<compile_context>
chip_gen: v7x
topology: tpu7x:2x2x1
jax: 0.10.0
libtpu: 0.0.40
codegen_flags: <defaults>
</compile_context>

<pallas_src>
import functools
import math

import jax
import jax.numpy as jnp
from jax.experimental import pallas as pl
from jax.experimental.pallas import tpu as pltpu


# --------------------------- VMEM / tiling policy ----------------------------

def _vmem_capacity_bytes():
    try:
        info = pltpu.get_tpu_info()
        cap = getattr(info, "vmem_capacity_bytes", None)
        if cap:
            return int(cap)
    except Exception:
        pass
    return 64 * 1024 * 1024      # conservative fallback (v7x per-core size)


_VMEM_CAP = _vmem_capacity_bytes()
_VMEM_LIMIT = min(_VMEM_CAP * 3 // 4, 96 * 1024 * 1024)   # 96MiB on 128MiB parts, 48MiB on v7x
_TILE_BUDGET = _VMEM_LIMIT // 2                           # double-buffered streamed working set


def _pick_tile(n, row_bytes, align=8):
    """Largest divisor of `n` that is a multiple of `align` and whose double-buffered
    streamed working set stays under _TILE_BUDGET.  Falls back to the full extent
    (always layout-legal)."""
    budget_rows = max(align, _TILE_BUDGET // max(1, 2 * row_bytes))
    cap = min(n, budget_rows)
    best = None
    for t in range(align, cap + 1, align):
        if n % t == 0:
            best = t
    return best if best is not None else n


def _const_spec(shape):
    nd = len(shape)
    return pl.BlockSpec(shape, lambda *_: (0,) * nd)


def _mm(a, b):
    return jnp.dot(a.astype(jnp.bfloat16), b.astype(jnp.bfloat16),
                   preferred_element_type=jnp.float32)


# ----------------------------- Pallas kernels -------------------------------

def _hbranch_kernel(x_ref, w1_ref, scale_ref, shift_ref, w2_ref, b2_ref, o_ref, xf_ref):
    # x_ref/o_ref: (thp, pixel, W, C) bf16  (batch dim squeezed by the BlockSpec).
    # Assemble the (thp*W, pixel*C) grouped feature lane-major in VMEM so the first
    # matmul runs with K = pixel*C (fills the 256-deep MXU on v6e/v7x).
    thp, px, W, C = x_ref.shape
    M = thp * W
    for p in range(px):                                   # static unroll, px is Python int
        xf_ref[:, p * C:(p + 1) * C] = x_ref[:, p].reshape(M, C)
    hid = jnp.dot(xf_ref[...], w1_ref[...], preferred_element_type=jnp.float32)
    hid = jnp.maximum(hid * scale_ref[...] + shift_ref[...], 0.0).astype(jnp.bfloat16)
    y = jnp.dot(hid, w2_ref[...], preferred_element_type=jnp.float32) + b2_ref[...]
    for p in range(px):
        o_ref[:, p] = y[:, p * C:(p + 1) * C].reshape(thp, W, C).astype(o_ref.dtype)


def _rowmlp_kernel(x_ref, w1_ref, scale_ref, shift_ref, w2_ref, b2_ref, o_ref):
    # fused Conv1x1 -> BN(folded) -> ReLU -> Conv1x1 on (tm, Cin) bf16 row tiles.
    hid = jnp.dot(x_ref[...], w1_ref[...], preferred_element_type=jnp.float32)
    hid = jnp.maximum(hid * scale_ref[...] + shift_ref[...], 0.0).astype(jnp.bfloat16)
    y = jnp.dot(hid, w2_ref[...], preferred_element_type=jnp.float32) + b2_ref[...]
    o_ref[...] = y.astype(o_ref.dtype)


def _mean_sum_kernel(x_ref, h_ref, w_ref, cw_ref, cb_ref, o_ref, acc_ref):
    # Per-batch grid axis 0 (parallel), spatial tile axis 1 (arbitrary, accumulates).
    # c is computed only for the running sum and never written back to HBM.
    t = pl.program_id(1)

    @pl.when(t == 0)
    def _():
        acc_ref[...] = jnp.zeros_like(acc_ref)

    c = jnp.dot(x_ref[...], cw_ref[...], preferred_element_type=jnp.float32) + cb_ref[...]
    s = h_ref[...].astype(jnp.float32) + w_ref[...].astype(jnp.float32) + c
    acc_ref[...] += jnp.sum(s, axis=0, keepdims=True)

    @pl.when(t == pl.num_programs(1) - 1)
    def _():
        o_ref[...] = acc_ref[...]


def _combine_proj_kernel(x_ref, h_ref, w_ref, attn_ref, cw_ref, cb_ref,
                         pw_ref, pb_ref, o_ref):
    # Recompute c on the fly (saves the (B,HW,C) HBM round trip), combine with the
    # per-batch attention weights, then apply the output projection.
    c = jnp.dot(x_ref[...], cw_ref[...], preferred_element_type=jnp.float32) + cb_ref[...]
    a = attn_ref[...]                                            # (3, C) f32
    y = (h_ref[...].astype(jnp.float32) * a[0:1, :]
         + w_ref[...].astype(jnp.float32) * a[1:2, :]
         + c * a[2:3, :])
    y = jnp.dot(y.astype(jnp.bfloat16), pw_ref[...],
                preferred_element_type=jnp.float32) + pb_ref[...]
    o_ref[...] = y.astype(o_ref.dtype)


# ----------------------------- kernel wrappers ------------------------------

def hbranch_pallas(hg, w1, scale, shift, w2, b2):
    B, Hp, px, W, C = hg.shape
    Ch = w1.shape[1]
    row_bytes = px * W * C * 2 * 2                    # bf16 in + bf16 out per Hp group
    align_h = 8 // math.gcd(W, 8)                     # keep thp*W a multiple of 8
    thp = _pick_tile(Hp, row_bytes, align=align_h)
    blk = pl.BlockSpec((None, thp, px, W, C), lambda b, i: (b, i, 0, 0, 0))
    return pl.pallas_call(
        _hbranch_kernel,
        out_shape=jax.ShapeDtypeStruct(hg.shape, hg.dtype),
        grid=(B, Hp // thp),
        in_specs=[blk,
                  _const_spec((px * C, Ch)),
                  _const_spec((1, Ch)),
                  _const_spec((1, Ch)),
                  _const_spec((Ch, px * C)),
                  _const_spec((1, px * C))],
        out_specs=blk,
        scratch_shapes=[pltpu.VMEM((thp * W, px * C), jnp.bfloat16)],
        compiler_params=pltpu.CompilerParams(
            dimension_semantics=("parallel", "parallel"),
            vmem_limit_bytes=_VMEM_LIMIT),
    )(hg, w1, scale.reshape(1, -1), shift.reshape(1, -1), w2, b2.reshape(1, -1))


def rowmlp_pallas(x_rows, w1, scale, shift, w2, b2):
    M, Cin = x_rows.shape
    Ch, Cout = w1.shape[1], w2.shape[1]
    tm = _pick_tile(M, (Cin + Cout) * 2, align=8)
    return pl.pallas_call(
        _rowmlp_kernel,
        out_shape=jax.ShapeDtypeStruct((M, Cout), x_rows.dtype),
        grid=(M // tm,),
        in_specs=[pl.BlockSpec((tm, Cin), lambda i: (i, 0)),
                  _const_spec((Cin, Ch)),
                  _const_spec((1, Ch)),
                  _const_spec((1, Ch)),
                  _const_spec((Ch, Cout)),
                  _const_spec((1, Cout))],
        out_specs=pl.BlockSpec((tm, Cout), lambda i: (i, 0)),
        compiler_params=pltpu.CompilerParams(
            dimension_semantics=("parallel",),
            vmem_limit_bytes=_VMEM_LIMIT),
    )(x_rows, w1, scale.reshape(1, -1), shift.reshape(1, -1), w2, b2.reshape(1, -1))


def mean_sum_pallas(x3, h3, w3, cw, cb):
    B, HW, C = x3.shape
    tr = _pick_tile(HW, 3 * C * 2, align=8)
    row = pl.BlockSpec((None, tr, C), lambda b, t: (b, t, 0))
    return pl.pallas_call(
        _mean_sum_kernel,
        out_shape=jax.ShapeDtypeStruct((B, 1, C), jnp.float32),
        grid=(B, HW // tr),
        in_specs=[row, row, row,
                  _const_spec((C, C)),
                  _const_spec((1, C))],
        out_specs=pl.BlockSpec((None, 1, C), lambda b, t: (b, 0, 0)),
        scratch_shapes=[pltpu.VMEM((1, C), jnp.float32)],
        compiler_params=pltpu.CompilerParams(
            dimension_semantics=("parallel", "arbitrary"),
            vmem_limit_bytes=_VMEM_LIMIT),
    )(x3, h3, w3, cw, cb.reshape(1, -1))


def combine_proj_pallas(x3, h3, w3, attn, cw, cb, pw, pb):
    B, HW, C = x3.shape
    tr = _pick_tile(HW, 3 * C * 2 + C * 4, align=8)
    row = pl.BlockSpec((None, tr, C), lambda b, t: (b, t, 0))
    return pl.pallas_call(
        _combine_proj_kernel,
        out_shape=jax.ShapeDtypeStruct((B, HW, C), jnp.float32),
        grid=(B, HW // tr),
        in_specs=[row, row, row,
                  pl.BlockSpec((None, 3, C), lambda b, t: (b, 0, 0)),
                  _const_spec((C, C)),
                  _const_spec((1, C)),
                  _const_spec((C, C)),
                  _const_spec((1, C))],
        out_specs=row,
        compiler_params=pltpu.CompilerParams(
            dimension_semantics=("parallel", "parallel"),
            vmem_limit_bytes=_VMEM_LIMIT),
    )(x3, h3, w3, attn, cw, cb.reshape(1, -1), pw, pb.reshape(1, -1))


# ------------------------------ HireMLP forward ------------------------------

def hire_mlp(x, p, pixel=2, step=1):
    """HireMLP forward (Pallas path).  x: (B, C, H, W) f32, NCHW in/out."""
    B, C, H, W = x.shape
    pad_h, pad_w = (-H) % pixel, (-W) % pixel
    Hp, Wp = (H + pad_h) // pixel, (W + pad_w) // pixel

    # Weights cast to bf16 once per call (not per grid step inside the kernels).
    bf = lambda a: a.astype(jnp.bfloat16)
    h1_w, h2_w = bf(p["h1_w"]), bf(p["h2_w"])
    w1_w, w2_w = bf(p["w1_w"]), bf(p["w2_w"])
    c_w, proj_w = bf(p["c_w"]), bf(p["proj_w"])

    xl = jnp.transpose(x, (0, 2, 3, 1)).astype(jnp.bfloat16)     # NHWC bf16, one pass

    # ---------------- h branch ----------------
    h_src = jnp.roll(xl, step, axis=1) if step else xl           # step_pad_mode == 'c'
    if pad_h:                                                    # pixel_pad_mode == 'c'
        h_src = jnp.pad(h_src, ((0, 0), (0, pad_h), (0, 0), (0, 0)), mode="wrap")
    hg = h_src.reshape(B, Hp, pixel, W, C)                       # free contiguous reshape
    h5 = hbranch_pallas(hg, h1_w, p["h1_scale"], p["h1_shift"], h2_w, p["h2_b"])
    h = h5.reshape(B, Hp * pixel, W, C)
    if pad_h:
        h = h[:, :H]
    if step:
        h = jnp.roll(h, -step, axis=1)

    # ---------------- w branch ----------------
    w_src = jnp.roll(xl, step, axis=2) if step else xl
    if pad_w:
        w_src = jnp.pad(w_src, ((0, 0), (0, 0), (0, pad_w), (0, 0)), mode="wrap")
    w_rows = w_src.reshape(B * H * Wp, pixel * C)                # free contiguous reshape
    w_rows = rowmlp_pallas(w_rows, w1_w, p["w1_scale"], p["w1_shift"], w2_w, p["w2_b"])
    w = w_rows.reshape(B, H, Wp * pixel, C)
    if pad_w:
        w = w[:, :, :W]
    if step:
        w = jnp.roll(w, -step, axis=2)

    # ---- spatial mean of (h + w + c) without writing c to HBM (kernel 3) ----
    HW = H * W
    x3 = xl.reshape(B, HW, C)
    h3 = h.reshape(B, HW, C)
    w3 = w.reshape(B, HW, C)
    sums = mean_sum_pallas(x3, h3, w3, c_w, p["c_b"])            # (B, 1, C) f32

    # ---- reweight MLP + 3-way softmax: tiny batched tail in plain XLA ----
    a = sums[:, 0] / HW                                          # (B, C)
    hid = jax.nn.gelu(_mm(a, p["rw1_w"]) + p["rw1_b"], approximate=False)
    logits = jnp.stack([_mm(hid, p["rw2_w"][k]) + p["rw2_b"][k] for k in range(3)])
    attn = jax.nn.softmax(logits, axis=0)                        # (3, B, C)
    attn = jnp.transpose(attn, (1, 0, 2))                        # (B, 3, C)

    # ---------------- combine + c recompute + output projection ----------------
    out3 = combine_proj_pallas(x3, h3, w3, attn, c_w, p["c_b"], proj_w, p["proj_b"])
    return jnp.transpose(out3.reshape(B, H, W, C), (0, 3, 1, 2)).astype(x.dtype)


# -------------------------- pure-JAX reference path -------------------------

def hire_mlp_ref(x, p, pixel=2, step=1):
    """Reference path.  Mirrors the kernel path's precision policy (bf16 MXU operands
    and bf16 storage of the h / w branch outputs) so the comparison isolates kernel
    correctness rather than bf16 rounding."""
    B, C, H, W = x.shape
    pad_h, pad_w = (-H) % pixel, (-W) % pixel
    Hp, Wp = (H + pad_h) // pixel, (W + pad_w) // pixel
    xl = jnp.transpose(x, (0, 2, 3, 1))

    def branch(feat, w1, scale, shift, w2, b2):
        hid = jnp.maximum(_mm(feat, w1) * scale + shift, 0.0)
        return _mm(hid, w2) + b2

    h_src = jnp.roll(xl, step, axis=1) if step else xl
    if pad_h:
        h_src = jnp.pad(h_src, ((0, 0), (0, pad_h), (0, 0), (0, 0)), mode="wrap")
    hf = (h_src.reshape(B, Hp, pixel, W, C)
          .transpose(0, 1, 3, 2, 4).reshape(B, Hp, W, pixel * C))
    ho = branch(hf, p["h1_w"], p["h1_scale"], p["h1_shift"], p["h2_w"], p["h2_b"])
    h = (ho.reshape(B, Hp, W, pixel, C).transpose(0, 1, 3, 2, 4)
         .reshape(B, Hp * pixel, W, C))[:, :H]
    if step:
        h = jnp.roll(h, -step, axis=1)
    h = h.astype(jnp.bfloat16).astype(jnp.float32)     # match kernel's bf16 intermediate

    w_src = jnp.roll(xl, step, axis=2) if step else xl
    if pad_w:
        w_src = jnp.pad(w_src, ((0, 0), (0, 0), (0, pad_w), (0, 0)), mode="wrap")
    wf = w_src.reshape(B, H, Wp, pixel * C)
    wo = branch(wf, p["w1_w"], p["w1_scale"], p["w1_shift"], p["w2_w"], p["w2_b"])
    w = wo.reshape(B, H, Wp * pixel, C)[:, :, :W]
    if step:
        w = jnp.roll(w, -step, axis=2)
    w = w.astype(jnp.bfloat16).astype(jnp.float32)     # match kernel's bf16 intermediate

    c = _mm(xl, p["c_w"]) + p["c_b"]

    a = jnp.mean(h + w + c, axis=(1, 2))                                 # (B, C)
    hid = jax.nn.gelu(_mm(a, p["rw1_w"]) + p["rw1_b"], approximate=False)
    logits = jnp.stack([_mm(hid, p["rw2_w"][k]) + p["rw2_b"][k] for k in range(3)])
    attn = jax.nn.softmax(logits, axis=0)                                # (3, B, C)

    out = (h * attn[0][:, None, None, :] + w * attn[1][:, None, None, :]
           + c * attn[2][:, None, None, :])
    out = _mm(out, p["proj_w"]) + p["proj_b"]
    return jnp.transpose(out, (0, 3, 1, 2))


# ------------------------------- parameters ---------------------------------

def init_params(key, dim, pixel):
    # 1x1 conv weights stored as (Cin, Cout) matrices; grouped C*pixel channel axes use
    # pixel-major ordering (p*C + c); BN running stats folded into (scale, shift).
    d2, d4, dp = dim // 2, dim // 4, dim * pixel
    keys = jax.random.split(key, 22)
    f32 = jnp.float32

    def nrm(k, shape, s=0.2):
        return s * jax.random.normal(k, shape, f32)

    def bn_fold(kg, kb, km, kv, n, eps=1e-5):
        gamma = 1.0 + 0.1 * jax.random.normal(kg, (n,), f32)
        beta = 0.1 * jax.random.normal(kb, (n,), f32)
        mean = 0.1 * jax.random.normal(km, (n,), f32)
        var = 1.0 + 0.1 * jnp.abs(jax.random.normal(kv, (n,), f32))
        scale = gamma / jnp.sqrt(var + eps)
        return scale, beta - mean * scale

    p = {}
    p["h1_w"] = nrm(keys[0], (dp, d2))
    p["h1_scale"], p["h1_shift"] = bn_fold(keys[1], keys[2], keys[3], keys[4], d2)
    p["h2_w"] = nrm(keys[5], (d2, dp))
    p["h2_b"] = nrm(keys[6], (dp,))
    p["w1_w"] = nrm(keys[7], (dp, d2))
    p["w1_scale"], p["w1_shift"] = bn_fold(keys[8], keys[9], keys[10], keys[11], d2)
    p["w2_w"] = nrm(keys[12], (d2, dp))
    p["w2_b"] = nrm(keys[13], (dp,))
    p["c_w"] = nrm(keys[14], (dim, dim))
    p["c_b"] = nrm(keys[15], (dim,))
    p["rw1_w"] = nrm(keys[16], (dim, d4))
    p["rw1_b"] = nrm(keys[17], (d4,))
    p["rw2_w"] = nrm(keys[18], (3, d4, dim))
    p["rw2_b"] = nrm(keys[19], (3, dim))
    p["proj_w"] = nrm(keys[20], (dim, dim))
    p["proj_b"] = nrm(keys[21], (dim,))
    return p


# ---------------------------------- main -------------------------------------

if __name__ == "__main__":
    B, C, H, W = 2, 128, 16, 16          # C=128 keeps every kernel output lane-dense
    pixel, step = 2, 1

    key = jax.random.PRNGKey(0)
    kx, kp = jax.random.split(key)
    x = jax.random.normal(kx, (B, C, H, W), jnp.float32)
    params = init_params(kp, C, pixel)

    fwd = jax.jit(functools.partial(hire_mlp, pixel=pixel, step=step))
    out = jax.block_until_ready(fwd(x, params))
    assert out.shape == (B, C, H, W)

    ref = jax.block_until_ready(hire_mlp_ref(x, params, pixel=pixel, step=step))
    max_err = float(jnp.max(jnp.abs(out - ref)))
    assert jnp.allclose(out, ref, rtol=2e-2, atol=2e-2), f"max abs err {max_err}"

    print("KERNEL_OK")
</pallas_src>

<mosaic_0001>
module attributes {stable_mosaic.version = 11 : i64} {
  func.func @_rowmlp_kernel(%arg0: i32, %arg1: memref<256x256xbf16, #tpu.memory_space<vmem>>, %arg2: memref<256x64xbf16, #tpu.memory_space<vmem>>, %arg3: memref<1x64xf32, #tpu.memory_space<vmem>>, %arg4: memref<1x64xf32, #tpu.memory_space<vmem>>, %arg5: memref<64x256xbf16, #tpu.memory_space<vmem>>, %arg6: memref<1x256xf32, #tpu.memory_space<vmem>>, %arg7: memref<256x256xbf16, #tpu.memory_space<vmem>>) attributes {dimension_semantics = [#tpu.dimension_semantics<parallel>], iteration_bounds = array<i64: 1>, scalar_prefetch = 0 : i64, scratch_operands = 0 : i64, tpu.core_type = #tpu.core_type<tc>, window_params = [{transform_indices = @transform_0, window_bounds = array<i64: 256, 256>}, {pipeline_mode = #tpu.pipeline_mode<synchronous>, transform_indices = @transform_1, window_bounds = array<i64: 256, 64>}, {pipeline_mode = #tpu.pipeline_mode<synchronous>, transform_indices = @transform_2, window_bounds = array<i64: 1, 64>}, {pipeline_mode = #tpu.pipeline_mode<synchronous>, transform_indices = @transform_3, window_bounds = array<i64: 1, 64>}, {pipeline_mode = #tpu.pipeline_mode<synchronous>, transform_indices = @transform_4, window_bounds = array<i64: 64, 256>}, {pipeline_mode = #tpu.pipeline_mode<synchronous>, transform_indices = @transform_5, window_bounds = array<i64: 1, 256>}, {transform_indices = @transform_6, window_bounds = array<i64: 256, 256>}]} {
    %c0 = arith.constant 0 : index
    %c0_0 = arith.constant 0 : index
    %0 = vector.load %arg1[%c0, %c0_0] : memref<256x256xbf16, #tpu.memory_space<vmem>>, vector<256x256xbf16>
    %c0_1 = arith.constant 0 : index
    %c0_2 = arith.constant 0 : index
    %1 = vector.load %arg2[%c0_1, %c0_2] : memref<256x64xbf16, #tpu.memory_space<vmem>>, vector<256x64xbf16>
    %cst = arith.constant dense<0.000000e+00> : vector<256x64xf32>
    %2 = tpu.matmul %0, %1, %cst {dimension_numbers = #tpu.dot_dimension_numbers<[1], [0], [0], [1], [0, 0, 1, 1], [], []>} : vector<256x256xbf16>, vector<256x64xbf16>, vector<256x64xf32> -> vector<256x64xf32>
    %c0_3 = arith.constant 0 : index
    %c0_4 = arith.constant 0 : index
    %3 = vector.load %arg3[%c0_3, %c0_4] : memref<1x64xf32, #tpu.memory_space<vmem>>, vector<1x64xf32>
    %4 = vector.broadcast %3 : vector<1x64xf32> to vector<256x64xf32>
    %5 = arith.mulf %2, %4 : vector<256x64xf32>
    %c0_5 = arith.constant 0 : index
    %c0_6 = arith.constant 0 : index
    %6 = vector.load %arg4[%c0_5, %c0_6] : memref<1x64xf32, #tpu.memory_space<vmem>>, vector<1x64xf32>
    %7 = vector.broadcast %6 : vector<1x64xf32> to vector<256x64xf32>
    %8 = arith.addf %5, %7 : vector<256x64xf32>
    %cst_7 = arith.constant 0.000000e+00 : f32
    %9 = vector.broadcast %cst_7 : f32 to vector<256x64xf32>
    %10 = arith.maximumf %8, %9 : vector<256x64xf32>
    %11 = arith.truncf %10 : vector<256x64xf32> to vector<256x64xbf16>
    %c0_8 = arith.constant 0 : index
    %c0_9 = arith.constant 0 : index
    %12 = vector.load %arg5[%c0_8, %c0_9] : memref<64x256xbf16, #tpu.memory_space<vmem>>, vector<64x256xbf16>
    %cst_10 = arith.constant dense<0.000000e+00> : vector<256x256xf32>
    %13 = tpu.matmul %11, %12, %cst_10 {dimension_numbers = #tpu.dot_dimension_numbers<[1], [0], [0], [1], [0, 0, 1, 1], [], []>} : vector<256x64xbf16>, vector<64x256xbf16>, vector<256x256xf32> -> vector<256x256xf32>
    %c0_11 = arith.constant 0 : index
    %c0_12 = arith.constant 0 : index
    %14 = vector.load %arg6[%c0_11, %c0_12] : memref<1x256xf32, #tpu.memory_space<vmem>>, vector<1x256xf32>
    %15 = vector.broadcast %14 : vector<1x256xf32> to vector<256x256xf32>
    %16 = arith.addf %13, %15 : vector<256x256xf32>
    %17 = arith.truncf %16 : vector<256x256xf32> to vector<256x256xbf16>
    %c0_13 = arith.constant 0 : index
    %c0_14 = arith.constant 0 : index
    %18 = vector.load %arg7[%c0_13, %c0_14] : memref<256x256xbf16, #tpu.memory_space<vmem>>, vector<256x256xbf16>
    tpu.vector_store %arg7[%c0_13, %c0_14], %17 {strides = array<i32>} : memref<256x256xbf16, #tpu.memory_space<vmem>>, vector<256x256xbf16>,
    return
  }
  func.func @transform_0(%arg0: i32) -> (i32, i32) {
    %c0_i32 = arith.constant 0 : i32
    %c0_i32_0 = arith.constant 0 : i32
    return %arg0, %c0_i32 : i32, i32
  }
  func.func @transform_1(%arg0: i32) -> (i32, i32) {
    %c0_i32 = arith.constant 0 : i32
    %c0_i32_0 = arith.constant 0 : i32
    %c0_i32_1 = arith.constant 0 : i32
    return %c0_i32, %c0_i32_0 : i32, i32
  }
  func.func @transform_2(%arg0: i32) -> (i32, i32) {
    %c0_i32 = arith.constant 0 : i32
    %c0_i32_0 = arith.constant 0 : i32
    %c0_i32_1 = arith.constant 0 : i32
    return %c0_i32, %c0_i32_0 : i32, i32
  }
  func.func @transform_3(%arg0: i32) -> (i32, i32) {
    %c0_i32 = arith.constant 0 : i32
    %c0_i32_0 = arith.constant 0 : i32
    %c0_i32_1 = arith.constant 0 : i32
    return %c0_i32, %c0_i32_0 : i32, i32
  }
  func.func @transform_4(%arg0: i32) -> (i32, i32) {
    %c0_i32 = arith.constant 0 : i32
    %c0_i32_0 = arith.constant 0 : i32
    %c0_i32_1 = arith.constant 0 : i32
    return %c0_i32, %c0_i32_0 : i32, i32
  }
  func.func @transform_5(%arg0: i32) -> (i32, i32) {
    %c0_i32 = arith.constant 0 : i32
    %c0_i32_0 = arith.constant 0 : i32
    %c0_i32_1 = arith.constant 0 : i32
    return %c0_i32, %c0_i32_0 : i32, i32
  }
  func.func @transform_6(%arg0: i32) -> (i32, i32) {
    %c0_i32 = arith.constant 0 : i32
    %c0_i32_0 = arith.constant 0 : i32
    return %arg0, %c0_i32 : i32, i32
  }
}

module attributes {stable_mosaic.version = 11 : i64} {
  func.func @_hbranch_kernel(%arg0: i32, %arg1: i32, %arg2: memref<1x8x2x16x128xbf16, #tpu.memory_space<vmem>>, %arg3: memref<256x64xbf16, #tpu.memory_space<vmem>>, %arg4: memref<1x64xf32, #tpu.memory_space<vmem>>, %arg5: memref<1x64xf32, #tpu.memory_space<vmem>>, %arg6: memref<64x256xbf16, #tpu.memory_space<vmem>>, %arg7: memref<1x256xf32, #tpu.memory_space<vmem>>, %arg8: memref<1x8x2x16x128xbf16, #tpu.memory_space<vmem>>, %arg9: memref<128x256xbf16, #tpu.memory_space<vmem>>) attributes {dimension_semantics = [#tpu.dimension_semantics<parallel>, #tpu.dimension_semantics<parallel>], iteration_bounds = array<i64: 2, 1>, scalar_prefetch = 0 : i64, scratch_operands = 1 : i64, tpu.core_type = #tpu.core_type<tc>, window_params = [{transform_indices = @transform_0, window_bounds = array<i64: 1, 8, 2, 16, 128>}, {pipeline_mode = #tpu.pipeline_mode<synchronous>, transform_indices = @transform_1, window_bounds = array<i64: 256, 64>}, {pipeline_mode = #tpu.pipeline_mode<synchronous>, transform_indices = @transform_2, window_bounds = array<i64: 1, 64>}, {pipeline_mode = #tpu.pipeline_mode<synchronous>, transform_indices = @transform_3, window_bounds = array<i64: 1, 64>}, {pipeline_mode = #tpu.pipeline_mode<synchronous>, transform_indices = @transform_4, window_bounds = array<i64: 64, 256>}, {pipeline_mode = #tpu.pipeline_mode<synchronous>, transform_indices = @transform_5, window_bounds = array<i64: 1, 256>}, {transform_indices = @transform_6, window_bounds = array<i64: 1, 8, 2, 16, 128>}]} {
    %c0 = arith.constant 0 : index
    %c0_0 = arith.constant 0 : index
    %c0_1 = arith.constant 0 : index
    %c0_2 = arith.constant 0 : index
    %c0_3 = arith.constant 0 : index
    %0 = vector.load %arg2[%c0, %c0_0, %c0_1, %c0_2, %c0_3] : memref<1x8x2x16x128xbf16, #tpu.memory_space<vmem>>, vector<1x8x1x16x128xbf16>
    %1 = vector.shape_cast %0 : vector<1x8x1x16x128xbf16> to vector<8x16x128xbf16>
    %2 = vector.shape_cast %1 : vector<8x16x128xbf16> to vector<128x128xbf16>
    %c0_4 = arith.constant 0 : index
    %c0_5 = arith.constant 0 : index
    %3 = vector.load %arg9[%c0_4, %c0_5] : memref<128x256xbf16, #tpu.memory_space<vmem>>, vector<128x128xbf16>
    tpu.vector_store %arg9[%c0_4, %c0_5], %2 {strides = array<i32>} : memref<128x256xbf16, #tpu.memory_space<vmem>>, vector<128x128xbf16>,
    %c0_6 = arith.constant 0 : index
    %c0_7 = arith.constant 0 : index
    %c1 = arith.constant 1 : index
    %c0_8 = arith.constant 0 : index
    %c0_9 = arith.constant 0 : index
    %4 = vector.load %arg2[%c0_6, %c0_7, %c1, %c0_8, %c0_9] : memref<1x8x2x16x128xbf16, #tpu.memory_space<vmem>>, vector<1x8x1x16x128xbf16>
    %5 = vector.shape_cast %4 : vector<1x8x1x16x128xbf16> to vector<8x16x128xbf16>
    %6 = vector.shape_cast %5 : vector<8x16x128xbf16> to vector<128x128xbf16>
    %c0_10 = arith.constant 0 : index
    %c128 = arith.constant 128 : index
    %7 = vector.load %arg9[%c0_10, %c128] : memref<128x256xbf16, #tpu.memory_space<vmem>>, vector<128x128xbf16>
    tpu.vector_store %arg9[%c0_10, %c128], %6 {strides = array<i32>} : memref<128x256xbf16, #tpu.memory_space<vmem>>, vector<128x128xbf16>,
    %c0_11 = arith.constant 0 : index
    %c0_12 = arith.constant 0 : index
    %8 = vector.load %arg9[%c0_11, %c0_12] : memref<128x256xbf16, #tpu.memory_space<vmem>>, vector<128x256xbf16>
    %c0_13 = arith.constant 0 : index
    %c0_14 = arith.constant 0 : index
    %9 = vector.load %arg3[%c0_13, %c0_14] : memref<256x64xbf16, #tpu.memory_space<vmem>>, vector<256x64xbf16>
    %cst = arith.constant dense<0.000000e+00> : vector<128x64xf32>
    %10 = tpu.matmul %8, %9, %cst {dimension_numbers = #tpu.dot_dimension_numbers<[1], [0], [0], [1], [0, 0, 1, 1], [], []>} : vector<128x256xbf16>, vector<256x64xbf16>, vector<128x64xf32> -> vector<128x64xf32>
    %c0_15 = arith.constant 0 : index
    %c0_16 = arith.constant 0 : index
    %11 = vector.load %arg4[%c0_15, %c0_16] : memref<1x64xf32, #tpu.memory_space<vmem>>, vector<1x64xf32>
    %12 = vector.broadcast %11 : vector<1x64xf32> to vector<128x64xf32>
    %13 = arith.mulf %10, %12 : vector<128x64xf32>
    %c0_17 = arith.constant 0 : index
    %c0_18 = arith.constant 0 : index
    %14 = vector.load %arg5[%c0_17, %c0_18] : memref<1x64xf32, #tpu.memory_space<vmem>>, vector<1x64xf32>
    %15 = vector.broadcast %14 : vector<1x64xf32> to vector<128x64xf32>
    %16 = arith.addf %13, %15 : vector<128x64xf32>
    %cst_19 = arith.constant 0.000000e+00 : f32
    %17 = vector.broadcast %cst_19 : f32 to vector<128x64xf32>
    %18 = arith.maximumf %16, %17 : vector<128x64xf32>
    %19 = arith.truncf %18 : vector<128x64xf32> to vector<128x64xbf16>
    %c0_20 = arith.constant 0 : index
    %c0_21 = arith.constant 0 : index
    %20 = vector.load %arg6[%c0_20, %c0_21] : memref<64x256xbf16, #tpu.memory_space<vmem>>, vector<64x256xbf16>
    %cst_22 = arith.constant dense<0.000000e+00> : vector<128x256xf32>
    %21 = tpu.matmul %19, %20, %cst_22 {dimension_numbers = #tpu.dot_dimension_numbers<[1], [0], [0], [1], [0, 0, 1, 1], [], []>} : vector<128x64xbf16>, vector<64x256xbf16>, vector<128x256xf32> -> vector<128x256xf32>
    %c0_23 = arith.constant 0 : index
    %c0_24 = arith.constant 0 : index
    %22 = vector.load %arg7[%c0_23, %c0_24] : memref<1x256xf32, #tpu.memory_space<vmem>>, vector<1x256xf32>
    %23 = vector.broadcast %22 : vector<1x256xf32> to vector<128x256xf32>
    %24 = arith.addf %21, %23 : vector<128x256xf32>
    %25 = vector.extract_strided_slice %24 {offsets = [0, 0], sizes = [128, 128], strides = [1, 1]} : vector<128x256xf32> to vector<128x128xf32>
    %26 = vector.shape_cast %25 : vector<128x128xf32> to vector<8x16x128xf32>
    %27 = arith.truncf %26 : vector<8x16x128xf32> to vector<8x16x128xbf16>
    %c0_25 = arith.constant 0 : index
    %c0_26 = arith.constant 0 : index
    %c0_27 = arith.constant 0 : index
    %c0_28 = arith.constant 0 : index
    %c0_29 = arith.constant 0 : index
    %28 = vector.load %arg8[%c0_25, %c0_26, %c0_27, %c0_28, %c0_29] : memref<1x8x2x16x128xbf16, #tpu.memory_space<vmem>>, vector<1x8x1x16x128xbf16>
    %29 = vector.shape_cast %28 : vector<1x8x1x16x128xbf16> to vector<8x16x128xbf16>
    %30 = vector.shape_cast %27 : vector<8x16x128xbf16> to vector<1x8x1x16x128xbf16>
    tpu.vector_store %arg8[%c0_25, %c0_26, %c0_27, %c0_28, %c0_29], %30 {strides = array<i32>} : memref<1x8x2x16x128xbf16, #tpu.memory_space<vmem>>, vector<1x8x1x16x128xbf16>,
    %31 = vector.extract_strided_slice %24 {offsets = [0, 128], sizes = [128, 128], strides = [1, 1]} : vector<128x256xf32> to vector<128x128xf32>
    %32 = vector.shape_cast %31 : vector<128x128xf32> to vector<8x16x128xf32>
    %33 = arith.truncf %32 : vector<8x16x128xf32> to vector<8x16x128xbf16>
    %c0_30 = arith.constant 0 : index
    %c0_31 = arith.constant 0 : index
    %c1_32 = arith.constant 1 : index
    %c0_33 = arith.constant 0 : index
    %c0_34 = arith.constant 0 : index
    %34 = vector.load %arg8[%c0_30, %c0_31, %c1_32, %c0_33, %c0_34] : memref<1x8x2x16x128xbf16, #tpu.memory_space<vmem>>, vector<1x8x1x16x128xbf16>
    %35 = vector.shape_cast %34 : vector<1x8x1x16x128xbf16> to vector<8x16x128xbf16>
    %36 = vector.shape_cast %33 : vector<8x16x128xbf16> to vector<1x8x1x16x128xbf16>
    tpu.vector_store %arg8[%c0_30, %c0_31, %c1_32, %c0_33, %c0_34], %36 {strides = array<i32>} : memref<1x8x2x16x128xbf16, #tpu.memory_space<vmem>>, vector<1x8x1x16x128xbf16>,
    return
  }
  func.func @transform_0(%arg0: i32, %arg1: i32) -> (i32, i32, i32, i32, i32) {
    %c0_i32 = arith.constant 0 : i32
    %c0_i32_0 = arith.constant 0 : i32
    %c0_i32_1 = arith.constant 0 : i32
    %c0_i32_2 = arith.constant 0 : i32
    return %arg0, %arg1, %c0_i32, %c0_i32_0, %c0_i32_1 : i32, i32, i32, i32, i32
  }
  func.func @transform_1(%arg0: i32, %arg1: i32) -> (i32, i32) {
    %c0_i32 = arith.constant 0 : i32
    %c0_i32_0 = arith.constant 0 : i32
    %c0_i32_1 = arith.constant 0 : i32
    return %c0_i32, %c0_i32_0 : i32, i32
  }
  func.func @transform_2(%arg0: i32, %arg1: i32) -> (i32, i32) {
    %c0_i32 = arith.constant 0 : i32
    %c0_i32_0 = arith.constant 0 : i32
    %c0_i32_1 = arith.constant 0 : i32
    return %c0_i32, %c0_i32_0 : i32, i32
  }
  func.func @transform_3(%arg0: i32, %arg1: i32) -> (i32, i32) {
    %c0_i32 = arith.constant 0 : i32
    %c0_i32_0 = arith.constant 0 : i32
    %c0_i32_1 = arith.constant 0 : i32
    return %c0_i32, %c0_i32_0 : i32, i32
  }
  func.func @transform_4(%arg0: i32, %arg1: i32) -> (i32, i32) {
    %c0_i32 = arith.constant 0 : i32
    %c0_i32_0 = arith.constant 0 : i32
    %c0_i32_1 = arith.constant 0 : i32
    return %c0_i32, %c0_i32_0 : i32, i32
  }
  func.func @transform_5(%arg0: i32, %arg1: i32) -> (i32, i32) {
    %c0_i32 = arith.constant 0 : i32
    %c0_i32_0 = arith.constant 0 : i32
    %c0_i32_1 = arith.constant 0 : i32
    return %c0_i32, %c0_i32_0 : i32, i32
  }
  func.func @transform_6(%arg0: i32, %arg1: i32) -> (i32, i32, i32, i32, i32) {
    %c0_i32 = arith.constant 0 : i32
    %c0_i32_0 = arith.constant 0 : i32
    %c0_i32_1 = arith.constant 0 : i32
    %c0_i32_2 = arith.constant 0 : i32
    return %arg0, %arg1, %c0_i32, %c0_i32_0, %c0_i32_1 : i32, i32, i32, i32, i32
  }
}

module attributes {stable_mosaic.version = 11 : i64} {
  func.func @_mean_sum_kernel(%arg0: i32, %arg1: i32, %arg2: memref<1x256x128xbf16, #tpu.memory_space<vmem>>, %arg3: memref<1x256x128xbf16, #tpu.memory_space<vmem>>, %arg4: memref<1x256x128xbf16, #tpu.memory_space<vmem>>, %arg5: memref<128x128xbf16, #tpu.memory_space<vmem>>, %arg6: memref<1x128xf32, #tpu.memory_space<vmem>>, %arg7: memref<1x1x128xf32, #tpu.memory_space<vmem>>, %arg8: memref<1x128xf32, #tpu.memory_space<vmem>>) attributes {dimension_semantics = [#tpu.dimension_semantics<parallel>, #tpu.dimension_semantics<arbitrary>], iteration_bounds = array<i64: 2, 1>, scalar_prefetch = 0 : i64, scratch_operands = 1 : i64, tpu.core_type = #tpu.core_type<tc>, window_params = [{transform_indices = @transform_0, window_bounds = array<i64: 1, 256, 128>}, {transform_indices = @transform_1, window_bounds = array<i64: 1, 256, 128>}, {transform_indices = @transform_2, window_bounds = array<i64: 1, 256, 128>}, {pipeline_mode = #tpu.pipeline_mode<synchronous>, transform_indices = @transform_3, window_bounds = array<i64: 128, 128>}, {pipeline_mode = #tpu.pipeline_mode<synchronous>, transform_indices = @transform_4, window_bounds = array<i64: 1, 128>}, {transform_indices = @transform_5, window_bounds = array<i64: 1, 1, 128>}]} {
    %c0_i32 = arith.constant 0 : i32
    %0 = arith.cmpi eq, %arg1, %c0_i32 : i32
    %1 = arith.extui %0 : i1 to i32
    %c0_i32_0 = arith.constant 0 : i32
    %2 = arith.cmpi ne, %1, %c0_i32_0 : i32
    scf.if %2 {
      %cst_20 = arith.constant 0.000000e+00 : f32
      %26 = vector.broadcast %cst_20 : f32 to vector<1x128xf32>
      %c0_21 = arith.constant 0 : index
      %c0_22 = arith.constant 0 : index
      %27 = vector.load %arg8[%c0_21, %c0_22] : memref<1x128xf32, #tpu.memory_space<vmem>>, vector<1x128xf32>
      tpu.vector_store %arg8[%c0_21, %c0_22], %26 {strides = array<i32>} : memref<1x128xf32, #tpu.memory_space<vmem>>, vector<1x128xf32>,
    } else {
    }
    %c0 = arith.constant 0 : index
    %c0_1 = arith.constant 0 : index
    %c0_2 = arith.constant 0 : index
    %3 = vector.load %arg2[%c0, %c0_1, %c0_2] : memref<1x256x128xbf16, #tpu.memory_space<vmem>>, vector<1x256x128xbf16>
    %4 = vector.shape_cast %3 : vector<1x256x128xbf16> to vector<256x128xbf16>
    %c0_3 = arith.constant 0 : index
    %c0_4 = arith.constant 0 : index
    %5 = vector.load %arg5[%c0_3, %c0_4] : memref<128x128xbf16, #tpu.memory_space<vmem>>, vector<128x128xbf16>
    %cst = arith.constant dense<0.000000e+00> : vector<256x128xf32>
    %6 = tpu.matmul %4, %5, %cst {dimension_numbers = #tpu.dot_dimension_numbers<[1], [0], [0], [1], [0, 0, 1, 1], [], []>} : vector<256x128xbf16>, vector<128x128xbf16>, vector<256x128xf32> -> vector<256x128xf32>
    %c0_5 = arith.constant 0 : index
    %c0_6 = arith.constant 0 : index
    %7 = vector.load %arg6[%c0_5, %c0_6] : memref<1x128xf32, #tpu.memory_space<vmem>>, vector<1x128xf32>
    %8 = vector.broadcast %7 : vector<1x128xf32> to vector<256x128xf32>
    %9 = arith.addf %6, %8 : vector<256x128xf32>
    %c0_7 = arith.constant 0 : index
    %c0_8 = arith.constant 0 : index
    %c0_9 = arith.constant 0 : index
    %10 = vector.load %arg3[%c0_7, %c0_8, %c0_9] : memref<1x256x128xbf16, #tpu.memory_space<vmem>>, vector<1x256x128xbf16>
    %11 = vector.shape_cast %10 : vector<1x256x128xbf16> to vector<256x128xbf16>
    %12 = arith.extf %11 : vector<256x128xbf16> to vector<256x128xf32>
    %c0_10 = arith.constant 0 : index
    %c0_11 = arith.constant 0 : index
    %c0_12 = arith.constant 0 : index
    %13 = vector.load %arg4[%c0_10, %c0_11, %c0_12] : memref<1x256x128xbf16, #tpu.memory_space<vmem>>, vector<1x256x128xbf16>
    %14 = vector.shape_cast %13 : vector<1x256x128xbf16> to vector<256x128xbf16>
    %15 = arith.extf %14 : vector<256x128xbf16> to vector<256x128xf32>
    %16 = arith.addf %12, %15 : vector<256x128xf32>
    %17 = arith.addf %16, %9 : vector<256x128xf32>
    %c0_13 = arith.constant 0 : index
    %c0_14 = arith.constant 0 : index
    %18 = vector.load %arg8[%c0_13, %c0_14] : memref<1x128xf32, #tpu.memory_space<vmem>>, vector<1x128xf32>
    %cst_15 = arith.constant dense<0.000000e+00> : vector<128xf32>
    %19 = vector.multi_reduction <add>, %17, %cst_15 [0] : vector<256x128xf32> to vector<128xf32>
    %20 = vector.shape_cast %19 : vector<128xf32> to vector<1x128xf32>
    %21 = arith.addf %18, %20 : vector<1x128xf32>
    %c0_16 = arith.constant 0 : index
    %c0_17 = arith.constant 0 : index
    %22 = vector.load %arg8[%c0_16, %c0_17] : memref<1x128xf32, #tpu.memory_space<vmem>>, vector<1x128xf32>
    tpu.vector_store %arg8[%c0_16, %c0_17], %21 {strides = array<i32>} : memref<1x128xf32, #tpu.memory_space<vmem>>, vector<1x128xf32>,
    %c0_i32_18 = arith.constant 0 : i32
    %23 = arith.cmpi eq, %arg1, %c0_i32_18 : i32
    %24 = arith.extui %23 : i1 to i32
    %c0_i32_19 = arith.constant 0 : i32
    %25 = arith.cmpi ne, %24, %c0_i32_19 : i32
    scf.if %25 {
      %c0_20 = arith.constant 0 : index
      %c0_21 = arith.constant 0 : index
      %26 = vector.load %arg8[%c0_20, %c0_21] : memref<1x128xf32, #tpu.memory_space<vmem>>, vector<1x128xf32>
      %c0_22 = arith.constant 0 : index
      %c0_23 = arith.constant 0 : index
      %c0_24 = arith.constant 0 : index
      %27 = vector.load %arg7[%c0_22, %c0_23, %c0_24] : memref<1x1x128xf32, #tpu.memory_space<vmem>>, vector<1x1x128xf32>
      %28 = vector.shape_cast %27 : vector<1x1x128xf32> to vector<1x128xf32>
      %29 = vector.shape_cast %26 : vector<1x128xf32> to vector<1x1x128xf32>
      tpu.vector_store %arg7[%c0_22, %c0_23, %c0_24], %29 {strides = array<i32>} : memref<1x1x128xf32, #tpu.memory_space<vmem>>, vector<1x1x128xf32>,
    } else {
    }
    return
  }
  func.func @transform_0(%arg0: i32, %arg1: i32) -> (i32, i32, i32) {
    %c0_i32 = arith.constant 0 : i32
    %c0_i32_0 = arith.constant 0 : i32
    return %arg0, %arg1, %c0_i32 : i32, i32, i32
  }
  func.func @transform_1(%arg0: i32, %arg1: i32) -> (i32, i32, i32) {
    %c0_i32 = arith.constant 0 : i32
    %c0_i32_0 = arith.constant 0 : i32
    return %arg0, %arg1, %c0_i32 : i32, i32, i32
  }
  func.func @transform_2(%arg0: i32, %arg1: i32) -> (i32, i32, i32) {
    %c0_i32 = arith.constant 0 : i32
    %c0_i32_0 = arith.constant 0 : i32
    return %arg0, %arg1, %c0_i32 : i32, i32, i32
  }
  func.func @transform_3(%arg0: i32, %arg1: i32) -> (i32, i32) {
    %c0_i32 = arith.constant 0 : i32
    %c0_i32_0 = arith.constant 0 : i32
    %c0_i32_1 = arith.constant 0 : i32
    return %c0_i32, %c0_i32_0 : i32, i32
  }
  func.func @transform_4(%arg0: i32, %arg1: i32) -> (i32, i32) {
    %c0_i32 = arith.constant 0 : i32
    %c0_i32_0 = arith.constant 0 : i32
    %c0_i32_1 = arith.constant 0 : i32
    return %c0_i32, %c0_i32_0 : i32, i32
  }
  func.func @transform_5(%arg0: i32, %arg1: i32) -> (i32, i32, i32) {
    %c0_i32 = arith.constant 0 : i32
    %c0_i32_0 = arith.constant 0 : i32
    %c0_i32_1 = arith.constant 0 : i32
    return %arg0, %c0_i32, %c0_i32_0 : i32, i32, i32
  }
}

module attributes {stable_mosaic.version = 11 : i64} {
  func.func @_combine_proj_kernel(%arg0: i32, %arg1: i32, %arg2: memref<1x256x128xbf16, #tpu.memory_space<vmem>>, %arg3: memref<1x256x128xbf16, #tpu.memory_space<vmem>>, %arg4: memref<1x256x128xbf16, #tpu.memory_space<vmem>>, %arg5: memref<1x3x128xf32, #tpu.memory_space<vmem>>, %arg6: memref<128x128xbf16, #tpu.memory_space<vmem>>, %arg7: memref<1x128xf32, #tpu.memory_space<vmem>>, %arg8: memref<128x128xbf16, #tpu.memory_space<vmem>>, %arg9: memref<1x128xf32, #tpu.memory_space<vmem>>, %arg10: memref<1x256x128xf32, #tpu.memory_space<vmem>>) attributes {dimension_semantics = [#tpu.dimension_semantics<parallel>, #tpu.dimension_semantics<parallel>], iteration_bounds = array<i64: 2, 1>, scalar_prefetch = 0 : i64, scratch_operands = 0 : i64, tpu.core_type = #tpu.core_type<tc>, window_params = [{transform_indices = @transform_0, window_bounds = array<i64: 1, 256, 128>}, {transform_indices = @transform_1, window_bounds = array<i64: 1, 256, 128>}, {transform_indices = @transform_2, window_bounds = array<i64: 1, 256, 128>}, {transform_indices = @transform_3, window_bounds = array<i64: 1, 3, 128>}, {pipeline_mode = #tpu.pipeline_mode<synchronous>, transform_indices = @transform_4, window_bounds = array<i64: 128, 128>}, {pipeline_mode = #tpu.pipeline_mode<synchronous>, transform_indices = @transform_5, window_bounds = array<i64: 1, 128>}, {pipeline_mode = #tpu.pipeline_mode<synchronous>, transform_indices = @transform_6, window_bounds = array<i64: 128, 128>}, {pipeline_mode = #tpu.pipeline_mode<synchronous>, transform_indices = @transform_7, window_bounds = array<i64: 1, 128>}, {transform_indices = @transform_8, window_bounds = array<i64: 1, 256, 128>}]} {
    %c0 = arith.constant 0 : index
    %c0_0 = arith.constant 0 : index
    %c0_1 = arith.constant 0 : index
    %0 = vector.load %arg2[%c0, %c0_0, %c0_1] : memref<1x256x128xbf16, #tpu.memory_space<vmem>>, vector<1x256x128xbf16>
    %1 = vector.shape_cast %0 : vector<1x256x128xbf16> to vector<256x128xbf16>
    %c0_2 = arith.constant 0 : index
    %c0_3 = arith.constant 0 : index
    %2 = vector.load %arg6[%c0_2, %c0_3] : memref<128x128xbf16, #tpu.memory_space<vmem>>, vector<128x128xbf16>
    %cst = arith.constant dense<0.000000e+00> : vector<256x128xf32>
    %3 = tpu.matmul %1, %2, %cst {dimension_numbers = #tpu.dot_dimension_numbers<[1], [0], [0], [1], [0, 0, 1, 1], [], []>} : vector<256x128xbf16>, vector<128x128xbf16>, vector<256x128xf32> -> vector<256x128xf32>
    %c0_4 = arith.constant 0 : index
    %c0_5 = arith.constant 0 : index
    %4 = vector.load %arg7[%c0_4, %c0_5] : memref<1x128xf32, #tpu.memory_space<vmem>>, vector<1x128xf32>
    %5 = vector.broadcast %4 : vector<1x128xf32> to vector<256x128xf32>
    %6 = arith.addf %3, %5 : vector<256x128xf32>
    %c0_6 = arith.constant 0 : index
    %c0_7 = arith.constant 0 : index
    %c0_8 = arith.constant 0 : index
    %7 = vector.load %arg5[%c0_6, %c0_7, %c0_8] : memref<1x3x128xf32, #tpu.memory_space<vmem>>, vector<1x3x128xf32>
    %8 = vector.shape_cast %7 : vector<1x3x128xf32> to vector<3x128xf32>
    %c0_9 = arith.constant 0 : index
    %c0_10 = arith.constant 0 : index
    %c0_11 = arith.constant 0 : index
    %9 = vector.load %arg3[%c0_9, %c0_10, %c0_11] : memref<1x256x128xbf16, #tpu.memory_space<vmem>>, vector<1x256x128xbf16>
    %10 = vector.shape_cast %9 : vector<1x256x128xbf16> to vector<256x128xbf16>
    %11 = arith.extf %10 : vector<256x128xbf16> to vector<256x128xf32>
    %12 = vector.extract_strided_slice %8 {offsets = [0, 0], sizes = [1, 128], strides = [1, 1]} : vector<3x128xf32> to vector<1x128xf32>
    %13 = vector.broadcast %12 : vector<1x128xf32> to vector<256x128xf32>
    %14 = arith.mulf %11, %13 : vector<256x128xf32>
    %c0_12 = arith.constant 0 : index
    %c0_13 = arith.constant 0 : index
    %c0_14 = arith.constant 0 : index
    %15 = vector.load %arg4[%c0_12, %c0_13, %c0_14] : memref<1x256x128xbf16, #tpu.memory_space<vmem>>, vector<1x256x128xbf16>
    %16 = vector.shape_cast %15 : vector<1x256x128xbf16> to vector<256x128xbf16>
    %17 = arith.extf %16 : vector<256x128xbf16> to vector<256x128xf32>
    %18 = vector.extract_strided_slice %8 {offsets = [1, 0], sizes = [1, 128], strides = [1, 1]} : vector<3x128xf32> to vector<1x128xf32>
    %19 = vector.broadcast %18 : vector<1x128xf32> to vector<256x128xf32>
    %20 = arith.mulf %17, %19 : vector<256x128xf32>
    %21 = arith.addf %14, %20 : vector<256x128xf32>
    %22 = vector.extract_strided_slice %8 {offsets = [2, 0], sizes = [1, 128], strides = [1, 1]} : vector<3x128xf32> to vector<1x128xf32>
    %23 = vector.broadcast %22 : vector<1x128xf32> to vector<256x128xf32>
    %24 = arith.mulf %6, %23 : vector<256x128xf32>
    %25 = arith.addf %21, %24 : vector<256x128xf32>
    %26 = arith.truncf %25 : vector<256x128xf32> to vector<256x128xbf16>
    %c0_15 = arith.constant 0 : index
    %c0_16 = arith.constant 0 : index
    %27 = vector.load %arg8[%c0_15, %c0_16] : memref<128x128xbf16, #tpu.memory_space<vmem>>, vector<128x128xbf16>
    %cst_17 = arith.constant dense<0.000000e+00> : vector<256x128xf32>
    %28 = tpu.matmul %26, %27, %cst_17 {dimension_numbers = #tpu.dot_dimension_numbers<[1], [0], [0], [1], [0, 0, 1, 1], [], []>} : vector<256x128xbf16>, vector<128x128xbf16>, vector<256x128xf32> -> vector<256x128xf32>
    %c0_18 = arith.constant 0 : index
    %c0_19 = arith.constant 0 : index
    %29 = vector.load %arg9[%c0_18, %c0_19] : memref<1x128xf32, #tpu.memory_space<vmem>>, vector<1x128xf32>
    %30 = vector.broadcast %29 : vector<1x128xf32> to vector<256x128xf32>
    %31 = arith.addf %28, %30 : vector<256x128xf32>
    %c0_20 = arith.constant 0 : index
    %c0_21 = arith.constant 0 : index
    %c0_22 = arith.constant 0 : index
    %32 = vector.load %arg10[%c0_20, %c0_21, %c0_22] : memref<1x256x128xf32, #tpu.memory_space<vmem>>, vector<1x256x128xf32>
    %33 = vector.shape_cast %32 : vector<1x256x128xf32> to vector<256x128xf32>
    %34 = vector.shape_cast %31 : vector<256x128xf32> to vector<1x256x128xf32>
    tpu.vector_store %arg10[%c0_20, %c0_21, %c0_22], %34 {strides = array<i32>} : memref<1x256x128xf32, #tpu.memory_space<vmem>>, vector<1x256x128xf32>,
    return
  }
  func.func @transform_0(%arg0: i32, %arg1: i32) -> (i32, i32, i32) {
    %c0_i32 = arith.constant 0 : i32
    %c0_i32_0 = arith.constant 0 : i32
    return %arg0, %arg1, %c0_i32 : i32, i32, i32
  }
  func.func @transform_1(%arg0: i32, %arg1: i32) -> (i32, i32, i32) {
    %c0_i32 = arith.constant 0 : i32
    %c0_i32_0 = arith.constant 0 : i32
    return %arg0, %arg1, %c0_i32 : i32, i32, i32
  }
  func.func @transform_2(%arg0: i32, %arg1: i32) -> (i32, i32, i32) {
    %c0_i32 = arith.constant 0 : i32
    %c0_i32_0 = arith.constant 0 : i32
    return %arg0, %arg1, %c0_i32 : i32, i32, i32
  }
  func.func @transform_3(%arg0: i32, %arg1: i32) -> (i32, i32, i32) {
    %c0_i32 = arith.constant 0 : i32
    %c0_i32_0 = arith.constant 0 : i32
    %c0_i32_1 = arith.constant 0 : i32
    return %arg0, %c0_i32, %c0_i32_0 : i32, i32, i32
  }
  func.func @transform_4(%arg0: i32, %arg1: i32) -> (i32, i32) {
    %c0_i32 = arith.constant 0 : i32
    %c0_i32_0 = arith.constant 0 : i32
    %c0_i32_1 = arith.constant 0 : i32
    return %c0_i32, %c0_i32_0 : i32, i32
  }
  func.func @transform_5(%arg0: i32, %arg1: i32) -> (i32, i32) {
    %c0_i32 = arith.constant 0 : i32
    %c0_i32_0 = arith.constant 0 : i32
    %c0_i32_1 = arith.constant 0 : i32
    return %c0_i32, %c0_i32_0 : i32, i32
  }
  func.func @transform_6(%arg0: i32, %arg1: i32) -> (i32, i32) {
    %c0_i32 = arith.constant 0 : i32
    %c0_i32_0 = arith.constant 0 : i32
    %c0_i32_1 = arith.constant 0 : i32
    return %c0_i32, %c0_i32_0 : i32, i32
  }
  func.func @transform_7(%arg0: i32, %arg1: i32) -> (i32, i32) {
    %c0_i32 = arith.constant 0 : i32
    %c0_i32_0 = arith.constant 0 : i32
    %c0_i32_1 = arith.constant 0 : i32
    return %c0_i32, %c0_i32_0 : i32, i32
  }
  func.func @transform_8(%arg0: i32, %arg1: i32) -> (i32, i32, i32) {
    %c0_i32 = arith.constant 0 : i32
    %c0_i32_0 = arith.constant 0 : i32
    return %arg0, %arg1, %c0_i32 : i32, i32, i32
  }
}

</mosaic_0001>

<bundles_post_ra>
// kernel: hire_mlp.5
= control target key start
LH: loop header
LB: loop body
LE: loop exit
PB: predicated region body
PF: predicated region fallthrough
CT: control target
= control target key end

     0   :  { %v1488_v51 = vmov 0   ;;  %vm691_vm0 = vcmask 523264   ;;  %s1965_s1 = inlined_call_operand.vmem [shape: bf16[256,64], index: 1, kind: input, shape index: {}]   ;;  %s1966_s0 = inlined_call_operand.vmem [shape: bf16[256,256], index: 0, kind: input, shape index: {}]   ;;  %s1967_s4 = inlined_call_operand.vmem [shape: bf16[64,256], index: 4, kind: input, shape index: {}]   ;;  %s1968_s2 = inlined_call_operand.vmem [shape: f32[1,64], index: 2, kind: input, shape index: {}]   ;;  %s1969_s3 = inlined_call_operand.vmem [shape: f32[1,64], index: 3, kind: input, shape index: {}]   ;;  %s1970_s5 = inlined_call_operand.vmem [shape: f32[1,256], index: 5, kind: input, shape index: {}]   ;;  %s1971_s6 = inlined_call_operand.vmem [shape: bf16[256,256], index: 6, kind: output, shape index: {}]  }
   0x1   :  { %v1412_v0 = vld [vmem:[%s1965_s1 + $0x40] sm:$0xff]   ;;  %v1414_v2 = vld [vmem:[%s1965_s1 + $0x48] sm:$0xff]   ;;  %v1416_v4 = vld [vmem:[%s1965_s1 + $0x50] sm:$0xff]   ;;  %772 = vmatprep.mubr.bf16.mxu1 %v1488_v51 }
   0x2   :  { %v1413_v1 = vld [vmem:[%s1965_s1] sm:$0xff]   ;;  %1299 = vmatprep.subr.bf16.mxu0 %v1412_v0  ;;  %v1415_v3 = vld [vmem:[%s1965_s1 + $0x8] sm:$0xff]   ;;  %v1417_v5 = vld [vmem:[%s1965_s1 + $0x10] sm:$0xff]  }
   0x3   :  { %1300 = vmatpush3.bf16.msra.mxu0 %v1413_v1  ;;  %v1418_v6 = vld [vmem:[%s1965_s1 + $0x58] sm:$0xff]   ;;  %v1420_v8 = vld [vmem:[%s1965_s1 + $0x60] sm:$0xff]   ;;  %v1422_v10 = vld [vmem:[%s1965_s1 + $0x68] sm:$0xff]  }
   0x4   :  { %1301 = vmatprep.subr.bf16.mxu0 %v1414_v2  ;;  %v1419_v7 = vld [vmem:[%s1965_s1 + $0x18] sm:$0xff]   ;;  %v1421_v9 = vld [vmem:[%s1965_s1 + $0x20] sm:$0xff]   ;;  %v1423_v12 = vld [vmem:[%s1965_s1 + $0x28] sm:$0xff]  }
   0x5   :  { %v1430_v11 = vld [vmem:[%s1966_s0 + $0x4] ss:$8 sps:$4 sm:$0xff]   ;;  %v1424_v13 = vld [vmem:[%s1965_s1 + $0x70] sm:$0xff]   ;;  %v1426_v15 = vld [vmem:[%s1965_s1 + $0x78] sm:$0xff]  }
   0x6   :  { %376 = vmatprep.mubr.bf16.mxu0 %v1430_v11  ;;  %v1425_v14 = vld [vmem:[%s1965_s1 + $0x30] sm:$0xff]   ;;  %v1427_v16 = vld [vmem:[%s1965_s1 + $0x38] sm:$0xff]   ;;  %v1428_v17 = vld [vmem:[%s1966_s0] ss:$8 sps:$4 sm:$0xff]  }
   0x7   :  { %1302 = vmatpush3.bf16.msra.mxu0 %v1415_v3  ;;  %v1431_v18 = vld [vmem:[%s1966_s0 + $0x14] ss:$8 sps:$4 sm:$0xff]   ;;  %v1433_v19 = vld [vmem:[%s1966_s0 + $0x10] ss:$8 sps:$4 sm:$0xff]   ;;  %v1434_v20 = vld [vmem:[%s1966_s0 + $0x24] ss:$8 sps:$4 sm:$0xff]  }
   0x8   :  { %1303 = vmatprep.subr.bf16.mxu0 %v1416_v4  ;;  %v1476_v21 = vld [vmem:[%s1967_s4 + $0x4] ss:$8 sps:$4 sm:$0xff]   ;;  %v1478_v22 = vld [vmem:[%s1967_s4] ss:$8 sps:$4 sm:$0xff]   ;;  %v1437_v24 = vld [vmem:[%s1966_s0 + $0x34] ss:$8 sps:$4 sm:$0xff]  }
   0x9   :  { %740 = vmatprep.subr.bf16.mxu1 %v1476_v21  ;;  %v1436_v23 = vld [vmem:[%s1966_s0 + $0x20] ss:$8 sps:$4 sm:$0xff]   ;;  %v1439_v25 = vld [vmem:[%s1966_s0 + $0x30] ss:$8 sps:$4 sm:$0xff]   ;;  %v1440_v26 = vld [vmem:[%s1966_s0 + $0x44] ss:$8 sps:$4 sm:$0xff]  }
   0xa   :  { %741 = vmatpush1.bf16.msra.mxu1 %v1478_v22  ;;  %v1442_v27 = vld [vmem:[%s1966_s0 + $0x40] ss:$8 sps:$4 sm:$0xff]   ;;  %v1443_v28 = vld [vmem:[%s1966_s0 + $0x54] ss:$8 sps:$4 sm:$0xff]   ;;  %v1445_v29 = vld [vmem:[%s1966_s0 + $0x50] ss:$8 sps:$4 sm:$0xff]  }
   0xb   :  { %1304 = vmatpush3.bf16.msra.mxu0 %v1417_v5  ;;  %v1446_v30 = vld [vmem:[%s1966_s0 + $0x64] ss:$8 sps:$4 sm:$0xff]   ;;  %v1448_v31 = vld [vmem:[%s1966_s0 + $0x60] ss:$8 sps:$4 sm:$0xff]   ;;  %v1449_v32 = vld [vmem:[%s1966_s0 + $0x74] ss:$8 sps:$4 sm:$0xff]  }
   0xc   :  { %1305 = vmatprep.subr.bf16.mxu0 %v1418_v6  ;;  %v1451_v33 = vld [vmem:[%s1966_s0 + $0x70] ss:$8 sps:$4 sm:$0xff]   ;;  %v1452_v34 = vld [vmem:[%s1966_s0 + $0x84] ss:$8 sps:$4 sm:$0xff]   ;;  %v1454_v35 = vld [vmem:[%s1966_s0 + $0x80] ss:$8 sps:$4 sm:$0xff]  }
   0xd   :  { %v1455_v36 = vld [vmem:[%s1966_s0 + $0x94] ss:$8 sps:$4 sm:$0xff]   ;;  %v1457_v37 = vld [vmem:[%s1966_s0 + $0x90] ss:$8 sps:$4 sm:$0xff]   ;;  %v1458_v38 = vld [vmem:[%s1966_s0 + $0xa4] ss:$8 sps:$4 sm:$0xff]  }
   0xe   :  { %v1460_v39 = vld [vmem:[%s1966_s0 + $0xa0] ss:$8 sps:$4 sm:$0xff]   ;;  %v1461_v40 = vld [vmem:[%s1966_s0 + $0xb4] ss:$8 sps:$4 sm:$0xff]   ;;  %v1463_v42 = vld [vmem:[%s1966_s0 + $0xb0] ss:$8 sps:$4 sm:$0xff]  }
   0xf   :  { %1306 = vmatpush3.bf16.msra.mxu0 %v1419_v7  ;;  %v1479_v41 = vld [vmem:[%s1967_s4 + $0x14] ss:$8 sps:$4 sm:$0xff]   ;;  %v1481_v43 = vld [vmem:[%s1967_s4 + $0x10] ss:$8 sps:$4 sm:$0xff]   ;;  %v1464_v44 = vld [vmem:[%s1966_s0 + $0xc4] ss:$8 sps:$4 sm:$0xff]  }
  0x10   :  { %1307 = vmatprep.subr.bf16.mxu0 %v1420_v8  ;;  %742 = vmatprep.subr.bf16.mxu1 %v1479_v41  ;;  %v1482_v45 = vld [vmem:[%s1967_s4 + $0x24] ss:$8 sps:$4 sm:$0xff]   ;;  %v1484_v46 = vld [vmem:[%s1967_s4 + $0x20] ss:$8 sps:$4 sm:$0xff]   ;;  %v1485_v47 = vld [vmem:[%s1967_s4 + $0x34] ss:$8 sps:$4 sm:$0xff]  }
  0x11   :  { %743 = vmatpush1.bf16.msra.mxu1 %v1481_v43  ;;  %v1466_v48 = vld [vmem:[%s1966_s0 + $0xc0] ss:$8 sps:$4 sm:$0xff]   ;;  %v1487_v49 = vld [vmem:[%s1967_s4 + $0x30] ss:$8 sps:$4 sm:$0xff]   ;;  %v1467_v50 = vld [vmem:[%s1966_s0 + $0xd4] ss:$8 sps:$4 sm:$0xff]  }
  0x12   :  { %744 = vmatprep.subr.bf16.mxu1 %v1482_v45  ;;  %v1469_v52 = vld [vmem:[%s1966_s0 + $0xd0] ss:$8 sps:$4 sm:$0xff]   ;;  %v1470_v53 = vld [vmem:[%s1966_s0 + $0xe4] ss:$8 sps:$4 sm:$0xff]   ;;  %v1472_v54 = vld [vmem:[%s1966_s0 + $0xe0] ss:$8 sps:$4 sm:$0xff]  }
  0x13   :  { %1308 = vmatpush3.bf16.msra.mxu0 %v1421_v9  ;;  %v1473_v55 = vld [vmem:[%s1966_s0 + $0xf4] ss:$8 sps:$4 sm:$0xff]   ;;  %v1475_v56 = vld [vmem:[%s1966_s0 + $0xf0] ss:$8 sps:$4 sm:$0xff]   ;;  %v1696_v59 = vld [vmem:[%s1968_s2] ss:$0 sm:$0xff] }
  0x14   :  { %1309 = vmatprep.subr.bf16.mxu0 %v1422_v10  ;;  %v1701_v62 = vld [vmem:[%s1969_s3] ss:$0 sm:$0xff] }
  0x15   :  { %745 = vmatpush1.bf16.msra.mxu1 %v1484_v46 }
  0x16   :  { %746 = vmatprep.subr.bf16.mxu1 %v1485_v47 }
  0x17   :  { %1310 = vmatpush3.bf16.msra.mxu0 %v1423_v12 }
  0x18   :  { %1311 = vmatprep.subr.bf16.mxu0 %v1424_v13 }
  0x19   :  { %747 = vmatpush1.bf16.msra.mxu1 %v1487_v49 }
  0x1b   :  { %1312 = vmatpush3.bf16.msra.mxu0 %v1425_v14 }
  0x1c   :  { %1313 = vmatprep.subr.bf16.mxu0 %v1426_v15 }
  0x1f   :  { %1314 = vmatpush3.bf16.msra.mxu0 %v1427_v16 }
  0x22   :  { %377 = vmatmul.mubr.bf16.vlgmr.msra.gmra.mrb[0].mxu0 %v1428_v17 }
  0x23   :  { %384 = vmatprep.mubr.bf16.mxu0 %v1431_v18 }
  0x2a   :  { %385 = vmatmul.mubr.bf16.gmra.mrb[4].mxu0 %v1433_v19 }
  0x2b   :  { %392 = vmatprep.mubr.bf16.mxu0 %v1434_v20 }
  0x32   :  { %393 = vmatmul.mubr.bf16.gmra.mrb[8].mxu0 %v1436_v23 }
  0x33   :  { %400 = vmatprep.mubr.bf16.mxu0 %v1437_v24 }
  0x3a   :  { %401 = vmatmul.mubr.bf16.gmra.mrb[12].mxu0 %v1439_v25 }
  0x3b   :  { %408 = vmatprep.mubr.bf16.mxu0 %v1440_v26 }
  0x42   :  { %409 = vmatmul.mubr.bf16.gmra.mrb[16].mxu0 %v1442_v27 }
  0x43   :  { %416 = vmatprep.mubr.bf16.mxu0 %v1443_v28 }
  0x4a   :  { %417 = vmatmul.mubr.bf16.gmra.mrb[20].mxu0 %v1445_v29 }
  0x4b   :  { %424 = vmatprep.mubr.bf16.mxu0 %v1446_v30 }
  0x52   :  { %425 = vmatmul.mubr.bf16.gmra.mrb[24].mxu0 %v1448_v31 }
  0x53   :  { %432 = vmatprep.mubr.bf16.mxu0 %v1449_v32 }
  0x5a   :  { %433 = vmatmul.mubr.bf16.gmra.mrb[28].mxu0 %v1451_v33 }
  0x5b   :  { %440 = vmatprep.mubr.bf16.mxu0 %v1452_v34 }
  0x62   :  { %441 = vmatmul.mubr.bf16.gmra.mrb[32].mxu0 %v1454_v35 }
  0x63   :  { %448 = vmatprep.mubr.bf16.mxu0 %v1455_v36 }
  0x6a   :  { %449 = vmatmul.mubr.bf16.gmra.mrb[36].mxu0 %v1457_v37 }
  0x6b   :  { %456 = vmatprep.mubr.bf16.mxu0 %v1458_v38 }
  0x72   :  { %457 = vmatmul.mubr.bf16.gmra.mrb[40].mxu0 %v1460_v39 }
  0x73   :  { %464 = vmatprep.mubr.bf16.mxu0 %v1461_v40 }
  0x7a   :  { %465 = vmatmul.mubr.bf16.gmra.mrb[44].mxu0 %v1463_v42 }
  0x7b   :  { %472 = vmatprep.mubr.bf16.mxu0 %v1464_v44 }
  0x82   :  { %473 = vmatmul.mubr.bf16.gmra.mrb[48].mxu0 %v1466_v48 }
  0x83   :  { %480 = vmatprep.mubr.bf16.mxu0 %v1467_v50 }
  0x8a   :  { %481 = vmatmul.mubr.bf16.gmra.mrb[52].mxu0 %v1469_v52 }
  0x8b   :  { %488 = vmatprep.mubr.bf16.mxu0 %v1470_v53 }
  0x92   :  { %489 = vmatmul.mubr.bf16.gmra.mrb[56].mxu0 %v1472_v54 }
  0x93   :  { %496 = vmatprep.mubr.bf16.mxu0 %v1473_v55 }
  0x9a   :  { %497 = vmatmul.mubr.bf16.gmra.mrb[60].mxu0 %v1475_v56 }
  0xf5   :  { %v1315_v57 = vpop.f32.mrb[0].mxu0 }
  0xf6   :  { %v1316_v58 = vpop.f32.mrb[1].mxu0 }
  0xf7   :  { %v1317_v60 = vadd.f32 %v1316_v58, %v1315_v57  ;;  %v1318_v61 = vpop.f32.mrb[2].mxu0 }
  0xf8   :  { %v1319_v63 = vpop.f32.mrb[3].mxu0 }
  0xf9   :  { %v512_v0 = vmul.f32 %v1317_v60, %v1696_v59  ;;  %v1320_v1 = vadd.f32 %v1319_v63, %v1318_v61 }
  0xfb   :  { %v551_v2 = vadd.f32 %v1701_v62, %v512_v0  ;;  %v513_v3 = vmul.f32 %v1320_v1, %v1696_v59 }
  0xfd   :  { %v552_v4 = vadd.f32 %v1701_v62, %v513_v3  ;;  %v1321_v5 = vpop.f32.mrb[4].mxu0  ;;  %v583_v7 = vmax.f32 %v551_v2, 0.0 }
  0xfe   :  { %v1322_v6 = vpop.f32.mrb[5].mxu0 }
  0xff   :  { %v584_v8 = vmax.f32 %v552_v4, 0.0  ;;  %v1323_v9 = vadd.f32 %v1322_v6, %v1321_v5  ;;  %v1324_v10 = vpop.f32.mrb[6].mxu0 }
 0x100   :  { %v1325_v11 = vpop.f32.mrb[7].mxu0 }
 0x101   :  { %v615_v12 = vpack.c.bf16 %v584_v8, %v583_v7  ;;  %v514_v13 = vmul.f32 %v1323_v9, %v1696_v59  ;;  %v1326_v14 = vadd.f32 %v1325_v11, %v1324_v10 }
 0x103   :  { %v553_v15 = vadd.f32 %v1701_v62, %v514_v13  ;;  %v515_v16 = vmul.f32 %v1326_v14, %v1696_v59  ;;  %1219 = vmatmul.mubr.msk.bf16.vlgmr.msra.gmra.mrb[0].mxu1 %vm691_vm0, %v615_v12 }
 0x104   :  { %782 = vmatprep.mubr.bf16.mxu1 %v1488_v51 }
 0x105   :  { %v554_v17 = vadd.f32 %v1701_v62, %v515_v16  ;;  %v1327_v18 = vpop.f32.mrb[8].mxu0  ;;  %v585_v20 = vmax.f32 %v553_v15, 0.0 }
 0x106   :  { %v1328_v19 = vpop.f32.mrb[9].mxu0 }
 0x107   :  { %v586_v21 = vmax.f32 %v554_v17, 0.0  ;;  %v1329_v22 = vadd.f32 %v1328_v19, %v1327_v18  ;;  %v1330_v23 = vpop.f32.mrb[10].mxu0 }
 0x108   :  { %v1331_v24 = vpop.f32.mrb[11].mxu0 }
 0x109   :  { %v616_v25 = vpack.c.bf16 %v586_v21, %v585_v20  ;;  %v516_v26 = vmul.f32 %v1329_v22, %v1696_v59  ;;  %v1332_v27 = vadd.f32 %v1331_v24, %v1330_v23 }
 0x10b   :  { %v555_v28 = vadd.f32 %v1701_v62, %v516_v26  ;;  %v517_v29 = vmul.f32 %v1332_v27, %v1696_v59  ;;  %1220 = vmatmul.mubr.msk.bf16.gmra.mrb[4].mxu1 %vm691_vm0, %v616_v25 }
 0x10c   :  { %792 = vmatprep.mubr.bf16.mxu1 %v1488_v51 }
 0x10d   :  { %v556_v30 = vadd.f32 %v1701_v62, %v517_v29  ;;  %v1333_v31 = vpop.f32.mrb[12].mxu0  ;;  %v587_v33 = vmax.f32 %v555_v28, 0.0 }
 0x10e   :  { %v1334_v32 = vpop.f32.mrb[13].mxu0 }
 0x10f   :  { %v588_v34 = vmax.f32 %v556_v30, 0.0  ;;  %v1335_v35 = vadd.f32 %v1334_v32, %v1333_v31  ;;  %v1336_v36 = vpop.f32.mrb[14].mxu0 }
 0x110   :  { %v1337_v37 = vpop.f32.mrb[15].mxu0 }
 0x111   :  { %v617_v38 = vpack.c.bf16 %v588_v34, %v587_v33  ;;  %v518_v39 = vmul.f32 %v1335_v35, %v1696_v59  ;;  %v1338_v40 = vadd.f32 %v1337_v37, %v1336_v36 }
 0x113   :  { %v557_v41 = vadd.f32 %v1701_v62, %v518_v39  ;;  %v519_v42 = vmul.f32 %v1338_v40, %v1696_v59  ;;  %1221 = vmatmul.mubr.msk.bf16.gmra.mrb[8].mxu1 %vm691_vm0, %v617_v38 }
 0x114   :  { %802 = vmatprep.mubr.bf16.mxu1 %v1488_v51 }
 0x115   :  { %v558_v43 = vadd.f32 %v1701_v62, %v519_v42  ;;  %v1339_v44 = vpop.f32.mrb[16].mxu0  ;;  %v589_v46 = vmax.f32 %v557_v41, 0.0 }
 0x116   :  { %v1340_v45 = vpop.f32.mrb[17].mxu0 }
 0x117   :  { %v590_v47 = vmax.f32 %v558_v43, 0.0  ;;  %v1341_v48 = vadd.f32 %v1340_v45, %v1339_v44  ;;  %v1342_v49 = vpop.f32.mrb[18].mxu0 }
 0x118   :  { %v1343_v50 = vpop.f32.mrb[19].mxu0 }
 0x119   :  { %v618_v52 = vpack.c.bf16 %v590_v47, %v589_v46  ;;  %v520_v53 = vmul.f32 %v1341_v48, %v1696_v59  ;;  %v1344_v54 = vadd.f32 %v1343_v50, %v1342_v49 }
 0x11b   :  { %v559_v55 = vadd.f32 %v1701_v62, %v520_v53  ;;  %v521_v56 = vmul.f32 %v1344_v54, %v1696_v59  ;;  %1222 = vmatmul.mubr.msk.bf16.gmra.mrb[12].mxu1 %vm691_vm0, %v618_v52 }
 0x11c   :  { %812 = vmatprep.mubr.bf16.mxu1 %v1488_v51 }
 0x11d   :  { %v560_v57 = vadd.f32 %v1701_v62, %v521_v56  ;;  %v1345_v58 = vpop.f32.mrb[20].mxu0  ;;  %v591_v61 = vmax.f32 %v559_v55, 0.0 }
 0x11e   :  { %v1346_v60 = vpop.f32.mrb[21].mxu0 }
 0x11f   :  { %v592_v63 = vmax.f32 %v560_v57, 0.0  ;;  %v1347_v0 = vadd.f32 %v1346_v60, %v1345_v58  ;;  %v1348_v1 = vpop.f32.mrb[22].mxu0 }
 0x120   :  { %v1349_v2 = vpop.f32.mrb[23].mxu0 }
 0x121   :  { %v619_v3 = vpack.c.bf16 %v592_v63, %v591_v61  ;;  %v522_v4 = vmul.f32 %v1347_v0, %v1696_v59  ;;  %v1350_v5 = vadd.f32 %v1349_v2, %v1348_v1 }
 0x123   :  { %v561_v6 = vadd.f32 %v1701_v62, %v522_v4  ;;  %v523_v7 = vmul.f32 %v1350_v5, %v1696_v59  ;;  %1223 = vmatmul.mubr.msk.bf16.gmra.mrb[16].mxu1 %vm691_vm0, %v619_v3 }
 0x124   :  { %822 = vmatprep.mubr.bf16.mxu1 %v1488_v51 }
 0x125   :  { %v562_v8 = vadd.f32 %v1701_v62, %v523_v7  ;;  %v1351_v9 = vpop.f32.mrb[24].mxu0  ;;  %v593_v11 = vmax.f32 %v561_v6, 0.0 }
 0x126   :  { %v1352_v10 = vpop.f32.mrb[25].mxu0 }
 0x127   :  { %v594_v12 = vmax.f32 %v562_v8, 0.0  ;;  %v1353_v13 = vadd.f32 %v1352_v10, %v1351_v9  ;;  %v1354_v14 = vpop.f32.mrb[26].mxu0 }
 0x128   :  { %v1355_v15 = vpop.f32.mrb[27].mxu0 }
 0x129   :  { %v620_v16 = vpack.c.bf16 %v594_v12, %v593_v11  ;;  %v524_v17 = vmul.f32 %v1353_v13, %v1696_v59  ;;  %v1356_v18 = vadd.f32 %v1355_v15, %v1354_v14 }
 0x12b   :  { %v563_v19 = vadd.f32 %v1701_v62, %v524_v17  ;;  %v525_v20 = vmul.f32 %v1356_v18, %v1696_v59  ;;  %1224 = vmatmul.mubr.msk.bf16.gmra.mrb[20].mxu1 %vm691_vm0, %v620_v16 }
 0x12c   :  { %832 = vmatprep.mubr.bf16.mxu1 %v1488_v51 }
 0x12d   :  { %v564_v21 = vadd.f32 %v1701_v62, %v525_v20  ;;  %v1357_v22 = vpop.f32.mrb[28].mxu0  ;;  %v595_v24 = vmax.f32 %v563_v19, 0.0 }
 0x12e   :  { %v1358_v23 = vpop.f32.mrb[29].mxu0 }
 0x12f   :  { %v596_v25 = vmax.f32 %v564_v21, 0.0  ;;  %v1359_v26 = vadd.f32 %v1358_v23, %v1357_v22  ;;  %v1360_v27 = vpop.f32.mrb[30].mxu0 }
 0x130   :  { %v1361_v28 = vpop.f32.mrb[31].mxu0 }
 0x131   :  { %v621_v29 = vpack.c.bf16 %v596_v25, %v595_v24  ;;  %v526_v30 = vmul.f32 %v1359_v26, %v1696_v59  ;;  %v1362_v31 = vadd.f32 %v1361_v28, %v1360_v27 }
 0x133   :  { %v565_v32 = vadd.f32 %v1701_v62, %v526_v30  ;;  %v527_v33 = vmul.f32 %v1362_v31, %v1696_v59  ;;  %1225 = vmatmul.mubr.msk.bf16.gmra.mrb[24].mxu1 %vm691_vm0, %v621_v29 }
 0x134   :  { %842 = vmatprep.mubr.bf16.mxu1 %v1488_v51 }
 0x135   :  { %v566_v34 = vadd.f32 %v1701_v62, %v527_v33  ;;  %v1363_v35 = vpop.f32.mrb[32].mxu0  ;;  %v597_v37 = vmax.f32 %v565_v32, 0.0 }
 0x136   :  { %v1364_v36 = vpop.f32.mrb[33].mxu0 }
 0x137   :  { %v598_v38 = vmax.f32 %v566_v34, 0.0  ;;  %v1365_v39 = vadd.f32 %v1364_v36, %v1363_v35  ;;  %v1366_v40 = vpop.f32.mrb[34].mxu0 }
 0x138   :  { %v1367_v41 = vpop.f32.mrb[35].mxu0 }
 0x139   :  { %v622_v42 = vpack.c.bf16 %v598_v38, %v597_v37  ;;  %v528_v43 = vmul.f32 %v1365_v39, %v1696_v59  ;;  %v1368_v44 = vadd.f32 %v1367_v41, %v1366_v40 }
 0x13b   :  { %v567_v45 = vadd.f32 %v1701_v62, %v528_v43  ;;  %v529_v46 = vmul.f32 %v1368_v44, %v1696_v59  ;;  %1226 = vmatmul.mubr.msk.bf16.gmra.mrb[28].mxu1 %vm691_vm0, %v622_v42 }
 0x13c   :  { %852 = vmatprep.mubr.bf16.mxu1 %v1488_v51 }
 0x13d   :  { %v568_v47 = vadd.f32 %v1701_v62, %v529_v46  ;;  %v1369_v48 = vpop.f32.mrb[36].mxu0  ;;  %v599_v50 = vmax.f32 %v567_v45, 0.0 }
 0x13e   :  { %v1370_v49 = vpop.f32.mrb[37].mxu0 }
 0x13f   :  { %v600_v52 = vmax.f32 %v568_v47, 0.0  ;;  %v1371_v53 = vadd.f32 %v1370_v49, %v1369_v48  ;;  %v1372_v54 = vpop.f32.mrb[38].mxu0 }
 0x140   :  { %v1373_v55 = vpop.f32.mrb[39].mxu0 }
 0x141   :  { %v623_v56 = vpack.c.bf16 %v600_v52, %v599_v50  ;;  %v530_v57 = vmul.f32 %v1371_v53, %v1696_v59  ;;  %v1374_v58 = vadd.f32 %v1373_v55, %v1372_v54 }
 0x143   :  { %v569_v60 = vadd.f32 %v1701_v62, %v530_v57  ;;  %v531_v61 = vmul.f32 %v1374_v58, %v1696_v59  ;;  %1227 = vmatmul.mubr.msk.bf16.gmra.mrb[32].mxu1 %vm691_vm0, %v623_v56 }
 0x144   :  { %862 = vmatprep.mubr.bf16.mxu1 %v1488_v51 }
 0x145   :  { %v570_v63 = vadd.f32 %v1701_v62, %v531_v61  ;;  %v1375_v0 = vpop.f32.mrb[40].mxu0  ;;  %v601_v2 = vmax.f32 %v569_v60, 0.0 }
 0x146   :  { %v1376_v1 = vpop.f32.mrb[41].mxu0 }
 0x147   :  { %v602_v3 = vmax.f32 %v570_v63, 0.0  ;;  %v1377_v4 = vadd.f32 %v1376_v1, %v1375_v0  ;;  %v1378_v5 = vpop.f32.mrb[42].mxu0 }
 0x148   :  { %v1379_v6 = vpop.f32.mrb[43].mxu0 }
 0x149   :  { %v624_v7 = vpack.c.bf16 %v602_v3, %v601_v2  ;;  %v532_v8 = vmul.f32 %v1377_v4, %v1696_v59  ;;  %v1380_v9 = vadd.f32 %v1379_v6, %v1378_v5 }
 0x14b   :  { %v571_v10 = vadd.f32 %v1701_v62, %v532_v8  ;;  %v533_v11 = vmul.f32 %v1380_v9, %v1696_v59  ;;  %1228 = vmatmul.mubr.msk.bf16.gmra.mrb[36].mxu1 %vm691_vm0, %v624_v7 }
 0x14c   :  { %872 = vmatprep.mubr.bf16.mxu1 %v1488_v51 }
 0x14d   :  { %v572_v12 = vadd.f32 %v1701_v62, %v533_v11  ;;  %v1381_v13 = vpop.f32.mrb[44].mxu0  ;;  %v603_v15 = vmax.f32 %v571_v10, 0.0 }
 0x14e   :  { %v1382_v14 = vpop.f32.mrb[45].mxu0 }
 0x14f   :  { %v604_v16 = vmax.f32 %v572_v12, 0.0  ;;  %v1383_v17 = vadd.f32 %v1382_v14, %v1381_v13  ;;  %v1384_v18 = vpop.f32.mrb[46].mxu0 }
 0x150   :  { %v1385_v19 = vpop.f32.mrb[47].mxu0 }
 0x151   :  { %v625_v20 = vpack.c.bf16 %v604_v16, %v603_v15  ;;  %v534_v21 = vmul.f32 %v1383_v17, %v1696_v59  ;;  %v1386_v22 = vadd.f32 %v1385_v19, %v1384_v18 }
 0x153   :  { %v573_v23 = vadd.f32 %v1701_v62, %v534_v21  ;;  %v535_v24 = vmul.f32 %v1386_v22, %v1696_v59  ;;  %1229 = vmatmul.mubr.msk.bf16.gmra.mrb[40].mxu1 %vm691_vm0, %v625_v20  ;;  %v641_v20 = vlaneseq }
 0x154   :  { %882 = vmatprep.mubr.bf16.mxu1 %v1488_v51 }
 0x155   :  { %v574_v25 = vadd.f32 %v1701_v62, %v535_v24  ;;  %v1387_v26 = vpop.f32.mrb[48].mxu0  ;;  %v605_v28 = vmax.f32 %v573_v23, 0.0  ;;  %v642_v21 = vshrl.u32 %v641_v20, 7  ;;  %v639_v23 = vld [vmem:[%s1970_s5] sm:$0x3] }
 0x156   :  { %v1388_v27 = vpop.f32.mrb[49].mxu0 }
 0x157   :  { %v606_v29 = vmax.f32 %v574_v25, 0.0  ;;  %v1389_v30 = vadd.f32 %v1388_v27, %v1387_v26  ;;  %v1390_v31 = vpop.f32.mrb[50].mxu0  ;;  %v643_v22 = vsub.s32 0, %v642_v21  ;;  %v647_v24 = vsub.s32 1, %v642_v21 }
 0x158   :  { %v1391_v32 = vpop.f32.mrb[51].mxu0 }
 0x159   :  { %v626_v33 = vpack.c.bf16 %v606_v29, %v605_v28  ;;  %v536_v34 = vmul.f32 %v1389_v30, %v1696_v59  ;;  %v1392_v35 = vadd.f32 %v1391_v32, %v1390_v31  ;;  %v1803_v25 = vrot.slane %v639_v23, %v647_v24 }
 0x15b   :  { %v575_v36 = vadd.f32 %v1701_v62, %v536_v34  ;;  %v537_v37 = vmul.f32 %v1392_v35, %v1696_v59  ;;  %1230 = vmatmul.mubr.msk.bf16.gmra.mrb[44].mxu1 %vm691_vm0, %v626_v33 }
 0x15c   :  { %892 = vmatprep.mubr.bf16.mxu1 %v1488_v51 }
 0x15d   :  { %v576_v38 = vadd.f32 %v1701_v62, %v537_v37  ;;  %v1393_v39 = vpop.f32.mrb[52].mxu0  ;;  %v607_v41 = vmax.f32 %v575_v36, 0.0 }
 0x15e   :  { %v1394_v40 = vpop.f32.mrb[53].mxu0 }
 0x15f   :  { %v608_v42 = vmax.f32 %v576_v38, 0.0  ;;  %v1395_v43 = vadd.f32 %v1394_v40, %v1393_v39  ;;  %v1396_v44 = vpop.f32.mrb[54].mxu0 }
 0x160   :  { %v1397_v45 = vpop.f32.mrb[55].mxu0 }
 0x161   :  { %v627_v46 = vpack.c.bf16 %v608_v42, %v607_v41  ;;  %v538_v47 = vmul.f32 %v1395_v43, %v1696_v59  ;;  %v1398_v48 = vadd.f32 %v1397_v45, %v1396_v44 }
 0x163   :  { %v577_v49 = vadd.f32 %v1701_v62, %v538_v47  ;;  %v539_v50 = vmul.f32 %v1398_v48, %v1696_v59  ;;  %1231 = vmatmul.mubr.msk.bf16.gmra.mrb[48].mxu1 %vm691_vm0, %v627_v46 }
 0x164   :  { %902 = vmatprep.mubr.bf16.mxu1 %v1488_v51 }
 0x165   :  { %v578_v52 = vadd.f32 %v1701_v62, %v539_v50  ;;  %v1399_v53 = vpop.f32.mrb[56].mxu0  ;;  %v609_v55 = vmax.f32 %v577_v49, 0.0 }
 0x166   :  { %v1400_v54 = vpop.f32.mrb[57].mxu0 }
 0x167   :  { %v610_v56 = vmax.f32 %v578_v52, 0.0  ;;  %v1401_v57 = vadd.f32 %v1400_v54, %v1399_v53  ;;  %v1402_v58 = vpop.f32.mrb[58].mxu0 }
 0x168   :  { %v1403_v60 = vpop.f32.mrb[59].mxu0 }
 0x169   :  { %v628_v61 = vpack.c.bf16 %v610_v56, %v609_v55  ;;  %v540_v63 = vmul.f32 %v1401_v57, %v1696_v59  ;;  %v1404_v0 = vadd.f32 %v1403_v60, %v1402_v58 }
 0x16b   :  { %v579_v1 = vadd.f32 %v1701_v62, %v540_v63  ;;  %v541_v2 = vmul.f32 %v1404_v0, %v1696_v59  ;;  %1232 = vmatmul.mubr.msk.bf16.gmra.mrb[52].mxu1 %vm691_vm0, %v628_v61 }
 0x16c   :  { %912 = vmatprep.mubr.bf16.mxu1 %v1488_v51 }
 0x16d   :  { %v580_v3 = vadd.f32 %v1701_v62, %v541_v2  ;;  %v1405_v4 = vpop.f32.mrb[60].mxu0  ;;  %v611_v6 = vmax.f32 %v579_v1, 0.0 }
 0x16e   :  { %v1406_v5 = vpop.f32.mrb[61].mxu0 }
 0x16f   :  { %v612_v7 = vmax.f32 %v580_v3, 0.0  ;;  %v1407_v8 = vadd.f32 %v1406_v5, %v1405_v4  ;;  %v1408_v9 = vpop.f32.mrb[62].mxu0 }
 0x170   :  { %v1409_v10 = vpop.f32.mrb[63].mxu0 }
 0x171   :  { %v629_v11 = vpack.c.bf16 %v612_v7, %v611_v6  ;;  %v542_v12 = vmul.f32 %v1407_v8, %v1696_v59  ;;  %v1410_v13 = vadd.f32 %v1409_v10, %v1408_v9 }
 0x173   :  { %v581_v14 = vadd.f32 %v1701_v62, %v542_v12  ;;  %v543_v15 = vmul.f32 %v1410_v13, %v1696_v59  ;;  %1233 = vmatmul.mubr.msk.bf16.gmra.mrb[56].mxu1 %vm691_vm0, %v629_v11  ;;  %v1801_v59 = vrot.slane %v639_v23, %v643_v22 }
 0x174   :  { %922 = vmatprep.mubr.bf16.mxu1 %v1488_v51 }
 0x175   :  { %v582_v16 = vadd.f32 %v1701_v62, %v543_v15  ;;  %v613_v17 = vmax.f32 %v581_v14, 0.0 }
 0x177   :  { %v614_v18 = vmax.f32 %v582_v16, 0.0 }
 0x179   :  { %v630_v19 = vpack.c.bf16 %v614_v18, %v613_v17 }
 0x17b   :  { %1234 = vmatmul.mubr.msk.bf16.gmra.mrb[60].mxu1 %vm691_vm0, %v630_v19 }
 0x1d6   :  { %v774_v51 = vpop.f32.mrb[0].mxu1 }
 0x1d7   :  { %v775_v62 = vadd.f32 %v774_v51, %v1801_v59  ;;  %v776_v26 = vpop.f32.mrb[1].mxu1 }
 0x1d8   :  { %v777_v27 = vadd.f32 %v776_v26, %v1803_v25  ;;  %v778_v28 = vpop.f32.mrb[2].mxu1 }
 0x1d9   :  { %v779_v29 = vadd.f32 %v778_v28, %v1801_v59  ;;  %v780_v30 = vpop.f32.mrb[3].mxu1 }
 0x1da   :  { %v1267_v31 = vpack.c.bf16 %v777_v27, %v775_v62  ;;  %v781_v32 = vadd.f32 %v780_v30, %v1803_v25 }
 0x1dc   :  { %1125 = vst [vmem:[%s1971_s6] sm:$0xff] %v1267_v31  ;;  %v1268_v33 = vpack.c.bf16 %v781_v32, %v779_v29 }
 0x1de   :  { %1126 = vst [vmem:[%s1971_s6 + $0x8] sm:$0xff] %v1268_v33  ;;  %v784_v34 = vpop.f32.mrb[4].mxu1 }
 0x1df   :  { %v785_v35 = vadd.f32 %v784_v34, %v1801_v59  ;;  %v786_v36 = vpop.f32.mrb[5].mxu1 }
 0x1e0   :  { %v787_v37 = vadd.f32 %v786_v36, %v1803_v25  ;;  %v788_v38 = vpop.f32.mrb[6].mxu1 }
 0x1e1   :  { %v789_v39 = vadd.f32 %v788_v38, %v1801_v59  ;;  %v790_v40 = vpop.f32.mrb[7].mxu1 }
 0x1e2   :  { %v1269_v41 = vpack.c.bf16 %v787_v37, %v785_v35  ;;  %v791_v42 = vadd.f32 %v790_v40, %v1803_v25 }
 0x1e4   :  { %1127 = vst [vmem:[%s1971_s6 + $0x10] sm:$0xff] %v1269_v41  ;;  %v1270_v43 = vpack.c.bf16 %v791_v42, %v789_v39 }
 0x1e6   :  { %1128 = vst [vmem:[%s1971_s6 + $0x18] sm:$0xff] %v1270_v43  ;;  %v794_v44 = vpop.f32.mrb[8].mxu1 }
 0x1e7   :  { %v795_v45 = vadd.f32 %v794_v44, %v1801_v59  ;;  %v796_v46 = vpop.f32.mrb[9].mxu1 }
 0x1e8   :  { %v797_v47 = vadd.f32 %v796_v46, %v1803_v25  ;;  %v798_v48 = vpop.f32.mrb[10].mxu1 }
 0x1e9   :  { %v799_v49 = vadd.f32 %v798_v48, %v1801_v59  ;;  %v800_v50 = vpop.f32.mrb[11].mxu1 }
 0x1ea   :  { %v1271_v52 = vpack.c.bf16 %v797_v47, %v795_v45  ;;  %v801_v53 = vadd.f32 %v800_v50, %v1803_v25 }
 0x1ec   :  { %1129 = vst [vmem:[%s1971_s6 + $0x20] sm:$0xff] %v1271_v52  ;;  %v1272_v54 = vpack.c.bf16 %v801_v53, %v799_v49 }
 0x1ee   :  { %1130 = vst [vmem:[%s1971_s6 + $0x28] sm:$0xff] %v1272_v54  ;;  %v804_v55 = vpop.f32.mrb[12].mxu1 }
 0x1ef   :  { %v805_v56 = vadd.f32 %v804_v55, %v1801_v59  ;;  %v806_v57 = vpop.f32.mrb[13].mxu1 }
 0x1f0   :  { %v807_v58 = vadd.f32 %v806_v57, %v1803_v25  ;;  %v808_v60 = vpop.f32.mrb[14].mxu1 }
 0x1f1   :  { %v809_v61 = vadd.f32 %v808_v60, %v1801_v59  ;;  %v810_v63 = vpop.f32.mrb[15].mxu1 }
 0x1f2   :  { %v1273_v0 = vpack.c.bf16 %v807_v58, %v805_v56  ;;  %v811_v1 = vadd.f32 %v810_v63, %v1803_v25 }
 0x1f4   :  { %1131 = vst [vmem:[%s1971_s6 + $0x30] sm:$0xff] %v1273_v0  ;;  %v1274_v2 = vpack.c.bf16 %v811_v1, %v809_v61 }
 0x1f6   :  { %1132 = vst [vmem:[%s1971_s6 + $0x38] sm:$0xff] %v1274_v2  ;;  %v814_v3 = vpop.f32.mrb[16].mxu1 }
 0x1f7   :  { %v815_v4 = vadd.f32 %v814_v3, %v1801_v59  ;;  %v816_v5 = vpop.f32.mrb[17].mxu1 }
 0x1f8   :  { %v817_v6 = vadd.f32 %v816_v5, %v1803_v25  ;;  %v818_v7 = vpop.f32.mrb[18].mxu1 }
 0x1f9   :  { %v819_v8 = vadd.f32 %v818_v7, %v1801_v59  ;;  %v820_v9 = vpop.f32.mrb[19].mxu1 }
 0x1fa   :  { %v1275_v10 = vpack.c.bf16 %v817_v6, %v815_v4  ;;  %v821_v11 = vadd.f32 %v820_v9, %v1803_v25 }
 0x1fc   :  { %1133 = vst [vmem:[%s1971_s6 + $0x40] sm:$0xff] %v1275_v10  ;;  %v1276_v12 = vpack.c.bf16 %v821_v11, %v819_v8 }
 0x1fe   :  { %1134 = vst [vmem:[%s1971_s6 + $0x48] sm:$0xff] %v1276_v12  ;;  %v824_v13 = vpop.f32.mrb[20].mxu1 }
 0x1ff   :  { %v825_v14 = vadd.f32 %v824_v13, %v1801_v59  ;;  %v826_v15 = vpop.f32.mrb[21].mxu1 }
 0x200   :  { %v827_v16 = vadd.f32 %v826_v15, %v1803_v25  ;;  %v828_v17 = vpop.f32.mrb[22].mxu1 }
 0x201   :  { %v829_v18 = vadd.f32 %v828_v17, %v1801_v59  ;;  %v830_v19 = vpop.f32.mrb[23].mxu1 }
 0x202   :  { %v1277_v20 = vpack.c.bf16 %v827_v16, %v825_v14  ;;  %v831_v21 = vadd.f32 %v830_v19, %v1803_v25 }
 0x204   :  { %1135 = vst [vmem:[%s1971_s6 + $0x50] sm:$0xff] %v1277_v20  ;;  %v1278_v22 = vpack.c.bf16 %v831_v21, %v829_v18 }
 0x206   :  { %1136 = vst [vmem:[%s1971_s6 + $0x58] sm:$0xff] %v1278_v22  ;;  %v834_v23 = vpop.f32.mrb[24].mxu1 }
 0x207   :  { %v835_v24 = vadd.f32 %v834_v23, %v1801_v59  ;;  %v836_v51 = vpop.f32.mrb[25].mxu1 }
 0x208   :  { %v837_v62 = vadd.f32 %v836_v51, %v1803_v25  ;;  %v838_v26 = vpop.f32.mrb[26].mxu1 }
 0x209   :  { %v839_v27 = vadd.f32 %v838_v26, %v1801_v59  ;;  %v840_v28 = vpop.f32.mrb[27].mxu1 }
 0x20a   :  { %v1279_v29 = vpack.c.bf16 %v837_v62, %v835_v24  ;;  %v841_v30 = vadd.f32 %v840_v28, %v1803_v25 }
 0x20c   :  { %1137 = vst [vmem:[%s1971_s6 + $0x60] sm:$0xff] %v1279_v29  ;;  %v1280_v31 = vpack.c.bf16 %v841_v30, %v839_v27 }
 0x20e   :  { %1138 = vst [vmem:[%s1971_s6 + $0x68] sm:$0xff] %v1280_v31  ;;  %v844_v32 = vpop.f32.mrb[28].mxu1 }
 0x20f   :  { %v845_v33 = vadd.f32 %v844_v32, %v1801_v59  ;;  %v846_v34 = vpop.f32.mrb[29].mxu1 }
 0x210   :  { %v847_v35 = vadd.f32 %v846_v34, %v1803_v25  ;;  %v848_v36 = vpop.f32.mrb[30].mxu1 }
 0x211   :  { %v849_v37 = vadd.f32 %v848_v36, %v1801_v59  ;;  %v850_v38 = vpop.f32.mrb[31].mxu1 }
 0x212   :  { %v1281_v39 = vpack.c.bf16 %v847_v35, %v845_v33  ;;  %v851_v40 = vadd.f32 %v850_v38, %v1803_v25 }
 0x214   :  { %1139 = vst [vmem:[%s1971_s6 + $0x70] sm:$0xff] %v1281_v39  ;;  %v1282_v41 = vpack.c.bf16 %v851_v40, %v849_v37 }
 0x216   :  { %1140 = vst [vmem:[%s1971_s6 + $0x78] sm:$0xff] %v1282_v41  ;;  %v854_v42 = vpop.f32.mrb[32].mxu1 }
 0x217   :  { %v855_v43 = vadd.f32 %v854_v42, %v1801_v59  ;;  %v856_v44 = vpop.f32.mrb[33].mxu1 }
 0x218   :  { %v857_v45 = vadd.f32 %v856_v44, %v1803_v25  ;;  %v858_v46 = vpop.f32.mrb[34].mxu1 }
 0x219   :  { %v859_v47 = vadd.f32 %v858_v46, %v1801_v59  ;;  %v860_v48 = vpop.f32.mrb[35].mxu1 }
 0x21a   :  { %v1283_v49 = vpack.c.bf16 %v857_v45, %v855_v43  ;;  %v861_v50 = vadd.f32 %v860_v48, %v1803_v25 }
 0x21c   :  { %1141 = vst [vmem:[%s1971_s6 + $0x80] sm:$0xff] %v1283_v49  ;;  %v1284_v52 = vpack.c.bf16 %v861_v50, %v859_v47 }
 0x21e   :  { %1142 = vst [vmem:[%s1971_s6 + $0x88] sm:$0xff] %v1284_v52  ;;  %v864_v53 = vpop.f32.mrb[36].mxu1 }
 0x21f   :  { %v865_v54 = vadd.f32 %v864_v53, %v1801_v59  ;;  %v866_v55 = vpop.f32.mrb[37].mxu1 }
 0x220   :  { %v867_v56 = vadd.f32 %v866_v55, %v1803_v25  ;;  %v868_v57 = vpop.f32.mrb[38].mxu1 }
 0x221   :  { %v869_v58 = vadd.f32 %v868_v57, %v1801_v59  ;;  %v870_v60 = vpop.f32.mrb[39].mxu1 }
 0x222   :  { %v1285_v61 = vpack.c.bf16 %v867_v56, %v865_v54  ;;  %v871_v63 = vadd.f32 %v870_v60, %v1803_v25 }
 0x224   :  { %1143 = vst [vmem:[%s1971_s6 + $0x90] sm:$0xff] %v1285_v61  ;;  %v1286_v0 = vpack.c.bf16 %v871_v63, %v869_v58 }
 0x226   :  { %1144 = vst [vmem:[%s1971_s6 + $0x98] sm:$0xff] %v1286_v0  ;;  %v874_v1 = vpop.f32.mrb[40].mxu1 }
 0x227   :  { %v875_v2 = vadd.f32 %v874_v1, %v1801_v59  ;;  %v876_v3 = vpop.f32.mrb[41].mxu1 }
 0x228   :  { %v877_v4 = vadd.f32 %v876_v3, %v1803_v25  ;;  %v878_v5 = vpop.f32.mrb[42].mxu1 }
 0x229   :  { %v879_v6 = vadd.f32 %v878_v5, %v1801_v59  ;;  %v880_v7 = vpop.f32.mrb[43].mxu1 }
 0x22a   :  { %v1287_v8 = vpack.c.bf16 %v877_v4, %v875_v2  ;;  %v881_v9 = vadd.f32 %v880_v7, %v1803_v25 }
 0x22c   :  { %1145 = vst [vmem:[%s1971_s6 + $0xa0] sm:$0xff] %v1287_v8  ;;  %v1288_v10 = vpack.c.bf16 %v881_v9, %v879_v6 }
 0x22e   :  { %1146 = vst [vmem:[%s1971_s6 + $0xa8] sm:$0xff] %v1288_v10  ;;  %v884_v11 = vpop.f32.mrb[44].mxu1 }
 0x22f   :  { %v885_v12 = vadd.f32 %v884_v11, %v1801_v59  ;;  %v886_v13 = vpop.f32.mrb[45].mxu1 }
 0x230   :  { %v887_v14 = vadd.f32 %v886_v13, %v1803_v25  ;;  %v888_v15 = vpop.f32.mrb[46].mxu1 }
 0x231   :  { %v889_v16 = vadd.f32 %v888_v15, %v1801_v59  ;;  %v890_v17 = vpop.f32.mrb[47].mxu1 }
 0x232   :  { %v1289_v18 = vpack.c.bf16 %v887_v14, %v885_v12  ;;  %v891_v19 = vadd.f32 %v890_v17, %v1803_v25 }
 0x234   :  { %1147 = vst [vmem:[%s1971_s6 + $0xb0] sm:$0xff] %v1289_v18  ;;  %v1290_v20 = vpack.c.bf16 %v891_v19, %v889_v16 }
 0x236   :  { %1148 = vst [vmem:[%s1971_s6 + $0xb8] sm:$0xff] %v1290_v20  ;;  %v894_v21 = vpop.f32.mrb[48].mxu1 }
 0x237   :  { %v895_v22 = vadd.f32 %v894_v21, %v1801_v59  ;;  %v896_v23 = vpop.f32.mrb[49].mxu1 }
 0x238   :  { %v897_v24 = vadd.f32 %v896_v23, %v1803_v25  ;;  %v898_v51 = vpop.f32.mrb[50].mxu1 }
 0x239   :  { %v899_v62 = vadd.f32 %v898_v51, %v1801_v59  ;;  %v900_v26 = vpop.f32.mrb[51].mxu1 }
 0x23a   :  { %v1291_v27 = vpack.c.bf16 %v897_v24, %v895_v22  ;;  %v901_v28 = vadd.f32 %v900_v26, %v1803_v25 }
 0x23c   :  { %1149 = vst [vmem:[%s1971_s6 + $0xc0] sm:$0xff] %v1291_v27  ;;  %v1292_v29 = vpack.c.bf16 %v901_v28, %v899_v62 }
 0x23e   :  { %1150 = vst [vmem:[%s1971_s6 + $0xc8] sm:$0xff] %v1292_v29  ;;  %v904_v30 = vpop.f32.mrb[52].mxu1 }
 0x23f   :  { %v905_v31 = vadd.f32 %v904_v30, %v1801_v59  ;;  %v906_v32 = vpop.f32.mrb[53].mxu1 }
 0x240   :  { %v907_v33 = vadd.f32 %v906_v32, %v1803_v25  ;;  %v908_v34 = vpop.f32.mrb[54].mxu1 }
 0x241   :  { %v909_v35 = vadd.f32 %v908_v34, %v1801_v59  ;;  %v910_v36 = vpop.f32.mrb[55].mxu1 }
 0x242   :  { %v1293_v37 = vpack.c.bf16 %v907_v33, %v905_v31  ;;  %v911_v38 = vadd.f32 %v910_v36, %v1803_v25 }
 0x244   :  { %1151 = vst [vmem:[%s1971_s6 + $0xd0] sm:$0xff] %v1293_v37  ;;  %v1294_v39 = vpack.c.bf16 %v911_v38, %v909_v35 }
 0x246   :  { %1152 = vst [vmem:[%s1971_s6 + $0xd8] sm:$0xff] %v1294_v39  ;;  %v914_v40 = vpop.f32.mrb[56].mxu1 }
 0x247   :  { %v915_v41 = vadd.f32 %v914_v40, %v1801_v59  ;;  %v916_v42 = vpop.f32.mrb[57].mxu1 }
 0x248   :  { %v917_v43 = vadd.f32 %v916_v42, %v1803_v25  ;;  %v918_v44 = vpop.f32.mrb[58].mxu1 }
 0x249   :  { %v919_v45 = vadd.f32 %v918_v44, %v1801_v59  ;;  %v920_v46 = vpop.f32.mrb[59].mxu1 }
 0x24a   :  { %v1295_v47 = vpack.c.bf16 %v917_v43, %v915_v41  ;;  %v921_v48 = vadd.f32 %v920_v46, %v1803_v25 }
 0x24c   :  { %1153 = vst [vmem:[%s1971_s6 + $0xe0] sm:$0xff] %v1295_v47  ;;  %v1296_v49 = vpack.c.bf16 %v921_v48, %v919_v45 }
 0x24e   :  { %1154 = vst [vmem:[%s1971_s6 + $0xe8] sm:$0xff] %v1296_v49  ;;  %v924_v50 = vpop.f32.mrb[60].mxu1 }
 0x24f   :  { %v925_v52 = vadd.f32 %v924_v50, %v1801_v59  ;;  %v926_v53 = vpop.f32.mrb[61].mxu1 }
 0x250   :  { %v927_v54 = vadd.f32 %v926_v53, %v1803_v25  ;;  %v928_v55 = vpop.f32.mrb[62].mxu1 }
 0x251   :  { %v929_v56 = vadd.f32 %v928_v55, %v1801_v59  ;;  %v930_v57 = vpop.f32.mrb[63].mxu1 }
 0x252   :  { %v1297_v58 = vpack.c.bf16 %v927_v54, %v925_v52  ;;  %v931_v60 = vadd.f32 %v930_v57, %v1803_v25 }
 0x254   :  { %1155 = vst [vmem:[%s1971_s6 + $0xf0] sm:$0xff] %v1297_v58  ;;  %v1298_v61 = vpack.c.bf16 %v931_v60, %v929_v56 }
 0x256   :  { %1156 = vst [vmem:[%s1971_s6 + $0xf8] sm:$0xff] %v1298_v61 }

// kernel: hire_mlp.4
= control target key start
LH: loop header
LB: loop body
LE: loop exit
PB: predicated region body
PF: predicated region fallthrough
CT: control target
= control target key end

     0   :  { %s1655_s21 = smov 0   ;;  %s1657_s22 = smov 0   ;;  %s1900_s0 = inlined_call_operand.vmem [shape: bf16[2,8,2,16,128], index: 0, kind: input, shape index: {}]   ;;  %s1901_s1 = inlined_call_operand.vmem [shape: bf16[256,64], index: 1, kind: input, shape index: {}]   ;;  %s1902_s2 = inlined_call_operand.vmem [shape: f32[1,64], index: 2, kind: input, shape index: {}]   ;;  %s1903_s3 = inlined_call_operand.vmem [shape: f32[1,64], index: 3, kind: input, shape index: {}]   ;;  %s1904_s4 = inlined_call_operand.vmem [shape: bf16[64,256], index: 4, kind: input, shape index: {}]   ;;  %s1905_s5 = inlined_call_operand.vmem [shape: f32[1,256], index: 5, kind: input, shape index: {}]   ;;  %s1906_s6 = inlined_call_operand.vmem [shape: bf16[2,8,2,16,128], index: 6, kind: output, shape index: {}]  }
   0x1   :  { %s1659_s23 = smov 0  }
   0x2 LB: > { %s28_s24 = sadd.s32 1, %s1613_s22  ;;  %p1212_p0 = scmp.ge.s32.totalorder %s1617_s23, 1  ;;  %s1617_s23 = sphi %s1659_s23, %s16_s23   ;;  %s1613_s22 = sphi %s1657_s22, %s1908_s22   ;;  %s1609_s21 = sphi %s1655_s21, %s1907_s21  }
   0x3   : > { %p30_p1 = scmp.ge.s32.totalorder %s28_s24, 2  ;;  %p234_p2 = scmp.lt.s32.totalorder %s1617_s23, 3 }
   0x5   : > { %s1910_s24 = smov (%p30_p1, %s28_s24), 0  ;;  %p235_p3 = pnand %p1212_p0, %p234_p2 }
   0x6   : > { %v1551_v0 = vld [vmem:[%s1901_s1 + $0x40] sm:$0xff] (!%p235_p3)   ;;  %v1553_v2 = vld [vmem:[%s1901_s1 + $0x48] sm:$0xff] (!%p235_p3)   ;;  %p275_p4 = scmp.lt.s32.totalorder (!%p235_p3), %s1609_s21, 1  ;;  %v1555_v4 = vld [vmem:[%s1901_s1 + $0x50] sm:$0xff] (!%p235_p3)   ;;  %v1619_v40 = vmov (!%p235_p3), 0   ;;  %vm813_vm0 = vcmask (!%p235_p3), 523264  }
   0x7   : > { %238 = sbr.rel (%p235_p3) target bundleno = 540 (0x21c), region = 44  ;;  %v1552_v1 = vld [vmem:[%s1901_s1] sm:$0xff] (!%p235_p3)   ;;  %1462 = vmatprep.subr.bf16.mxu0 (!%p235_p3), %v1551_v0  ;;  %v1554_v3 = vld [vmem:[%s1901_s1 + $0x8] sm:$0xff] (!%p235_p3)   ;;  %v1556_v5 = vld [vmem:[%s1901_s1 + $0x10] sm:$0xff] (!%p235_p3)   ;;  %870 = vmatprep.mubr.bf16.mxu1 (!%p235_p3), %v1619_v40 }
   0x8   : > { %1463 = vmatpush3.bf16.msra.mxu0 (!%p235_p3), %v1552_v1  ;;  %v1557_v6 = vld [vmem:[%s1901_s1 + $0x58] sm:$0xff] (!%p235_p3)   ;;  %v1559_v8 = vld [vmem:[%s1901_s1 + $0x60] sm:$0xff] (!%p235_p3)   ;;  %v1561_v10 = vld [vmem:[%s1901_s1 + $0x68] sm:$0xff] (!%p235_p3)  }
   0x9   : > { %1464 = vmatprep.subr.bf16.mxu0 (!%p235_p3), %v1553_v2  ;;  %v1558_v7 = vld [vmem:[%s1901_s1 + $0x18] sm:$0xff] (!%p235_p3)   ;;  %v1560_v9 = vld [vmem:[%s1901_s1 + $0x20] sm:$0xff] (!%p235_p3)   ;;  %v1562_v12 = vld [vmem:[%s1901_s1 + $0x28] sm:$0xff] (!%p235_p3)  }
   0xa   : > { %v1563_v13 = vld [vmem:[%s1901_s1 + $0x70] sm:$0xff] (!%p235_p3)   ;;  %v1565_v15 = vld [vmem:[%s1901_s1 + $0x78] sm:$0xff] (!%p235_p3)   ;;  %v1583_v19 = vld [vmem:[%s1904_s4 + $0x4] ss:$8 sps:$4 sm:$0xff] (!%p235_p3)  }
   0xb   : > { %v1564_v14 = vld [vmem:[%s1901_s1 + $0x30] sm:$0xff] (!%p235_p3)   ;;  %v1566_v16 = vld [vmem:[%s1901_s1 + $0x38] sm:$0xff] (!%p235_p3)   ;;  %v1585_v20 = vld [vmem:[%s1904_s4] ss:$8 sps:$4 sm:$0xff] (!%p235_p3)   ;;  %838 = vmatprep.subr.bf16.mxu1 (!%p235_p3), %v1583_v19 }
   0xc   : > { %1465 = vmatpush3.bf16.msra.mxu0 (!%p235_p3), %v1554_v3  ;;  %839 = vmatpush1.bf16.msra.mxu1 (!%p235_p3), %v1585_v20  ;;  %v1586_v34 = vld [vmem:[%s1904_s4 + $0x14] ss:$8 sps:$4 sm:$0xff] (!%p235_p3)   ;;  %v1588_v35 = vld [vmem:[%s1904_s4 + $0x10] ss:$8 sps:$4 sm:$0xff] (!%p235_p3)   ;;  %v1589_v36 = vld [vmem:[%s1904_s4 + $0x24] ss:$8 sps:$4 sm:$0xff] (!%p235_p3)  }
   0xd   : > { %1466 = vmatprep.subr.bf16.mxu0 (!%p235_p3), %v1555_v4  ;;  %840 = vmatprep.subr.bf16.mxu1 (!%p235_p3), %v1586_v34  ;;  %v1591_v37 = vld [vmem:[%s1904_s4 + $0x20] ss:$8 sps:$4 sm:$0xff] (!%p235_p3)   ;;  %v1592_v38 = vld [vmem:[%s1904_s4 + $0x34] ss:$8 sps:$4 sm:$0xff] (!%p235_p3)   ;;  %v1594_v39 = vld [vmem:[%s1904_s4 + $0x30] ss:$8 sps:$4 sm:$0xff] (!%p235_p3)  }
   0xe   : > { %s1912_s21 = smov (!%p275_p4, %s1609_s21), 1  ;;  %v1775_v43 = vld [vmem:[%s1902_s2] ss:$0 sm:$0xff] }
   0xf   : > { %s1333_s15 = sshll.u32 %s1912_s21, 7  ;;  %v1780_v46 = vld [vmem:[%s1903_s3] ss:$0 sm:$0xff] }
  0x10   : > { %1467 = vmatpush3.bf16.msra.mxu0 %v1556_v5  ;;  %s1708_s26 = scalar_lea.vmem %s1900_s0, %s1333_s15  ;;  %841 = vmatpush1.bf16.msra.mxu1 %v1588_v35  ;;  %s1844_s28 = scalar_lea.vmem %s1906_s6, %s1333_s15 }
  0x11   : > { %1468 = vmatprep.subr.bf16.mxu0 %v1557_v6  ;;  %v1567_v11 = vld [vmem:[%s1708_s26 + $0x8] sm:$0xff]   ;;  %v1568_v17 = vld [vmem:[%s1708_s26] sm:$0xff]   ;;  %v1569_v18 = vld [vmem:[%s1708_s26 + $0x18] sm:$0xff]   ;;  %842 = vmatprep.subr.bf16.mxu1 %v1589_v36 }
  0x12   : > { %618 = vmatprep.mubr.bf16.mxu0 %v1567_v11  ;;  %v1570_v21 = vld [vmem:[%s1708_s26 + $0x10] sm:$0xff]   ;;  %v1571_v22 = vld [vmem:[%s1708_s26 + $0x28] sm:$0xff]   ;;  %v1572_v23 = vld [vmem:[%s1708_s26 + $0x20] sm:$0xff]  }
  0x13   : > { %v1573_v24 = vld [vmem:[%s1708_s26 + $0x38] sm:$0xff]   ;;  %v1574_v25 = vld [vmem:[%s1708_s26 + $0x30] sm:$0xff]   ;;  %v1575_v26 = vld [vmem:[%s1708_s26 + $0x48] sm:$0xff]  }
  0x14   : > { %1469 = vmatpush3.bf16.msra.mxu0 %v1558_v7  ;;  %v1576_v27 = vld [vmem:[%s1708_s26 + $0x40] sm:$0xff]   ;;  %v1577_v28 = vld [vmem:[%s1708_s26 + $0x58] sm:$0xff]   ;;  %v1578_v29 = vld [vmem:[%s1708_s26 + $0x50] sm:$0xff]   ;;  %843 = vmatpush1.bf16.msra.mxu1 %v1591_v37 }
  0x15   : > { %1470 = vmatprep.subr.bf16.mxu0 %v1559_v8  ;;  %v1579_v30 = vld [vmem:[%s1708_s26 + $0x68] sm:$0xff]   ;;  %v1580_v31 = vld [vmem:[%s1708_s26 + $0x60] sm:$0xff]   ;;  %v1581_v32 = vld [vmem:[%s1708_s26 + $0x78] sm:$0xff]   ;;  %844 = vmatprep.subr.bf16.mxu1 %v1592_v38 }
  0x16   : > { %v1582_v33 = vld [vmem:[%s1708_s26 + $0x70] sm:$0xff]  }
  0x18   : > { %1471 = vmatpush3.bf16.msra.mxu0 %v1560_v9  ;;  %845 = vmatpush1.bf16.msra.mxu1 %v1594_v39 }
  0x19   : > { %1472 = vmatprep.subr.bf16.mxu0 %v1561_v10 }
  0x1c   : > { %1473 = vmatpush3.bf16.msra.mxu0 %v1562_v12 }
  0x1d   : > { %1474 = vmatprep.subr.bf16.mxu0 %v1563_v13 }
  0x20   : > { %1475 = vmatpush3.bf16.msra.mxu0 %v1564_v14 }
  0x21   : > { %1476 = vmatprep.subr.bf16.mxu0 %v1565_v15 }
  0x24   : > { %1477 = vmatpush3.bf16.msra.mxu0 %v1566_v16 }
  0x27   : > { %619 = vmatmul.mubr.bf16.vlgmr.msra.gmra.mrb[0].mxu0 %v1568_v17 }
  0x28   : > { %626 = vmatprep.mubr.bf16.mxu0 %v1569_v18 }
  0x2f   : > { %627 = vmatmul.mubr.bf16.gmra.mrb[4].mxu0 %v1570_v21 }
  0x30   : > { %634 = vmatprep.mubr.bf16.mxu0 %v1571_v22 }
  0x37   : > { %635 = vmatmul.mubr.bf16.gmra.mrb[8].mxu0 %v1572_v23 }
  0x38   : > { %642 = vmatprep.mubr.bf16.mxu0 %v1573_v24 }
  0x3f   : > { %643 = vmatmul.mubr.bf16.gmra.mrb[12].mxu0 %v1574_v25 }
  0x40   : > { %650 = vmatprep.mubr.bf16.mxu0 %v1575_v26 }
  0x47   : > { %651 = vmatmul.mubr.bf16.gmra.mrb[16].mxu0 %v1576_v27 }
  0x48   : > { %658 = vmatprep.mubr.bf16.mxu0 %v1577_v28 }
  0x4f   : > { %659 = vmatmul.mubr.bf16.gmra.mrb[20].mxu0 %v1578_v29 }
  0x50   : > { %666 = vmatprep.mubr.bf16.mxu0 %v1579_v30 }
  0x57   : > { %667 = vmatmul.mubr.bf16.gmra.mrb[24].mxu0 %v1580_v31 }
  0x58   : > { %674 = vmatprep.mubr.bf16.mxu0 %v1581_v32 }
  0x5f   : > { %675 = vmatmul.mubr.bf16.gmra.mrb[28].mxu0 %v1582_v33 }
  0xfa   : > { %v1478_v41 = vpop.f32.mrb[0].mxu0 }
  0xfb   : > { %v1479_v42 = vpop.f32.mrb[1].mxu0 }
  0xfc   : > { %v1480_v44 = vadd.f32 %v1479_v42, %v1478_v41  ;;  %v1481_v45 = vpop.f32.mrb[2].mxu0 }
  0xfd   : > { %v1482_v47 = vpop.f32.mrb[3].mxu0 }
  0xfe   : > { %v690_v48 = vmul.f32 %v1480_v44, %v1775_v43  ;;  %v1483_v49 = vadd.f32 %v1482_v47, %v1481_v45 }
 0x100   : > { %v713_v50 = vadd.f32 %v1780_v46, %v690_v48  ;;  %v691_v51 = vmul.f32 %v1483_v49, %v1775_v43 }
 0x102   : > { %v714_v52 = vadd.f32 %v1780_v46, %v691_v51  ;;  %v1484_v53 = vpop.f32.mrb[4].mxu0  ;;  %v729_v55 = vmax.f32 %v713_v50, 0.0 }
 0x103   : > { %v1485_v54 = vpop.f32.mrb[5].mxu0 }
 0x104   : > { %v730_v56 = vmax.f32 %v714_v52, 0.0  ;;  %v1486_v57 = vadd.f32 %v1485_v54, %v1484_v53  ;;  %v1487_v58 = vpop.f32.mrb[6].mxu0 }
 0x105   : > { %v1488_v59 = vpop.f32.mrb[7].mxu0 }
 0x106   : > { %v745_v60 = vpack.c.bf16 %v730_v56, %v729_v55  ;;  %v692_v61 = vmul.f32 %v1486_v57, %v1775_v43  ;;  %v1489_v62 = vadd.f32 %v1488_v59, %v1487_v58 }
 0x108   : > { %v715_v63 = vadd.f32 %v1780_v46, %v692_v61  ;;  %v693_v0 = vmul.f32 %v1489_v62, %v1775_v43  ;;  %1275 = vmatmul.mubr.msk.bf16.vlgmr.msra.gmra.mrb[0].mxu1 %vm813_vm0, %v745_v60 }
 0x109   : > { %880 = vmatprep.mubr.bf16.mxu1 %v1619_v40 }
 0x10a   : > { %v716_v1 = vadd.f32 %v1780_v46, %v693_v0  ;;  %v1490_v2 = vpop.f32.mrb[8].mxu0  ;;  %v731_v4 = vmax.f32 %v715_v63, 0.0 }
 0x10b   : > { %v1491_v3 = vpop.f32.mrb[9].mxu0 }
 0x10c   : > { %v732_v5 = vmax.f32 %v716_v1, 0.0  ;;  %v1492_v6 = vadd.f32 %v1491_v3, %v1490_v2  ;;  %v1493_v7 = vpop.f32.mrb[10].mxu0 }
 0x10d   : > { %v1494_v8 = vpop.f32.mrb[11].mxu0 }
 0x10e   : > { %v746_v9 = vpack.c.bf16 %v732_v5, %v731_v4  ;;  %v694_v10 = vmul.f32 %v1492_v6, %v1775_v43  ;;  %v1495_v11 = vadd.f32 %v1494_v8, %v1493_v7 }
 0x110   : > { %v717_v12 = vadd.f32 %v1780_v46, %v694_v10  ;;  %v695_v13 = vmul.f32 %v1495_v11, %v1775_v43  ;;  %1276 = vmatmul.mubr.msk.bf16.gmra.mrb[4].mxu1 %vm813_vm0, %v746_v9 }
 0x111   : > { %890 = vmatprep.mubr.bf16.mxu1 %v1619_v40 }
 0x112   : > { %v718_v14 = vadd.f32 %v1780_v46, %v695_v13  ;;  %v1496_v15 = vpop.f32.mrb[12].mxu0  ;;  %v733_v17 = vmax.f32 %v717_v12, 0.0 }
 0x113   : > { %v1497_v16 = vpop.f32.mrb[13].mxu0 }
 0x114   : > { %v734_v18 = vmax.f32 %v718_v14, 0.0  ;;  %v1498_v19 = vadd.f32 %v1497_v16, %v1496_v15  ;;  %v1499_v20 = vpop.f32.mrb[14].mxu0 }
 0x115   : > { %v1500_v21 = vpop.f32.mrb[15].mxu0 }
 0x116   : > { %v747_v22 = vpack.c.bf16 %v734_v18, %v733_v17  ;;  %v696_v23 = vmul.f32 %v1498_v19, %v1775_v43  ;;  %v1501_v24 = vadd.f32 %v1500_v21, %v1499_v20 }
 0x118   : > { %v719_v25 = vadd.f32 %v1780_v46, %v696_v23  ;;  %v697_v26 = vmul.f32 %v1501_v24, %v1775_v43  ;;  %1277 = vmatmul.mubr.msk.bf16.gmra.mrb[8].mxu1 %vm813_vm0, %v747_v22  ;;  %v763_v22 = vlaneseq }
 0x119   : > { %900 = vmatprep.mubr.bf16.mxu1 %v1619_v40 }
 0x11a   : > { %v720_v27 = vadd.f32 %v1780_v46, %v697_v26  ;;  %v1502_v28 = vpop.f32.mrb[16].mxu0  ;;  %v735_v30 = vmax.f32 %v719_v25, 0.0  ;;  %v764_v23 = vshrl.u32 %v763_v22, 7  ;;  %v761_v25 = vld [vmem:[%s1905_s5] sm:$0x3] }
 0x11b   : > { %v1503_v29 = vpop.f32.mrb[17].mxu0 }
 0x11c   : > { %v736_v31 = vmax.f32 %v720_v27, 0.0  ;;  %v1504_v32 = vadd.f32 %v1503_v29, %v1502_v28  ;;  %v1505_v33 = vpop.f32.mrb[18].mxu0  ;;  %v765_v24 = vsub.s32 0, %v764_v23 }
 0x11d   : > { %v1506_v34 = vpop.f32.mrb[19].mxu0 }
 0x11e   : > { %v748_v35 = vpack.c.bf16 %v736_v31, %v735_v30  ;;  %v698_v36 = vmul.f32 %v1504_v32, %v1775_v43  ;;  %v1507_v37 = vadd.f32 %v1506_v34, %v1505_v33  ;;  %v1832_v26 = vrot.slane %v761_v25, %v765_v24 }
 0x120   : > { %v721_v38 = vadd.f32 %v1780_v46, %v698_v36  ;;  %v699_v39 = vmul.f32 %v1507_v37, %v1775_v43  ;;  %1278 = vmatmul.mubr.msk.bf16.gmra.mrb[12].mxu1 %vm813_vm0, %v748_v35 }
 0x121   : > { %910 = vmatprep.mubr.bf16.mxu1 %v1619_v40 }
 0x122   : > { %v722_v41 = vadd.f32 %v1780_v46, %v699_v39  ;;  %v1508_v42 = vpop.f32.mrb[20].mxu0  ;;  %v737_v45 = vmax.f32 %v721_v38, 0.0 }
 0x123   : > { %v1509_v44 = vpop.f32.mrb[21].mxu0 }
 0x124   : > { %v738_v47 = vmax.f32 %v722_v41, 0.0  ;;  %v1510_v48 = vadd.f32 %v1509_v44, %v1508_v42  ;;  %v1511_v49 = vpop.f32.mrb[22].mxu0 }
 0x125   : > { %v1512_v50 = vpop.f32.mrb[23].mxu0 }
 0x126   : > { %v749_v51 = vpack.c.bf16 %v738_v47, %v737_v45  ;;  %v700_v52 = vmul.f32 %v1510_v48, %v1775_v43  ;;  %v1513_v53 = vadd.f32 %v1512_v50, %v1511_v49 }
 0x128   : > { %v723_v54 = vadd.f32 %v1780_v46, %v700_v52  ;;  %v701_v55 = vmul.f32 %v1513_v53, %v1775_v43  ;;  %1279 = vmatmul.mubr.msk.bf16.gmra.mrb[16].mxu1 %vm813_vm0, %v749_v51 }
 0x129   : > { %920 = vmatprep.mubr.bf16.mxu1 %v1619_v40 }
 0x12a   : > { %v724_v56 = vadd.f32 %v1780_v46, %v701_v55  ;;  %v1514_v57 = vpop.f32.mrb[24].mxu0  ;;  %v739_v59 = vmax.f32 %v723_v54, 0.0 }
 0x12b   : > { %v1515_v58 = vpop.f32.mrb[25].mxu0 }
 0x12c   : > { %v740_v60 = vmax.f32 %v724_v56, 0.0  ;;  %v1516_v61 = vadd.f32 %v1515_v58, %v1514_v57  ;;  %v1517_v62 = vpop.f32.mrb[26].mxu0 }
 0x12d   : > { %v1518_v63 = vpop.f32.mrb[27].mxu0 }
 0x12e   : > { %v750_v0 = vpack.c.bf16 %v740_v60, %v739_v59  ;;  %v702_v1 = vmul.f32 %v1516_v61, %v1775_v43  ;;  %v1519_v2 = vadd.f32 %v1518_v63, %v1517_v62 }
 0x130   : > { %v725_v3 = vadd.f32 %v1780_v46, %v702_v1  ;;  %v703_v4 = vmul.f32 %v1519_v2, %v1775_v43  ;;  %1280 = vmatmul.mubr.msk.bf16.gmra.mrb[20].mxu1 %vm813_vm0, %v750_v0 }
 0x131   : > { %930 = vmatprep.mubr.bf16.mxu1 %v1619_v40 }
 0x132   : > { %v726_v5 = vadd.f32 %v1780_v46, %v703_v4  ;;  %v1520_v6 = vpop.f32.mrb[28].mxu0  ;;  %v741_v8 = vmax.f32 %v725_v3, 0.0 }
 0x133   : > { %v1521_v7 = vpop.f32.mrb[29].mxu0 }
 0x134   : > { %v742_v9 = vmax.f32 %v726_v5, 0.0  ;;  %v1522_v10 = vadd.f32 %v1521_v7, %v1520_v6  ;;  %v1523_v11 = vpop.f32.mrb[30].mxu0 }
 0x135   : > { %v1524_v12 = vpop.f32.mrb[31].mxu0 }
 0x136   : > { %v751_v13 = vpack.c.bf16 %v742_v9, %v741_v8  ;;  %v704_v14 = vmul.f32 %v1522_v10, %v1775_v43  ;;  %v1525_v15 = vadd.f32 %v1524_v12, %v1523_v11 }
 0x138   : > { %v727_v16 = vadd.f32 %v1780_v46, %v704_v14  ;;  %v705_v17 = vmul.f32 %v1525_v15, %v1775_v43  ;;  %1281 = vmatmul.mubr.msk.bf16.gmra.mrb[24].mxu1 %vm813_vm0, %v751_v13  ;;  %v769_v43 = vsub.s32 1, %v764_v23 }
 0x139   : > { %940 = vmatprep.mubr.bf16.mxu1 %v1619_v40 }
 0x13a   : > { %v728_v18 = vadd.f32 %v1780_v46, %v705_v17  ;;  %v743_v19 = vmax.f32 %v727_v16, 0.0  ;;  %v1834_v40 = vrot.slane %v761_v25, %v769_v43 }
 0x13c   : > { %v744_v20 = vmax.f32 %v728_v18, 0.0 }
 0x13e   : > { %v752_v21 = vpack.c.bf16 %v744_v20, %v743_v19 }
 0x140   : > { %1282 = vmatmul.mubr.msk.bf16.gmra.mrb[28].mxu1 %vm813_vm0, %v752_v21 }
 0x1db   : > { %v872_v27 = vpop.f32.mrb[0].mxu1 }
 0x1dc   : > { %v874_v46 = vpop.f32.mrb[1].mxu1  ;;  %v873_v29 = vadd.f32 %v872_v27, %v1832_v26 }
 0x1dd   : > { %v876_v28 = vpop.f32.mrb[2].mxu1  ;;  %v875_v32 = vadd.f32 %v874_v46, %v1834_v40 }
 0x1de   : > { %v877_v30 = vadd.f32 %v876_v28, %v1832_v26  ;;  %v878_v31 = vpop.f32.mrb[3].mxu1 }
 0x1df   : > { %v879_v33 = vadd.f32 %v878_v31, %v1834_v40 }
 0x1e0   : > { %v1370_v34 = vpack.c.bf16 %v877_v30, %v873_v29 }
 0x1e1   : > { %v1410_v35 = vpack.c.bf16 %v879_v33, %v875_v32 }
 0x1e2   : > { %1371 = vst [vmem:[%s1844_s28] sm:$0xff] %v1370_v34  }
 0x1e3   : > { %1454 = vst [vmem:[%s1844_s28 + $0x8] sm:$0xff] %v1410_v35   ;;  %v882_v36 = vpop.f32.mrb[4].mxu1 }
 0x1e4   : > { %v884_v37 = vpop.f32.mrb[5].mxu1  ;;  %v883_v39 = vadd.f32 %v882_v36, %v1832_v26 }
 0x1e5   : > { %v886_v38 = vpop.f32.mrb[6].mxu1  ;;  %v885_v44 = vadd.f32 %v884_v37, %v1834_v40 }
 0x1e6   : > { %v887_v41 = vadd.f32 %v886_v38, %v1832_v26  ;;  %v888_v42 = vpop.f32.mrb[7].mxu1 }
 0x1e7   : > { %v889_v45 = vadd.f32 %v888_v42, %v1834_v40 }
 0x1e8   : > { %v1375_v47 = vpack.c.bf16 %v887_v41, %v883_v39 }
 0x1e9   : > { %v1415_v48 = vpack.c.bf16 %v889_v45, %v885_v44 }
 0x1ea   : > { %1447 = vst [vmem:[%s1844_s28 + $0x10] sm:$0xff] %v1375_v47  }
 0x1eb   : > { %1455 = vst [vmem:[%s1844_s28 + $0x18] sm:$0xff] %v1415_v48   ;;  %v892_v49 = vpop.f32.mrb[8].mxu1 }
 0x1ec   : > { %v894_v50 = vpop.f32.mrb[9].mxu1  ;;  %v893_v52 = vadd.f32 %v892_v49, %v1832_v26 }
 0x1ed   : > { %v896_v51 = vpop.f32.mrb[10].mxu1  ;;  %v895_v55 = vadd.f32 %v894_v50, %v1834_v40 }
 0x1ee   : > { %v897_v53 = vadd.f32 %v896_v51, %v1832_v26  ;;  %v898_v54 = vpop.f32.mrb[11].mxu1 }
 0x1ef   : > { %v899_v56 = vadd.f32 %v898_v54, %v1834_v40 }
 0x1f0   : > { %v1380_v57 = vpack.c.bf16 %v897_v53, %v893_v52 }
 0x1f1   : > { %v1420_v58 = vpack.c.bf16 %v899_v56, %v895_v55 }
 0x1f2   : > { %1448 = vst [vmem:[%s1844_s28 + $0x20] sm:$0xff] %v1380_v57  }
 0x1f3   : > { %1456 = vst [vmem:[%s1844_s28 + $0x28] sm:$0xff] %v1420_v58   ;;  %v902_v59 = vpop.f32.mrb[12].mxu1 }
 0x1f4   : > { %v904_v60 = vpop.f32.mrb[13].mxu1  ;;  %v903_v62 = vadd.f32 %v902_v59, %v1832_v26 }
 0x1f5   : > { %v906_v61 = vpop.f32.mrb[14].mxu1  ;;  %v905_v1 = vadd.f32 %v904_v60, %v1834_v40 }
 0x1f6   : > { %v907_v63 = vadd.f32 %v906_v61, %v1832_v26  ;;  %v908_v0 = vpop.f32.mrb[15].mxu1 }
 0x1f7   : > { %v909_v2 = vadd.f32 %v908_v0, %v1834_v40 }
 0x1f8   : > { %v1385_v3 = vpack.c.bf16 %v907_v63, %v903_v62 }
 0x1f9   : > { %v1425_v4 = vpack.c.bf16 %v909_v2, %v905_v1 }
 0x1fa   : > { %1449 = vst [vmem:[%s1844_s28 + $0x30] sm:$0xff] %v1385_v3  }
 0x1fb   : > { %1457 = vst [vmem:[%s1844_s28 + $0x38] sm:$0xff] %v1425_v4   ;;  %v912_v5 = vpop.f32.mrb[16].mxu1 }
 0x1fc   : > { %v914_v6 = vpop.f32.mrb[17].mxu1  ;;  %v913_v8 = vadd.f32 %v912_v5, %v1832_v26 }
 0x1fd   : > { %v916_v7 = vpop.f32.mrb[18].mxu1  ;;  %v915_v11 = vadd.f32 %v914_v6, %v1834_v40 }
 0x1fe   : > { %v917_v9 = vadd.f32 %v916_v7, %v1832_v26  ;;  %v918_v10 = vpop.f32.mrb[19].mxu1 }
 0x1ff   : > { %v919_v12 = vadd.f32 %v918_v10, %v1834_v40 }
 0x200   : > { %v1390_v13 = vpack.c.bf16 %v917_v9, %v913_v8 }
 0x201   : > { %v1430_v14 = vpack.c.bf16 %v919_v12, %v915_v11 }
 0x202   : > { %1450 = vst [vmem:[%s1844_s28 + $0x40] sm:$0xff] %v1390_v13  }
 0x203   : > { %1458 = vst [vmem:[%s1844_s28 + $0x48] sm:$0xff] %v1430_v14   ;;  %v922_v15 = vpop.f32.mrb[20].mxu1 }
 0x204   : > { %v924_v16 = vpop.f32.mrb[21].mxu1  ;;  %v923_v18 = vadd.f32 %v922_v15, %v1832_v26 }
 0x205   : > { %v926_v17 = vpop.f32.mrb[22].mxu1  ;;  %v925_v21 = vadd.f32 %v924_v16, %v1834_v40 }
 0x206   : > { %v927_v19 = vadd.f32 %v926_v17, %v1832_v26  ;;  %v928_v20 = vpop.f32.mrb[23].mxu1 }
 0x207   : > { %v929_v22 = vadd.f32 %v928_v20, %v1834_v40 }
 0x208   : > { %v1395_v23 = vpack.c.bf16 %v927_v19, %v923_v18 }
 0x209   : > { %v1435_v24 = vpack.c.bf16 %v929_v22, %v925_v21 }
 0x20a   : > { %1451 = vst [vmem:[%s1844_s28 + $0x50] sm:$0xff] %v1395_v23  }
 0x20b   : > { %1459 = vst [vmem:[%s1844_s28 + $0x58] sm:$0xff] %v1435_v24   ;;  %v932_v25 = vpop.f32.mrb[24].mxu1 }
 0x20c   : > { %v934_v43 = vpop.f32.mrb[25].mxu1  ;;  %v933_v46 = vadd.f32 %v932_v25, %v1832_v26 }
 0x20d   : > { %v936_v27 = vpop.f32.mrb[26].mxu1  ;;  %v935_v30 = vadd.f32 %v934_v43, %v1834_v40 }
 0x20e   : > { %v937_v28 = vadd.f32 %v936_v27, %v1832_v26  ;;  %v938_v29 = vpop.f32.mrb[27].mxu1 }
 0x20f   : > { %v939_v31 = vadd.f32 %v938_v29, %v1834_v40 }
 0x210   : > { %v1400_v32 = vpack.c.bf16 %v937_v28, %v933_v46 }
 0x211   : > { %v1440_v33 = vpack.c.bf16 %v939_v31, %v935_v30 }
 0x212   : > { %1452 = vst [vmem:[%s1844_s28 + $0x60] sm:$0xff] %v1400_v32  }
 0x213   : > { %1460 = vst [vmem:[%s1844_s28 + $0x68] sm:$0xff] %v1440_v33   ;;  %v942_v34 = vpop.f32.mrb[28].mxu1 }
 0x214   : > { %v944_v35 = vpop.f32.mrb[29].mxu1  ;;  %v943_v37 = vadd.f32 %v942_v34, %v1832_v26 }
 0x215   : > { %v946_v36 = vpop.f32.mrb[30].mxu1  ;;  %v945_v41 = vadd.f32 %v944_v35, %v1834_v40 }
 0x216   : > { %v947_v38 = vadd.f32 %v946_v36, %v1832_v26  ;;  %v948_v39 = vpop.f32.mrb[31].mxu1 }
 0x217   : > { %v949_v42 = vadd.f32 %v948_v39, %v1834_v40 }
 0x218   : > { %v1405_v44 = vpack.c.bf16 %v947_v38, %v943_v37 }
 0x219   : > { %v1445_v45 = vpack.c.bf16 %v949_v42, %v945_v41 }
 0x21a   : > { %1453 = vst [vmem:[%s1844_s28 + $0x70] sm:$0xff] %v1405_v44  }
 0x21b   : > { %1461 = vst [vmem:[%s1844_s28 + $0x78] sm:$0xff] %v1445_v45  }
 0x21c PF: > { %s16_s23 = sadd.s32 1, %s1617_s23   ;;  %s1907_s21 = smov %s1613_s22 }
 0x21d   : > { %p13_p5 = scmp.ge.s32.totalorder %s16_s23, 4   ;;  %s1908_s22 = smov %s1910_s24 }
 0x21f   :  { %15 = sbr.rel (!%p13_p5) target bundleno = 2 (0x2), region = 76 }

// kernel: hire_mlp.6
= control target key start
LH: loop header
LB: loop body
LE: loop exit
PB: predicated region body
PF: predicated region fallthrough
CT: control target
= control target key end

     0   :  { %s1412_s18 = smov 0   ;;  %s1414_s19 = smov 0   ;;  %s1669_s0 = inlined_call_operand.vmem [shape: bf16[2,256,128], index: 0, kind: input, shape index: {}]   ;;  %s1670_s1 = inlined_call_operand.vmem [shape: bf16[2,256,128], index: 1, kind: input, shape index: {}]   ;;  %s1671_s2 = inlined_call_operand.vmem [shape: bf16[2,256,128], index: 2, kind: input, shape index: {}]   ;;  %s1672_s3 = inlined_call_operand.vmem [shape: bf16[128,128], index: 3, kind: input, shape index: {}]   ;;  %s1673_s4 = inlined_call_operand.vmem [shape: f32[1,128], index: 4, kind: input, shape index: {}]   ;;  %s1674_s5 = inlined_call_operand.vmem [shape: f32[2,1,128], index: 5, kind: output, shape index: {}]  }
   0x1   :  { %s1416_s20 = smov 0  }
   0x2 LB: > { %s27_s21 = sadd.s32 1, %s1375_s19  ;;  %p1025_p0 = scmp.ge.s32.totalorder %s1379_s20, 1  ;;  %s1379_s20 = sphi %s1416_s20, %s15_s20   ;;  %s1375_s19 = sphi %s1414_s19, %s1676_s19   ;;  %s1371_s18 = sphi %s1412_s18, %s1675_s18  }
   0x3   : > { %p29_p1 = scmp.ge.s32.totalorder %s27_s21, 2  ;;  %p240_p2 = scmp.lt.s32.totalorder %s1379_s20, 3 }
   0x5   : > { %s1678_s21 = smov (%p29_p1, %s27_s21), 0  ;;  %p241_p3 = pnand %p1025_p0, %p240_p2 }
   0x6   : > { %v1333_v0 = vld [vmem:[%s1672_s3] sm:$0xff] (!%p241_p3)   ;;  %p289_p4 = scmp.lt.s32.totalorder (!%p241_p3), %s1371_s18, 1  ;;  %v1334_v1 = vld [vmem:[%s1672_s3 + $0x8] sm:$0xff] (!%p241_p3)   ;;  %v1335_v2 = vld [vmem:[%s1672_s3 + $0x10] sm:$0xff] (!%p241_p3)   ;;  %v1381_v24 = vmov (!%p241_p3), 0.0  }
   0x7   : > { %244 = sbr.rel (%p241_p3) target bundleno = 343 (0x157), region = 40  ;;  %1244 = vmatprep.subr.bf16.mxu0 (!%p241_p3), %v1333_v0  ;;  %1292 = vmatprep.subr.bf16.mxu1 (!%p241_p3), %v1333_v0  ;;  %v1336_v3 = vld [vmem:[%s1672_s3 + $0x18] sm:$0xff] (!%p241_p3)   ;;  %v1337_v5 = vld [vmem:[%s1672_s3 + $0x20] sm:$0xff] (!%p241_p3)   ;;  %v1338_v6 = vld [vmem:[%s1672_s3 + $0x28] sm:$0xff] (!%p241_p3)   ;;  %326 = vst [vmem:[#allocation2] sm:$0x1] (!%p241_p3), %v1381_v24 }
   0x8   : > { %1245 = vmatpush3.bf16.msra.mxu0 (!%p241_p3), %v1333_v0  ;;  %1300 = vmatpush3.bf16.msra.mxu1 (!%p241_p3), %v1333_v0  ;;  %v1339_v8 = vld [vmem:[%s1672_s3 + $0x30] sm:$0xff] (!%p241_p3)   ;;  %v1340_v9 = vld [vmem:[%s1672_s3 + $0x38] sm:$0xff] (!%p241_p3)  }
   0x9   : > { %1246 = vmatprep.subr.bf16.mxu0 (!%p241_p3), %v1334_v1  ;;  %1293 = vmatprep.subr.bf16.mxu1 (!%p241_p3), %v1334_v1 }
   0xc   : > { %1247 = vmatpush3.bf16.msra.mxu0 (!%p241_p3), %v1334_v1  ;;  %1301 = vmatpush3.bf16.msra.mxu1 (!%p241_p3), %v1334_v1 }
   0xd   : > { %1248 = vmatprep.subr.bf16.mxu0 (!%p241_p3), %v1335_v2  ;;  %1294 = vmatprep.subr.bf16.mxu1 (!%p241_p3), %v1335_v2 }
   0xe   : > { %s1680_s18 = smov (!%p289_p4, %s1371_s18), 1 }
   0xf   : > { %s1442_s28 = sshll.u32 %s1680_s18, 7 }
  0x10   : > { %s1448_s6 = scalar_lea.vmem %s1669_s0, %s1442_s28  ;;  %1249 = vmatpush3.bf16.msra.mxu0 %v1335_v2  ;;  %1302 = vmatpush3.bf16.msra.mxu1 %v1335_v2  ;;  %s1485_s23 = scalar_lea.vmem %s1670_s1, %s1442_s28 }
  0x11   : > { %v1341_v4 = vld [vmem:[%s1448_s6] sm:$0xff]   ;;  %1250 = vmatprep.subr.bf16.mxu0 %v1336_v3  ;;  %1295 = vmatprep.subr.bf16.mxu1 %v1336_v3  ;;  %v1342_v10 = vld [vmem:[%s1448_s6 + $0x8] sm:$0xff]   ;;  %v1343_v12 = vld [vmem:[%s1448_s6 + $0x10] sm:$0xff]   ;;  %s1491_s26 = scalar_lea.vmem %s1671_s2, %s1442_s28 }
  0x12   : > { %1260 = vmatprep.mubr.bf16.mxu0 %v1341_v4  ;;  %v1349_v7 = vld [vmem:[%s1448_s6 + $0x40] sm:$0xff]   ;;  %v1350_v11 = vld [vmem:[%s1448_s6 + $0x48] sm:$0xff]   ;;  %v1351_v13 = vld [vmem:[%s1448_s6 + $0x50] sm:$0xff]  }
  0x13   : > { %1276 = vmatprep.mubr.bf16.mxu1 %v1349_v7  ;;  %v1344_v14 = vld [vmem:[%s1448_s6 + $0x18] sm:$0xff]   ;;  %v1345_v16 = vld [vmem:[%s1448_s6 + $0x20] sm:$0xff]   ;;  %v1346_v18 = vld [vmem:[%s1448_s6 + $0x28] sm:$0xff]  }
  0x14   : > { %1251 = vmatpush3.bf16.msra.mxu0 %v1336_v3  ;;  %1303 = vmatpush3.bf16.msra.mxu1 %v1336_v3  ;;  %v1352_v15 = vld [vmem:[%s1448_s6 + $0x58] sm:$0xff]   ;;  %v1353_v17 = vld [vmem:[%s1448_s6 + $0x60] sm:$0xff]   ;;  %v1354_v19 = vld [vmem:[%s1448_s6 + $0x68] sm:$0xff]  }
  0x15   : > { %1252 = vmatprep.subr.bf16.mxu0 %v1337_v5  ;;  %1296 = vmatprep.subr.bf16.mxu1 %v1337_v5  ;;  %v1347_v20 = vld [vmem:[%s1448_s6 + $0x30] sm:$0xff]   ;;  %v1348_v22 = vld [vmem:[%s1448_s6 + $0x38] sm:$0xff]   ;;  %v1190_v25 = vld [vmem:[%s1485_s23 + $0x8] sm:$0xff]  }
  0x16   : > { %v1355_v21 = vld [vmem:[%s1448_s6 + $0x70] sm:$0xff]   ;;  %v1356_v23 = vld [vmem:[%s1448_s6 + $0x78] sm:$0xff]   ;;  %v1205_v26 = vld [vmem:[%s1491_s26 + $0x8] sm:$0xff]   ;;  %v1068_v29 = vunpack.c.l.bf16 %v1190_v25  ;;  %v1069_v33 = vunpack.c.h.bf16 %v1190_v25  ;;  %s320_s6 = scalar_lea.vmem %s1674_s5, %s1680_s18 }
  0x17   : > { %v1063_v27 = vld [vmem:[%s1485_s23] sm:$0xff]   ;;  %v1132_v30 = vunpack.c.l.bf16 %v1205_v26  ;;  %v1133_v34 = vunpack.c.h.bf16 %v1205_v26  ;;  %v1192_v35 = vld [vmem:[%s1485_s23 + $0x18] sm:$0xff]   ;;  %v1191_v37 = vld [vmem:[%s1485_s23 + $0x10] sm:$0xff]  }
  0x18   : > { %1253 = vmatpush3.bf16.msra.mxu0 %v1337_v5  ;;  %1304 = vmatpush3.bf16.msra.mxu1 %v1337_v5  ;;  %v1127_v28 = vld [vmem:[%s1491_s26] sm:$0xff]   ;;  %v1064_v31 = vunpack.c.l.bf16 %v1063_v27  ;;  %v1207_v36 = vld [vmem:[%s1491_s26 + $0x18] sm:$0xff]   ;;  %v1206_v38 = vld [vmem:[%s1491_s26 + $0x10] sm:$0xff]   ;;  %v1065_v43 = vunpack.c.h.bf16 %v1063_v27  ;;  %v1076_v48 = vunpack.c.l.bf16 %v1192_v35  ;;  %v1072_v50 = vunpack.c.l.bf16 %v1191_v37 }
  0x19   : > { %1254 = vmatprep.subr.bf16.mxu0 %v1338_v6  ;;  %1297 = vmatprep.subr.bf16.mxu1 %v1338_v6  ;;  %v1128_v32 = vunpack.c.l.bf16 %v1127_v28  ;;  %v1501_v39 = vadd.f32 %v1132_v30, %v1068_v29  ;;  %v1194_v40 = vld [vmem:[%s1485_s23 + $0x28] sm:$0xff]   ;;  %v1506_v42 = vadd.f32 %v1133_v34, %v1069_v33  ;;  %v1129_v44 = vunpack.c.h.bf16 %v1127_v28  ;;  %v1193_v46 = vld [vmem:[%s1485_s23 + $0x20] sm:$0xff]   ;;  %v1215_v24 = vld [vmem:[%s1491_s26 + $0x58] sm:$0xff]  }
  0x1a   : > { %v1209_v45 = vld [vmem:[%s1491_s26 + $0x28] sm:$0xff]   ;;  %v1208_v47 = vld [vmem:[%s1491_s26 + $0x20] sm:$0xff]   ;;  %v1140_v49 = vunpack.c.l.bf16 %v1207_v36  ;;  %v1136_v51 = vunpack.c.l.bf16 %v1206_v38  ;;  %v1077_v52 = vunpack.c.h.bf16 %v1192_v35  ;;  %v1141_v53 = vunpack.c.h.bf16 %v1207_v36  ;;  %v1199_v25 = vld [vmem:[%s1485_s23 + $0x50] sm:$0xff]  }
  0x1b   : > { %v1504_v41 = vadd.f32 %v1128_v32, %v1064_v31  ;;  %v1073_v54 = vunpack.c.h.bf16 %v1191_v37  ;;  %v1137_v55 = vunpack.c.h.bf16 %v1206_v38  ;;  %v1198_v56 = vld [vmem:[%s1485_s23 + $0x48] sm:$0xff]   ;;  %v1197_v58 = vld [vmem:[%s1485_s23 + $0x40] sm:$0xff]   ;;  %v1084_v59 = vunpack.c.l.bf16 %v1194_v40  ;;  %v1214_v31 = vld [vmem:[%s1491_s26 + $0x50] sm:$0xff]  }
  0x1c   : > { %1255 = vmatpush3.bf16.msra.mxu0 %v1338_v6  ;;  %1305 = vmatpush3.bf16.msra.mxu1 %v1338_v6  ;;  %v1213_v57 = vld [vmem:[%s1491_s26 + $0x48] sm:$0xff]   ;;  %v1148_v60 = vunpack.c.l.bf16 %v1209_v45  ;;  %v1080_v61 = vunpack.c.l.bf16 %v1193_v46  ;;  %v1144_v62 = vunpack.c.l.bf16 %v1208_v47  ;;  %v1212_v63 = vld [vmem:[%s1491_s26 + $0x40] sm:$0xff]   ;;  %v1085_v0 = vunpack.c.h.bf16 %v1194_v40 }
  0x1d   : > { %1256 = vmatprep.subr.bf16.mxu0 %v1339_v8  ;;  %1298 = vmatprep.subr.bf16.mxu1 %v1339_v8  ;;  %v1149_v1 = vunpack.c.h.bf16 %v1209_v45  ;;  %v1081_v2 = vunpack.c.h.bf16 %v1193_v46  ;;  %v1145_v3 = vunpack.c.h.bf16 %v1208_v47  ;;  %v1100_v4 = vunpack.c.l.bf16 %v1198_v56  ;;  %v1544_v26 = vld [vmem:[%s1673_s4] ss:$0 sm:$0xff] }
  0x1e   : > { %v1164_v5 = vunpack.c.l.bf16 %v1213_v57  ;;  %v1096_v6 = vunpack.c.l.bf16 %v1197_v58  ;;  %v1101_v7 = vunpack.c.h.bf16 %v1198_v56  ;;  %v1172_v40 = vunpack.c.l.bf16 %v1215_v24 }
  0x1f   : > { %v1546_v27 = vadd.f32 %v1145_v3, %v1081_v2  ;;  %v1105_v56 = vunpack.c.h.bf16 %v1199_v25 }
  0x20   : > { %1257 = vmatpush3.bf16.msra.mxu0 %v1339_v8  ;;  %1306 = vmatpush3.bf16.msra.mxu1 %v1339_v8  ;;  %v1516_v8 = vld [vmem:[%s1485_s23 + $0x38] sm:$0xff]   ;;  %v833_v32 = vadd.f32 %v1164_v5, %v1100_v4  ;;  %v1202_v4 = vld [vmem:[%s1485_s23 + $0x68] sm:$0xff]  }
  0x21   : > { %1258 = vmatprep.subr.bf16.mxu0 %v1340_v9  ;;  %1299 = vmatprep.subr.bf16.mxu1 %v1340_v9  ;;  %v1092_v28 = vunpack.c.l.bf16 %v1516_v8 }
  0x24   : > { %1259 = vmatpush3.bf16.msra.mxu0 %v1340_v9  ;;  %1307 = vmatpush3.bf16.msra.mxu1 %v1340_v9  ;;  %v1519_v9 = vld [vmem:[%s1491_s26 + $0x38] sm:$0xff]  }
  0x25   : > { %v1156_v29 = vunpack.c.l.bf16 %v1519_v9 }
  0x27   : > { %1261 = vmatmul.mubr.bf16.vlgmr.msra.gmra.mrb[0].mxu0 %v1342_v10  ;;  %1277 = vmatmul.mubr.bf16.vlgmr.msra.gmra.mrb[0].mxu1 %v1350_v11  ;;  %v1522_v10 = vld [vmem:[%s1485_s23 + $0x30] sm:$0xff]   ;;  %v1160_v11 = vunpack.c.l.bf16 %v1212_v63 }
  0x28   : > { %1264 = vmatprep.mubr.bf16.mxu0 %v1343_v12  ;;  %1280 = vmatprep.mubr.bf16.mxu1 %v1351_v13  ;;  %v1165_v12 = vunpack.c.h.bf16 %v1213_v57  ;;  %v1097_v13 = vunpack.c.h.bf16 %v1197_v58  ;;  %v1088_v30 = vunpack.c.l.bf16 %v1522_v10  ;;  %v1169_v57 = vunpack.c.h.bf16 %v1214_v31 }
  0x29   : > { %v831_v33 = vadd.f32 %v1160_v11, %v1096_v6 }
  0x2a   : > { %v834_v34 = vadd.f32 %v1165_v12, %v1101_v7  ;;  %v1093_v7 = vunpack.c.h.bf16 %v1516_v8  ;;  %v1201_v12 = vld [vmem:[%s1485_s23 + $0x60] sm:$0xff]  }
  0x2f   : > { %1265 = vmatmul.mubr.bf16.gmra.mrb[4].mxu0 %v1344_v14  ;;  %1281 = vmatmul.mubr.bf16.gmra.mrb[4].mxu1 %v1352_v15  ;;  %v1161_v14 = vunpack.c.h.bf16 %v1212_v63  ;;  %v816_v15 = vadd.f32 %v1129_v44, %v1065_v43  ;;  %v1104_v43 = vunpack.c.l.bf16 %v1199_v25 }
  0x30   : > { %1268 = vmatprep.mubr.bf16.mxu0 %v1345_v16  ;;  %1284 = vmatprep.mubr.bf16.mxu1 %v1353_v17  ;;  %v1524_v16 = vadd.f32 %v1140_v49, %v1076_v48  ;;  %v1526_v17 = vadd.f32 %v1136_v51, %v1072_v50  ;;  %v1168_v49 = vunpack.c.l.bf16 %v1214_v31  ;;  %v1173_v50 = vunpack.c.h.bf16 %v1215_v24 }
  0x31   : > { %v832_v35 = vadd.f32 %v1161_v14, %v1097_v13  ;;  %v1216_v13 = vld [vmem:[%s1491_s26 + $0x60] sm:$0xff]   ;;  %v836_v31 = vadd.f32 %v1169_v57, %v1105_v56 }
  0x32   : > { %v835_v24 = vadd.f32 %v1168_v49, %v1104_v43 }
  0x37   : > { %1269 = vmatmul.mubr.bf16.gmra.mrb[8].mxu0 %v1346_v18  ;;  %1285 = vmatmul.mubr.bf16.gmra.mrb[8].mxu1 %v1354_v19  ;;  %v1528_v18 = vadd.f32 %v1141_v53, %v1077_v52  ;;  %v1530_v19 = vadd.f32 %v1137_v55, %v1073_v54  ;;  %v1556_v53 = vld [vmem:[%s1491_s26 + $0x30] sm:$0xff]  }
  0x38   : > { %1272 = vmatprep.mubr.bf16.mxu0 %v1347_v20  ;;  %1288 = vmatprep.mubr.bf16.mxu1 %v1355_v21  ;;  %v1532_v20 = vadd.f32 %v1148_v60, %v1084_v59  ;;  %v1534_v21 = vadd.f32 %v1144_v62, %v1080_v61  ;;  %v1152_v6 = vunpack.c.l.bf16 %v1556_v53 }
  0x3f   : > { %1273 = vmatmul.mubr.bf16.gmra.mrb[12].mxu0 %v1348_v22  ;;  %1289 = vmatmul.mubr.bf16.gmra.mrb[12].mxu1 %v1356_v23  ;;  %v1536_v22 = vadd.f32 %v1149_v1, %v1085_v0  ;;  %v1200_v23 = vld [vmem:[%s1485_s23 + $0x58] sm:$0xff]  }
  0x40   : > { %v1108_v38 = vunpack.c.l.bf16 %v1200_v23  ;;  %v1109_v44 = vunpack.c.h.bf16 %v1200_v23 }
  0x42   : > { %v837_v23 = vadd.f32 %v1172_v40, %v1108_v38  ;;  %v838_v25 = vadd.f32 %v1173_v50, %v1109_v44  ;;  %v1177_v50 = vunpack.c.h.bf16 %v1216_v13 }
  0xfa   : > { %v1262_v36 = vpop.f32.mrb[0].mxu0  ;;  %v1278_v37 = vpop.f32.mrb[0].mxu1 }
  0xfb   : > { %v569_v45 = vadd.f32 %v1262_v36, %v1544_v26  ;;  %v560_v46 = vpop.f32.mrb[1].mxu0  ;;  %v633_v47 = vadd.f32 %v1278_v37, %v1544_v26  ;;  %v624_v48 = vpop.f32.mrb[1].mxu1 }
  0xfc   : > { %v561_v51 = vadd.f32 %v1544_v26, %v560_v46  ;;  %v1263_v52 = vpop.f32.mrb[2].mxu0  ;;  %v625_v54 = vadd.f32 %v1544_v26, %v624_v48  ;;  %v1279_v55 = vpop.f32.mrb[2].mxu1  ;;  %v1176_v46 = vunpack.c.l.bf16 %v1216_v13 }
  0xfd   : > { %v849_v58 = vadd.f32 %v1501_v39, %v569_v45  ;;  %v572_v59 = vadd.f32 %v1263_v52, %v1544_v26  ;;  %v563_v60 = vpop.f32.mrb[3].mxu0  ;;  %v1561_v61 = vadd.f32 %v833_v32, %v633_v47  ;;  %v636_v62 = vadd.f32 %v1279_v55, %v1544_v26  ;;  %v627_v63 = vpop.f32.mrb[3].mxu1  ;;  %v1217_v39 = vld [vmem:[%s1491_s26 + $0x68] sm:$0xff]  }
  0xfe   : > { %v847_v0 = vadd.f32 %v1504_v41, %v561_v51  ;;  %v564_v1 = vadd.f32 %v1544_v26, %v563_v60  ;;  %v1566_v2 = vadd.f32 %v831_v33, %v625_v54  ;;  %v628_v3 = vadd.f32 %v1544_v26, %v627_v63 }
  0xff   : > { %v850_v5 = vadd.f32 %v1506_v42, %v572_v59  ;;  %v1574_v11 = vadd.f32 %v834_v34, %v636_v62  ;;  %v1116_v32 = vunpack.c.l.bf16 %v1202_v4  ;;  %v1180_v33 = vunpack.c.l.bf16 %v1217_v39 }
 0x100   : > { %v848_v14 = vadd.f32 %v816_v15, %v564_v1  ;;  %v1578_v41 = vadd.f32 %v832_v35, %v628_v3  ;;  %v1112_v45 = vunpack.c.l.bf16 %v1201_v12  ;;  %v1117_v47 = vunpack.c.h.bf16 %v1202_v4 }
 0x101   : > { %v1181_v35 = vunpack.c.h.bf16 %v1217_v39  ;;  %v1113_v52 = vunpack.c.h.bf16 %v1201_v12  ;;  %v1599_v39 = vld [vmem:[%s1485_s23 + $0x78] sm:$0xff]  }
 0x102   : > { %v880_v36 = vadd.f32 %v848_v14, %v847_v0  ;;  %v1266_v37 = vpop.f32.mrb[4].mxu0  ;;  %v1282_v42 = vpop.f32.mrb[4].mxu1  ;;  %v1219_v12 = vld [vmem:[%s1491_s26 + $0x78] sm:$0xff]   ;;  %v1153_v14 = vunpack.c.h.bf16 %v1556_v53 }
 0x103   : > { %v585_v34 = vadd.f32 %v1266_v37, %v1544_v26  ;;  %v576_v48 = vpop.f32.mrb[5].mxu0  ;;  %v649_v51 = vadd.f32 %v1282_v42, %v1544_v26  ;;  %v640_v15 = vpop.f32.mrb[5].mxu1  ;;  %v1218_v37 = vld [vmem:[%s1491_s26 + $0x70] sm:$0xff]  }
 0x104   : > { %v881_v38 = vadd.f32 %v880_v36, %v849_v58  ;;  %v577_v40 = vadd.f32 %v1544_v26, %v576_v48  ;;  %v1267_v43 = vpop.f32.mrb[6].mxu0  ;;  %v641_v44 = vadd.f32 %v1544_v26, %v640_v15  ;;  %v1283_v49 = vpop.f32.mrb[6].mxu1  ;;  %v839_v36 = vadd.f32 %v1176_v46, %v1112_v45 }
 0x105   : > { %v853_v54 = vadd.f32 %v1524_v16, %v585_v34  ;;  %v588_v55 = vadd.f32 %v1267_v43, %v1544_v26  ;;  %v579_v56 = vpop.f32.mrb[7].mxu0  ;;  %v1586_v57 = vadd.f32 %v837_v23, %v649_v51  ;;  %v652_v59 = vadd.f32 %v1283_v49, %v1544_v26  ;;  %v643_v58 = vpop.f32.mrb[7].mxu1  ;;  %v1606_v23 = vld [vmem:[%s1485_s23 + $0x70] sm:$0xff]  }
 0x106   : > { %v851_v60 = vadd.f32 %v1526_v17, %v577_v40  ;;  %v882_v62 = vadd.f32 %v881_v38, %v850_v5  ;;  %v580_v63 = vadd.f32 %v1544_v26, %v579_v56  ;;  %v1591_v0 = vadd.f32 %v835_v24, %v641_v44 }
 0x107   : > { %v854_v1 = vadd.f32 %v1528_v18, %v588_v55  ;;  %v1157_v16 = vunpack.c.h.bf16 %v1519_v9  ;;  %v1595_v3 = vadd.f32 %v838_v25, %v652_v59  ;;  %v644_v4 = vadd.f32 %v1544_v26, %v643_v58 }
 0x108   : > { %v883_v13 = vadd.f32 %v882_v62, %v851_v60  ;;  %v852_v17 = vadd.f32 %v1530_v19, %v580_v63  ;;  %v1089_v5 = vunpack.c.h.bf16 %v1522_v10  ;;  %v841_v18 = vadd.f32 %v1180_v33, %v1116_v32 }
 0x109   : > { %v1608_v24 = vadd.f32 %v836_v31, %v644_v4  ;;  %v842_v25 = vadd.f32 %v1181_v35, %v1117_v47  ;;  %v840_v51 = vadd.f32 %v1177_v50, %v1113_v52  ;;  %v1124_v15 = vunpack.c.l.bf16 %v1599_v39 }
 0x10a   : > { %v884_v42 = vadd.f32 %v883_v13, %v852_v17  ;;  %v1270_v34 = vpop.f32.mrb[8].mxu0  ;;  %v1286_v48 = vpop.f32.mrb[8].mxu1  ;;  %v1188_v38 = vunpack.c.l.bf16 %v1219_v12  ;;  %v1120_v31 = vunpack.c.l.bf16 %v1606_v23  ;;  %v1125_v32 = vunpack.c.h.bf16 %v1599_v39 }
 0x10b   : > { %v601_v19 = vadd.f32 %v1270_v34, %v1544_v26  ;;  %v592_v40 = vpop.f32.mrb[9].mxu0  ;;  %v665_v43 = vadd.f32 %v1286_v48, %v1544_v26  ;;  %v656_v44 = vpop.f32.mrb[9].mxu1  ;;  %v1184_v52 = vunpack.c.l.bf16 %v1218_v37  ;;  %v1185_v34 = vunpack.c.h.bf16 %v1218_v37 }
 0x10c   : > { %v885_v33 = vadd.f32 %v884_v42, %v853_v54  ;;  %v593_v45 = vadd.f32 %v1544_v26, %v592_v40  ;;  %v1271_v46 = vpop.f32.mrb[10].mxu0  ;;  %v657_v47 = vadd.f32 %v1544_v26, %v656_v44  ;;  %v1287_v35 = vpop.f32.mrb[10].mxu1  ;;  %v845_v48 = vadd.f32 %v1188_v38, %v1124_v15 }
 0x10d   : > { %v857_v49 = vadd.f32 %v1532_v20, %v601_v19  ;;  %v604_v50 = vadd.f32 %v1271_v46, %v1544_v26  ;;  %v595_v55 = vpop.f32.mrb[11].mxu0  ;;  %v1620_v56 = vadd.f32 %v841_v18, %v665_v43  ;;  %v668_v59 = vadd.f32 %v1287_v35, %v1544_v26  ;;  %v659_v58 = vpop.f32.mrb[11].mxu1 }
 0x10e   : > { %v855_v60 = vadd.f32 %v1534_v21, %v593_v45  ;;  %v886_v54 = vadd.f32 %v885_v33, %v854_v1  ;;  %v596_v62 = vadd.f32 %v1544_v26, %v595_v55  ;;  %v871_v63 = vadd.f32 %v839_v36, %v657_v47 }
 0x10f   : > { %v858_v4 = vadd.f32 %v1536_v22, %v604_v50  ;;  %v874_v39 = vadd.f32 %v842_v25, %v668_v59  ;;  %v660_v13 = vadd.f32 %v1544_v26, %v659_v58  ;;  %v1189_v20 = vunpack.c.h.bf16 %v1219_v12 }
 0x110   : > { %v887_v17 = vadd.f32 %v886_v54, %v855_v60  ;;  %v856_v42 = vadd.f32 %v1546_v27, %v596_v62  ;;  %v1121_v18 = vunpack.c.h.bf16 %v1606_v23  ;;  %v829_v21 = vadd.f32 %v1156_v29, %v1092_v28 }
 0x111   : > { %v872_v1 = vadd.f32 %v840_v51, %v660_v13  ;;  %v827_v22 = vadd.f32 %v1152_v6, %v1088_v30  ;;  %v830_v27 = vadd.f32 %v1157_v16, %v1093_v7  ;;  %v843_v23 = vadd.f32 %v1184_v52, %v1120_v31 }
 0x112   : > { %v888_v36 = vadd.f32 %v887_v17, %v856_v42  ;;  %v1274_v19 = vpop.f32.mrb[12].mxu0  ;;  %v1290_v12 = vpop.f32.mrb[12].mxu1  ;;  %v828_v40 = vadd.f32 %v1153_v14, %v1089_v5  ;;  %v846_v29 = vadd.f32 %v1189_v20, %v1125_v32  ;;  %v844_v6 = vadd.f32 %v1185_v34, %v1121_v18 }
 0x113   : > { %v617_v25 = vadd.f32 %v1274_v19, %v1544_v26  ;;  %v608_v37 = vpop.f32.mrb[13].mxu0  ;;  %v681_v9 = vadd.f32 %v1290_v12, %v1544_v26  ;;  %v672_v28 = vpop.f32.mrb[13].mxu1 }
 0x114   : > { %v889_v51 = vadd.f32 %v888_v36, %v857_v49  ;;  %v609_v15 = vadd.f32 %v1544_v26, %v608_v37  ;;  %v1275_v10 = vpop.f32.mrb[14].mxu0  ;;  %v673_v53 = vadd.f32 %v1544_v26, %v672_v28  ;;  %v1291_v30 = vpop.f32.mrb[14].mxu1 }
 0x115   : > { %v861_v8 = vadd.f32 %v829_v21, %v617_v25  ;;  %v620_v7 = vadd.f32 %v1275_v10, %v1544_v26  ;;  %v611_v16 = vpop.f32.mrb[15].mxu0  ;;  %v877_v38 = vadd.f32 %v845_v48, %v681_v9  ;;  %v684_v43 = vadd.f32 %v1291_v30, %v1544_v26  ;;  %v675_v5 = vpop.f32.mrb[15].mxu1 }
 0x116   : > { %v859_v14 = vadd.f32 %v827_v22, %v609_v15  ;;  %v890_v44 = vadd.f32 %v889_v51, %v858_v4  ;;  %v612_v31 = vadd.f32 %v1544_v26, %v611_v16  ;;  %v875_v32 = vadd.f32 %v843_v23, %v673_v53 }
 0x117   : > { %v862_v33 = vadd.f32 %v830_v27, %v620_v7  ;;  %v878_v45 = vadd.f32 %v846_v29, %v684_v43  ;;  %v676_v46 = vadd.f32 %v1544_v26, %v675_v5 }
 0x118   : > { %v891_v47 = vadd.f32 %v890_v44, %v859_v14  ;;  %v860_v35 = vadd.f32 %v828_v40, %v612_v31 }
 0x119   : > { %v876_v52 = vadd.f32 %v844_v6, %v676_v46 }
 0x11a   : > { %v892_v49 = vadd.f32 %v891_v47, %v860_v35 }
 0x11c   : > { %v893_v50 = vadd.f32 %v892_v49, %v861_v8 }
 0x11e   : > { %v894_v55 = vadd.f32 %v893_v50, %v862_v33 }
 0x120   : > { %v895_v59 = vadd.f32 %v894_v55, %v1566_v2 }
 0x122   : > { %v896_v58 = vadd.f32 %v895_v59, %v1578_v41 }
 0x124   : > { %v897_v60 = vadd.f32 %v896_v58, %v1561_v61 }
 0x126   : > { %v898_v54 = vadd.f32 %v897_v60, %v1574_v11 }
 0x128   : > { %v899_v62 = vadd.f32 %v898_v54, %v1591_v0 }
 0x12a   : > { %v900_v4 = vadd.f32 %v899_v62, %v1608_v24  ;;  %v879_v24 = vld [vmem:[#allocation2] sm:$0x1] }
 0x12c   : > { %v901_v26 = vadd.f32 %v900_v4, %v1586_v57 }
 0x12e   : > { %v902_v13 = vadd.f32 %v901_v26, %v1595_v3 }
 0x130   : > { %v903_v20 = vadd.f32 %v902_v13, %v871_v63 }
 0x132   : > { %v904_v17 = vadd.f32 %v903_v20, %v872_v1 }
 0x134   : > { %v905_v42 = vadd.f32 %v904_v17, %v1620_v56 }
 0x136   : > { %v906_v2 = vadd.f32 %v905_v42, %v874_v39 }
 0x138   : > { %v907_v18 = vadd.f32 %v906_v2, %v875_v32 }
 0x13a   : > { %v908_v41 = vadd.f32 %v907_v18, %v876_v52 }
 0x13c   : > { %v909_v34 = vadd.f32 %v908_v41, %v877_v38 }
 0x13e   : > { %v910_v61 = vadd.f32 %v909_v34, %v878_v45 }
 0x140   : > { %v911_v21 = vrot.slane %v910_v61, 4 }
 0x142   : > { %v912_v11 = vadd.f32 %v911_v21, %v910_v61 }
 0x144   : > { %v913_v48 = vrot.slane %v912_v11, 2 }
 0x146   : > { %v914_v0 = vadd.f32 %v913_v48, %v912_v11 }
 0x148   : > { %v915_v36 = vrot.slane %v914_v0, 1 }
 0x14a   : > { %v916_v19 = vadd.f32 %v915_v36, %v914_v0 }
 0x14c   : > { %v917_v57 = vadd.f32 %v916_v19, %v879_v24 }
 0x14e   : > { %918 = vst [vmem:[#allocation2] sm:$0x1] %v917_v57 }
 0x155   : > { %v922_v3 = vld [vmem:[#allocation2] sm:$0x1] }
 0x156   : > { %923 = vst [vmem:[%s320_s6] sm:$0x1] %v922_v3 }
 0x157 PF: > { %s15_s20 = sadd.s32 1, %s1379_s20   ;;  %s1675_s18 = smov %s1375_s19 }
 0x158   : > { %p12_p5 = scmp.ge.s32.totalorder %s15_s20, 4   ;;  %s1676_s19 = smov %s1678_s21 }
 0x15a   :  { %14 = sbr.rel (!%p12_p5) target bundleno = 2 (0x2), region = 84 }

// kernel: hire_mlp.7
= control target key start
LH: loop header
LB: loop body
LE: loop exit
PB: predicated region body
PF: predicated region fallthrough
CT: control target
= control target key end

     0   :  { %13 = vsyncpa [#allocation3], 0  ;;  %s2640_s0 = inlined_call_operand.vmem [shape: bf16[2,256,128], index: 0, kind: input, shape index: {}]   ;;  %s2641_s1 = inlined_call_operand.vmem [shape: bf16[2,256,128], index: 1, kind: input, shape index: {}]   ;;  %s2642_s2 = inlined_call_operand.vmem [shape: bf16[2,256,128], index: 2, kind: input, shape index: {}]   ;;  %s2643_s3 = inlined_call_operand.vmem [shape: f32[2,3,128], index: 3, kind: input, shape index: {}]   ;;  %s2644_s4 = inlined_call_operand.vmem [shape: bf16[128,128], index: 4, kind: input, shape index: {}]   ;;  %s2645_s5 = inlined_call_operand.vmem [shape: f32[1,128], index: 5, kind: input, shape index: {}]   ;;  %s2646_s6 = inlined_call_operand.vmem [shape: bf16[128,128], index: 6, kind: input, shape index: {}]   ;;  %s2647_s7 = inlined_call_operand.vmem [shape: f32[1,128], index: 7, kind: input, shape index: {}]   ;;  %s2648_s8 = inlined_call_operand.hbm [shape: f32[2,256,128], index: 8, kind: output, shape index: {}]  }
   0x1   :  { %15 = vsyncpa [#allocation3 + $0x1], 0  ;;  %s2084_s27 = smov 0   ;;  %s2086_s28 = smov 0  }
   0x2   :  { %s2088_s29 = smov 0   ;;  %s2090_s30 = smov 0  }
   0x3   :  { %s2092_s9 = smov 0   ;;  %s2094_s10 = smov 0  }
   0x4 LB: > { %s1509_s11 = sadd.s32 4294967295, %s2034_s10   ;;  %s1510_s12 = sadd.s32 4294967294, %s2034_s10   ;;  %s2034_s10 = sphi %s2094_s10, %s21_s10   ;;  %s2030_s9 = sphi %s2092_s9, %s2655_s9   ;;  %s2026_s30 = sphi %s2090_s30, %s2654_s30   ;;  %s2022_s29 = sphi %s2088_s29, %s2653_s29   ;;  %s2018_s28 = sphi %s2086_s28, %s2652_s28   ;;  %s2014_s27 = sphi %s2084_s27, %s2651_s27  }
   0x5   : > { %s33_s13 = sadd.s32 1, %s2030_s9  ;;  %s236_s14 = sadd.s32 1, %s2022_s29 }
   0x6   : > { %p35_p0 = scmp.ge.s32.totalorder %s33_s13, 2  ;;  %p246_p1 = scmp.ne.s32.totalorder %s2022_s29, %s2018_s28 }
   0x7   : > { %p247_p2 = scmp.eq.s32.totalorder %s1509_s11, 1  ;;  %p252_p3 = scmp.ne.s32.totalorder %s2018_s28, %s2014_s27 }
   0x8   : > { %s2657_s13 = smov (%p35_p0, %s33_s13), 0  ;;  %p253_p5 = scmp.eq.s32.totalorder %s1510_s12, 1 }
   0x9   : > { %p2124_p4 = por %p247_p2, %p246_p1  ;;  %s231_s16 = ssub.s32 %s2030_s9, %s2657_s13 }
   0xa   : > { %p1513_p6 = scmp.ge.s32.totalorder %s2034_s10, 1  ;;  %p234_p7 = scmp.eq.s32.totalorder %s231_s16, 0 }
   0xb   : > { %p2131_p8 = por %p253_p5, %p252_p3  ;;  %p329_p9 = scmp.lt.s32.totalorder %s2034_s10, 3 }
   0xc   : > { %s2137_s18 = scalar_select %p234_p7, %s2022_s29, %s236_s14  }
   0xd   : > { %p330_p10 = pnand %p1513_p6, %p329_p9 }
   0xe   : > { %v1924_v0 = vld [vmem:[%s2644_s4] sm:$0xff] (!%p330_p10)   ;;  %p390_p11 = scmp.lt.s32.totalorder (!%p330_p10), %s2026_s30, 1  ;;  %v1925_v1 = vld [vmem:[%s2644_s4 + $0x8] sm:$0xff] (!%p330_p10)   ;;  %v1926_v2 = vld [vmem:[%s2644_s4 + $0x10] sm:$0xff] (!%p330_p10)   ;;  %v850_v29 = vlaneseq (!%p330_p10)  ;;  %s2036_s11 = smov (!%p330_p10), [#allocation2]  }
   0xf   : > { %333 = sbr.rel (%p330_p10) target bundleno = 559 (0x22f), region = 52  ;;  %1771 = vmatprep.subr.bf16.mxu0 (!%p330_p10), %v1924_v0  ;;  %v1927_v3 = vld [vmem:[%s2644_s4 + $0x18] sm:$0xff] (!%p330_p10)   ;;  %v1928_v5 = vld [vmem:[%s2644_s4 + $0x20] sm:$0xff] (!%p330_p10)   ;;  %v1929_v6 = vld [vmem:[%s2644_s4 + $0x28] sm:$0xff] (!%p330_p10)  }
  0x10   : > { %1772 = vmatpush3.bf16.msra.mxu0 (!%p330_p10), %v1924_v0  ;;  %v1930_v7 = vld [vmem:[%s2644_s4 + $0x30] sm:$0xff] (!%p330_p10)   ;;  %v1931_v8 = vld [vmem:[%s2644_s4 + $0x38] sm:$0xff] (!%p330_p10)   ;;  %v1948_v9 = vld [vmem:[%s2646_s6] sm:$0xff] (!%p330_p10)   ;;  %v2208_v30 = vshrl.u32 (!%p330_p10), %v850_v29, 7 }
  0x11   : > { %1773 = vmatprep.subr.bf16.mxu0 (!%p330_p10), %v1925_v1  ;;  %v1949_v10 = vld [vmem:[%s2646_s6 + $0x8] sm:$0xff] (!%p330_p10)   ;;  %1819 = vmatprep.subr.bf16.mxu1 (!%p330_p10), %v1948_v9  ;;  %v1950_v12 = vld [vmem:[%s2646_s6 + $0x10] sm:$0xff] (!%p330_p10)   ;;  %v1951_v14 = vld [vmem:[%s2646_s6 + $0x18] sm:$0xff] (!%p330_p10)  }
  0x12   : > { %1820 = vmatpush3.bf16.msra.mxu1 (!%p330_p10), %v1948_v9  ;;  %v1952_v15 = vld [vmem:[%s2646_s6 + $0x20] sm:$0xff] (!%p330_p10)   ;;  %v852_v31 = vsub.s32 (!%p330_p10), 0, %v2208_v30  ;;  %v952_v32 = vsub.s32 (!%p330_p10), 1, %v2208_v30  ;;  %v1953_v40 = vld [vmem:[%s2646_s6 + $0x28] sm:$0xff] (!%p330_p10)   ;;  %v1954_v56 = vld [vmem:[%s2646_s6 + $0x30] sm:$0xff] (!%p330_p10)  }
  0x13   : > { %1821 = vmatprep.subr.bf16.mxu1 (!%p330_p10), %v1949_v10 }
  0x14   : > { %1774 = vmatpush3.bf16.msra.mxu0 (!%p330_p10), %v1925_v1 }
  0x15   : > { %1775 = vmatprep.subr.bf16.mxu0 (!%p330_p10), %v1926_v2 }
  0x16   : > { %s2147_s23 = scalar_select %p390_p11, %s2026_s30, 1  ;;  %1822 = vmatpush3.bf16.msra.mxu1 %v1949_v10 }
  0x17   : > { %1823 = vmatprep.subr.bf16.mxu1 %v1950_v12 }
  0x18   : > { %s2153_s26 = sshll.u32 %s2147_s23, 7  ;;  %1776 = vmatpush3.bf16.msra.mxu0 %v1926_v2  ;;  %s1521_s20 = sshll.u32 %s2147_s23, 2 }
  0x19   : > { %s2159_s14 = scalar_lea.vmem %s2640_s0, %s2153_s26  ;;  %1777 = vmatprep.subr.bf16.mxu0 %v1927_v3  ;;  %s422_s24 = scalar_lea.vmem %s2643_s3, %s1521_s20 }
  0x1a   : > { %v1932_v4 = vld [vmem:[%s2159_s14] sm:$0xff]   ;;  %v1933_v11 = vld [vmem:[%s2159_s14 + $0x8] sm:$0xff]   ;;  %v1934_v13 = vld [vmem:[%s2159_s14 + $0x10] sm:$0xff]   ;;  %1824 = vmatpush3.bf16.msra.mxu1 %v1950_v12  ;;  %s2221_s12 = scalar_lea.vmem %s2641_s1, %s2153_s26  ;;  %s2227_s23 = scalar_lea.vmem %s2642_s2, %s2153_s26 }
  0x1b   : > { %1787 = vmatprep.mubr.bf16.mxu0 %v1932_v4  ;;  %1825 = vmatprep.subr.bf16.mxu1 %v1951_v14  ;;  %v1935_v16 = vld [vmem:[%s2159_s14 + $0x18] sm:$0xff]   ;;  %v1936_v17 = vld [vmem:[%s2159_s14 + $0x20] sm:$0xff]   ;;  %v1937_v18 = vld [vmem:[%s2159_s14 + $0x28] sm:$0xff]   ;;  %s1564_s20 = sshll.u32 %s2026_s30, 12 }
  0x1c   : > { %1778 = vmatpush3.bf16.msra.mxu0 %v1927_v3  ;;  %v1938_v19 = vld [vmem:[%s2159_s14 + $0x30] sm:$0xff]   ;;  %v1939_v20 = vld [vmem:[%s2159_s14 + $0x38] sm:$0xff]   ;;  %v1940_v21 = vld [vmem:[%s2159_s14 + $0x40] sm:$0xff]  }
  0x1d   : > { %1779 = vmatprep.subr.bf16.mxu0 %v1928_v5  ;;  %v1941_v22 = vld [vmem:[%s2159_s14 + $0x48] sm:$0xff]   ;;  %v1942_v23 = vld [vmem:[%s2159_s14 + $0x50] sm:$0xff]   ;;  %v1943_v24 = vld [vmem:[%s2159_s14 + $0x58] sm:$0xff]  }
  0x1e   : > { %1826 = vmatpush3.bf16.msra.mxu1 %v1951_v14  ;;  %v1944_v25 = vld [vmem:[%s2159_s14 + $0x60] sm:$0xff]   ;;  %v1945_v26 = vld [vmem:[%s2159_s14 + $0x68] sm:$0xff]   ;;  %v1946_v27 = vld [vmem:[%s2159_s14 + $0x70] sm:$0xff]  }
  0x1f   : > { %1827 = vmatprep.subr.bf16.mxu1 %v1952_v15  ;;  %v1947_v28 = vld [vmem:[%s2159_s14 + $0x78] sm:$0xff]   ;;  %v2215_v33 = vld [vmem:[%s422_s24] sm:$0x7]  ;;  %v1693_v36 = vld [vmem:[%s2221_s12 + $0x8] sm:$0xff]   ;;  %s2584_s24 = scalar_lea.hbm %s2648_s8, %s1564_s20 }
  0x20   : > { %1780 = vmatpush3.bf16.msra.mxu0 %v1928_v5  ;;  %v2230_v34 = vrot.slane %v2215_v33, %v852_v31  ;;  %v2233_v35 = vrot.slane %v2215_v33, %v952_v32  ;;  %v1708_v37 = vld [vmem:[%s2227_s23 + $0x8] sm:$0xff]   ;;  %v1571_v38 = vunpack.c.l.bf16 %v1693_v36  ;;  %v1566_v41 = vld [vmem:[%s2221_s12] sm:$0xff]   ;;  %v1572_v47 = vunpack.c.h.bf16 %v1693_v36  ;;  %v1695_v61 = vld [vmem:[%s2221_s12 + $0x18] sm:$0xff]  }
  0x21   : > { %1781 = vmatprep.subr.bf16.mxu0 %v1929_v6  ;;  %v1635_v39 = vunpack.c.l.bf16 %v1708_v37  ;;  %v1630_v42 = vld [vmem:[%s2227_s23] sm:$0xff]   ;;  %v1567_v43 = vunpack.c.l.bf16 %v1566_v41  ;;  %v1636_v48 = vunpack.c.h.bf16 %v1708_v37  ;;  %v1568_v49 = vunpack.c.h.bf16 %v1566_v41  ;;  %v1710_v62 = vld [vmem:[%s2227_s23 + $0x18] sm:$0xff]   ;;  %v1694_v2 = vld [vmem:[%s2221_s12 + $0x10] sm:$0xff]  }
  0x22   : > { %1828 = vmatpush3.bf16.msra.mxu1 %v1952_v15  ;;  %v1631_v44 = vunpack.c.l.bf16 %v1630_v42  ;;  %v856_v45 = vmul.f32 %v1571_v38, %v2230_v34  ;;  %v1632_v51 = vunpack.c.h.bf16 %v1630_v42  ;;  %v857_v54 = vmul.f32 %v1572_v47, %v2230_v34  ;;  %v1709_v3 = vld [vmem:[%s2227_s23 + $0x10] sm:$0xff]   ;;  %v1955_v4 = vld [vmem:[%s2646_s6 + $0x38] sm:$0xff]  }
  0x23   : > { %v956_v46 = vmul.f32 %v1635_v39, %v2233_v35  ;;  %1829 = vmatprep.subr.bf16.mxu1 %v1953_v40  ;;  %v854_v50 = vmul.f32 %v1567_v43, %v2230_v34  ;;  %v957_v55 = vmul.f32 %v1636_v48, %v2233_v35  ;;  %v855_v57 = vmul.f32 %v1568_v49, %v2230_v34 }
  0x24   : > { %1782 = vmatpush3.bf16.msra.mxu0 %v1929_v6  ;;  %v954_v52 = vmul.f32 %v1631_v44, %v2233_v35  ;;  %v955_v58 = vmul.f32 %v1632_v51, %v2233_v35  ;;  %v1579_v0 = vunpack.c.l.bf16 %v1695_v61  ;;  %v1643_v1 = vunpack.c.l.bf16 %v1710_v62  ;;  %v1699_v51 = vld [vmem:[%s2221_s12 + $0x38] sm:$0xff]  }
  0x25   : > { %1783 = vmatprep.subr.bf16.mxu0 %v1930_v7  ;;  %v2246_v53 = vadd.f32 %v956_v46, %v856_v45  ;;  %v2257_v60 = vadd.f32 %v957_v55, %v857_v54  ;;  %v1575_v5 = vunpack.c.l.bf16 %v1694_v2  ;;  %v1639_v6 = vunpack.c.l.bf16 %v1709_v3 }
  0x26   : > { %1830 = vmatpush3.bf16.msra.mxu1 %v1953_v40  ;;  %v2255_v59 = vadd.f32 %v954_v52, %v854_v50  ;;  %v2261_v63 = vadd.f32 %v955_v58, %v855_v57  ;;  %v1580_v9 = vunpack.c.h.bf16 %v1695_v61  ;;  %v1644_v10 = vunpack.c.h.bf16 %v1710_v62  ;;  %v1714_v52 = vld [vmem:[%s2227_s23 + $0x38] sm:$0xff]   ;;  %v1713_v57 = vld [vmem:[%s2227_s23 + $0x30] sm:$0xff]  }
  0x27   : > { %1831 = vmatprep.subr.bf16.mxu1 %v1954_v56  ;;  %v958_v12 = vmul.f32 %v1639_v6, %v2233_v35  ;;  %v1640_v14 = vunpack.c.h.bf16 %v1709_v3  ;;  %v1595_v54 = vunpack.c.l.bf16 %v1699_v51  ;;  %v1659_v55 = vunpack.c.l.bf16 %v1714_v52 }
  0x28   : > { %1784 = vmatpush3.bf16.msra.mxu0 %v1930_v7  ;;  %v860_v7 = vmul.f32 %v1579_v0, %v2230_v34  ;;  %v1655_v61 = vunpack.c.l.bf16 %v1713_v57  ;;  %v1656_v6 = vunpack.c.h.bf16 %v1713_v57  ;;  %v1717_v57 = vld [vmem:[%s2227_s23 + $0x50] sm:$0xff]  }
  0x29   : > { %1785 = vmatprep.subr.bf16.mxu0 %v1931_v8  ;;  %v868_v62 = vmul.f32 %v1595_v54, %v2230_v34  ;;  %v968_v0 = vmul.f32 %v1659_v55, %v2233_v35 }
  0x2a   : > { %1832 = vmatpush3.bf16.msra.mxu1 %v1954_v56  ;;  %v1698_v56 = vld [vmem:[%s2221_s12 + $0x30] sm:$0xff]  }
  0x2b   : > { %1833 = vmatprep.subr.bf16.mxu1 %v1955_v4  ;;  %v1591_v58 = vunpack.c.l.bf16 %v1698_v56 }
  0x2c   : > { %1786 = vmatpush3.bf16.msra.mxu0 %v1931_v8  ;;  %v960_v8 = vmul.f32 %v1643_v1, %v2233_v35  ;;  %v1596_v1 = vunpack.c.h.bf16 %v1699_v51  ;;  %v1703_v51 = vld [vmem:[%s2221_s12 + $0x58] sm:$0xff]  }
  0x2d   : > { %v866_v3 = vmul.f32 %v1591_v58, %v2230_v34  ;;  %v1611_v54 = vunpack.c.l.bf16 %v1703_v51 }
  0x2e   : > { %1834 = vmatpush3.bf16.msra.mxu1 %v1955_v4  ;;  %v2272_v15 = vadd.f32 %v960_v8, %v860_v7  ;;  %v966_v4 = vmul.f32 %v1655_v61, %v2233_v35  ;;  %v2312_v7 = vadd.f32 %v968_v0, %v868_v62  ;;  %v869_v8 = vmul.f32 %v1596_v1, %v2230_v34 }
  0x2f   : > { %1788 = vmatmul.mubr.bf16.vlgmr.msra.gmra.mrb[0].mxu0 %v1933_v11  ;;  %v858_v11 = vmul.f32 %v1575_v5, %v2230_v34  ;;  %v1592_v5 = vunpack.c.h.bf16 %v1698_v56  ;;  %v1702_v56 = vld [vmem:[%s2221_s12 + $0x50] sm:$0xff]   ;;  %v1671_v61 = vunpack.c.l.bf16 %v1717_v57  ;;  %v876_v62 = vmul.f32 %v1611_v54, %v2230_v34 }
  0x30   : > { %1791 = vmatprep.mubr.bf16.mxu0 %v1934_v13  ;;  %v1576_v13 = vunpack.c.h.bf16 %v1694_v2  ;;  %v1660_v2 = vunpack.c.h.bf16 %v1714_v52  ;;  %v1718_v52 = vld [vmem:[%s2227_s23 + $0x58] sm:$0xff]   ;;  %v1607_v58 = vunpack.c.l.bf16 %v1702_v56  ;;  %v1612_v1 = vunpack.c.h.bf16 %v1703_v51 }
  0x31   : > { %v1675_v55 = vunpack.c.l.bf16 %v1718_v52 }
  0x33   : > { %v976_v0 = vmul.f32 %v1675_v55, %v2233_v35 }
  0x37   : > { %1792 = vmatmul.mubr.bf16.gmra.mrb[4].mxu0 %v1935_v16  ;;  %v861_v16 = vmul.f32 %v1580_v9, %v2230_v34  ;;  %v969_v9 = vmul.f32 %v1660_v2, %v2233_v35  ;;  %v1676_v2 = vunpack.c.h.bf16 %v1718_v52 }
  0x38   : > { %1795 = vmatprep.mubr.bf16.mxu0 %v1936_v17  ;;  %v961_v17 = vmul.f32 %v1644_v10, %v2233_v35  ;;  %v2316_v10 = vadd.f32 %v966_v4, %v866_v3  ;;  %v874_v3 = vmul.f32 %v1607_v58, %v2230_v34  ;;  %v974_v4 = vmul.f32 %v1671_v61, %v2233_v35 }
  0x3f   : > { %1796 = vmatmul.mubr.bf16.gmra.mrb[8].mxu0 %v1937_v18  ;;  %v2276_v18 = vadd.f32 %v958_v12, %v858_v11  ;;  %v867_v11 = vmul.f32 %v1592_v5, %v2230_v34  ;;  %v967_v12 = vmul.f32 %v1656_v6, %v2233_v35  ;;  %v1608_v5 = vunpack.c.h.bf16 %v1702_v56 }
  0x40   : > { %1799 = vmatprep.mubr.bf16.mxu0 %v1938_v19  ;;  %v859_v19 = vmul.f32 %v1576_v13, %v2230_v34  ;;  %v2320_v13 = vadd.f32 %v969_v9, %v869_v8  ;;  %v1672_v6 = vunpack.c.h.bf16 %v1717_v57  ;;  %v2352_v8 = vadd.f32 %v976_v0, %v876_v62  ;;  %v1707_v62 = vld [vmem:[%s2221_s12 + $0x78] sm:$0xff]  }
  0x41   : > { %v877_v9 = vmul.f32 %v1612_v1, %v2230_v34  ;;  %v1722_v0 = vld [vmem:[%s2227_s23 + $0x78] sm:$0xff]   ;;  %v1627_v1 = vunpack.c.l.bf16 %v1707_v62 }
  0x47   : > { %1800 = vmatmul.mubr.bf16.gmra.mrb[12].mxu0 %v1939_v20  ;;  %v959_v20 = vmul.f32 %v1640_v14, %v2233_v35  ;;  %v2322_v14 = vadd.f32 %v967_v12, %v867_v11  ;;  %v977_v11 = vmul.f32 %v1676_v2, %v2233_v35  ;;  %v2356_v12 = vadd.f32 %v974_v4, %v874_v3  ;;  %v1706_v3 = vld [vmem:[%s2221_s12 + $0x70] sm:$0xff]  }
  0x48   : > { %1803 = vmatprep.mubr.bf16.mxu0 %v1940_v21  ;;  %v2280_v21 = vadd.f32 %v961_v17, %v861_v16  ;;  %v1701_v16 = vld [vmem:[%s2221_s12 + $0x48] sm:$0xff]   ;;  %v1691_v2 = vunpack.c.l.bf16 %v1722_v0  ;;  %v1721_v4 = vld [vmem:[%s2227_s23 + $0x70] sm:$0xff]  }
  0x49   : > { %v1716_v17 = vld [vmem:[%s2227_s23 + $0x48] sm:$0xff]  }
  0x4f   : > { %1804 = vmatmul.mubr.bf16.gmra.mrb[16].mxu0 %v1941_v22  ;;  %v2282_v22 = vadd.f32 %v959_v20, %v859_v19  ;;  %v1603_v19 = vunpack.c.l.bf16 %v1701_v16  ;;  %v1667_v20 = vunpack.c.l.bf16 %v1716_v17 }
  0x50   : > { %1807 = vmatprep.mubr.bf16.mxu0 %v1942_v23  ;;  %v1697_v23 = vld [vmem:[%s2221_s12 + $0x28] sm:$0xff]  }
  0x51   : > { %v1588_v37 = vunpack.c.h.bf16 %v1697_v23 }
  0x53   : > { %v865_v44 = vmul.f32 %v1588_v37, %v2230_v34 }
  0x57   : > { %1808 = vmatmul.mubr.bf16.gmra.mrb[20].mxu0 %v1943_v24  ;;  %v1712_v24 = vld [vmem:[%s2227_s23 + $0x28] sm:$0xff]  }
  0x58   : > { %1811 = vmatprep.mubr.bf16.mxu0 %v1944_v25  ;;  %v1587_v25 = vunpack.c.l.bf16 %v1697_v23  ;;  %v1652_v38 = vunpack.c.h.bf16 %v1712_v24  ;;  %v1700_v23 = vld [vmem:[%s2221_s12 + $0x40] sm:$0xff]  }
  0x59   : > { %v1600_v37 = vunpack.c.h.bf16 %v1700_v23 }
  0x5a   : > { %v864_v32 = vmul.f32 %v1587_v25, %v2230_v34  ;;  %v965_v45 = vmul.f32 %v1652_v38, %v2233_v35  ;;  %v1599_v25 = vunpack.c.l.bf16 %v1700_v23  ;;  %v1705_v23 = vld [vmem:[%s2221_s12 + $0x68] sm:$0xff]  }
  0x5c   : > { %v2300_v49 = vadd.f32 %v965_v45, %v865_v44  ;;  %v871_v44 = vmul.f32 %v1600_v37, %v2230_v34  ;;  %v1620_v37 = vunpack.c.h.bf16 %v1705_v23 }
  0x5e   : > { %v881_v52 = vmul.f32 %v1620_v37, %v2230_v34 }
  0x5f   : > { %1812 = vmatmul.mubr.bf16.gmra.mrb[24].mxu0 %v1945_v26  ;;  %v1651_v26 = vunpack.c.l.bf16 %v1712_v24  ;;  %v1715_v24 = vld [vmem:[%s2227_s23 + $0x40] sm:$0xff]  }
  0x60   : > { %1815 = vmatprep.mubr.bf16.mxu0 %v1946_v27  ;;  %v1696_v27 = vld [vmem:[%s2221_s12 + $0x20] sm:$0xff]   ;;  %v1664_v38 = vunpack.c.h.bf16 %v1715_v24 }
  0x61   : > { %v1583_v29 = vunpack.c.l.bf16 %v1696_v27  ;;  %v964_v36 = vmul.f32 %v1651_v26, %v2233_v35  ;;  %v1584_v41 = vunpack.c.h.bf16 %v1696_v27  ;;  %v1663_v26 = vunpack.c.l.bf16 %v1715_v24  ;;  %v1720_v24 = vld [vmem:[%s2227_s23 + $0x68] sm:$0xff]  }
  0x62   : > { %v872_v27 = vmul.f32 %v1603_v19, %v2230_v34  ;;  %v971_v45 = vmul.f32 %v1664_v38, %v2233_v35  ;;  %v2360_v19 = vadd.f32 %v977_v11, %v877_v9  ;;  %v1684_v38 = vunpack.c.h.bf16 %v1720_v24 }
  0x63   : > { %v862_v39 = vmul.f32 %v1583_v29, %v2230_v34  ;;  %v2292_v43 = vadd.f32 %v964_v36, %v864_v32  ;;  %v863_v47 = vmul.f32 %v1584_v41, %v2230_v34  ;;  %v1604_v29 = vunpack.c.h.bf16 %v1701_v16 }
  0x64   : > { %v870_v32 = vmul.f32 %v1599_v25, %v2230_v34  ;;  %v970_v36 = vmul.f32 %v1663_v26, %v2233_v35  ;;  %v875_v16 = vmul.f32 %v1608_v5, %v2230_v34  ;;  %v1619_v25 = vunpack.c.l.bf16 %v1705_v23 }
  0x65   : > { %v1683_v26 = vunpack.c.l.bf16 %v1720_v24  ;;  %v981_v54 = vmul.f32 %v1684_v38, %v2233_v35  ;;  %v1623_v5 = vunpack.c.l.bf16 %v1706_v3  ;;  %v884_v9 = vmul.f32 %v1627_v1, %v2230_v34 }
  0x66   : > { %v984_v11 = vmul.f32 %v1691_v2, %v2233_v35 }
  0x67   : > { %1816 = vmatmul.mubr.bf16.gmra.mrb[28].mxu0 %v1947_v28  ;;  %v1711_v28 = vld [vmem:[%s2227_s23 + $0x20] sm:$0xff]   ;;  %v2380_v58 = vadd.f32 %v981_v54, %v881_v52  ;;  %v882_v23 = vmul.f32 %v1623_v5, %v2230_v34 }
  0x68   : > { %v1647_v31 = vunpack.c.l.bf16 %v1711_v28  ;;  %v1648_v42 = vunpack.c.h.bf16 %v1711_v28  ;;  %v972_v28 = vmul.f32 %v1667_v20, %v2233_v35 }
  0x6a   : > { %v962_v40 = vmul.f32 %v1647_v31, %v2233_v35  ;;  %v963_v48 = vmul.f32 %v1648_v42, %v2233_v35  ;;  %v1668_v31 = vunpack.c.h.bf16 %v1716_v17  ;;  %v2336_v42 = vadd.f32 %v970_v36, %v870_v32 }
  0x6b   : > { %v975_v17 = vmul.f32 %v1672_v6, %v2233_v35  ;;  %v880_v32 = vmul.f32 %v1619_v25, %v2230_v34  ;;  %v980_v36 = vmul.f32 %v1683_v26, %v2233_v35  ;;  %v1687_v6 = vunpack.c.l.bf16 %v1721_v4 }
  0x6c   : > { %v2296_v46 = vadd.f32 %v962_v40, %v862_v39  ;;  %v2302_v50 = vadd.f32 %v963_v48, %v863_v47  ;;  %v2332_v39 = vadd.f32 %v972_v28, %v872_v27  ;;  %v873_v40 = vmul.f32 %v1604_v29, %v2230_v34  ;;  %v1704_v27 = vld [vmem:[%s2221_s12 + $0x60] sm:$0xff]   ;;  %s386_s12 = sand.u32 1, %s2018_s28  }
  0x6d   : > { %v973_v41 = vmul.f32 %v1668_v31, %v2233_v35  ;;  %v2342_v48 = vadd.f32 %v971_v45, %v871_v44  ;;  %v2362_v20 = vadd.f32 %v975_v17, %v875_v16  ;;  %v1719_v28 = vld [vmem:[%s2227_s23 + $0x60] sm:$0xff]   ;;  %v1615_v29 = vunpack.c.l.bf16 %v1704_v27  ;;  %s1514_s14 = sshll.u32 %s386_s12, 8  ;;  %s2594_s30 = scalar_lea.sflag [#allocation3], %s386_s12 }
  0x6e   : > { %v1679_v31 = vunpack.c.l.bf16 %v1719_v28  ;;  %v1616_v44 = vunpack.c.h.bf16 %v1704_v27  ;;  %v1680_v45 = vunpack.c.h.bf16 %v1719_v28  ;;  %v2372_v51 = vadd.f32 %v980_v36, %v880_v32  ;;  %s2519_s19 = scalar_lea.vmem [#allocation2], %s1514_s14  ;;  %s1960_s14 = sshll.u32 %s2036_s11, 4  ;;  %s1961_s14 = int_to_ptr.vmem [resolvable:$false] %s1960_s14 }
  0x6f   : > { %v2340_v47 = vadd.f32 %v973_v41, %v873_v40  ;;  %v878_v40 = vmul.f32 %v1615_v29, %v2230_v34  ;;  %v1628_v16 = vunpack.c.h.bf16 %v1707_v62  ;;  %v1692_v17 = vunpack.c.h.bf16 %v1722_v0  ;;  %s1382_s26 = sshll.u32 %s2519_s19, 4  ;;  %s1962_s16 = scalar_lea.vmem %s1961_s14, 8192  ;;  %s2586_s26 = int_to_ptr.vmem [resolvable:$true] %s1382_s26 }
  0x70   : > { %v978_v41 = vmul.f32 %v1679_v31, %v2233_v35  ;;  %v879_v56 = vmul.f32 %v1616_v44, %v2230_v34  ;;  %v979_v57 = vmul.f32 %v1680_v45, %v2233_v35  ;;  %v982_v24 = vmul.f32 %v1687_v6, %v2233_v35  ;;  %s1956_s25 = scalar_lea.vmem %s2586_s26, 4096  ;;  %p1963_p1 = scmp.lt.s32.totalorder %s2586_s26, %s1961_s14 }
  0x71   : > { %v1624_v25 = vunpack.c.h.bf16 %v1706_v3  ;;  %v1688_v26 = vunpack.c.h.bf16 %v1721_v4  ;;  %v2392_v27 = vadd.f32 %v984_v11, %v884_v9  ;;  %v885_v28 = vmul.f32 %v1628_v16, %v2230_v34  ;;  %p1957_p12 = scmp.ne.s32.totalorder %s2586_s26, %s1956_s25  ;;  %p1964_p2 = scmp.lt.s32.totalorder %s1962_s16, %s1956_s25 }
  0x72   : > { %v2376_v55 = vadd.f32 %v978_v41, %v878_v40  ;;  %v2382_v61 = vadd.f32 %v979_v57, %v879_v56  ;;  %v985_v29 = vmul.f32 %v1692_v17, %v2233_v35  ;;  %v2396_v31 = vadd.f32 %v982_v24, %v882_v23  ;;  %v2408_v41 = vld [vmem:[%s2645_s5] ss:$0 sm:$0xff] }
  0x73   : > { %v883_v32 = vmul.f32 %v1624_v25, %v2230_v34  ;;  %v983_v36 = vmul.f32 %v1688_v26, %v2233_v35  ;;  %v1020_v40 = vsub.s32 2, %v2208_v30  ;;  %p1958_p13 = pnand %p1957_p12, %p2124_p4  ;;  %p1965_p3 = por %p1964_p2, %p1963_p1 }
  0x74   : > { %v2400_v37 = vadd.f32 %v985_v29, %v885_v28 }
  0x75   : > { %v2402_v38 = vadd.f32 %v983_v36, %v883_v32  ;;  %v2411_v44 = vrot.slane %v2215_v33, %v1020_v40  ;;  %p1959_p0 = pneg %p1958_p13 }
  0x77   : > { %p1966_p5 = pnand %p1965_p3, %p1959_p0 }
 0x102   : > { %v1789_v45 = vpop.f32.mrb[0].mxu0 }
 0x103   : > { %v667_v52 = vadd.f32 %v1789_v45, %v2408_v41  ;;  %v658_v34 = vpop.f32.mrb[1].mxu0 }
 0x104   : > { %v659_v35 = vadd.f32 %v2408_v41, %v658_v34  ;;  %v1790_v54 = vpop.f32.mrb[2].mxu0 }
 0x105   : > { %v1024_v56 = vmul.f32 %v2411_v44, %v667_v52  ;;  %v670_v57 = vadd.f32 %v1790_v54, %v2408_v41  ;;  %v661_v30 = vpop.f32.mrb[3].mxu0 }
 0x106   : > { %v1022_v62 = vmul.f32 %v2411_v44, %v659_v35  ;;  %v662_v0 = vadd.f32 %v2408_v41, %v661_v30 }
 0x107   : > { %v1056_v1 = vadd.f32 %v1024_v56, %v2246_v53  ;;  %v1025_v33 = vmul.f32 %v2411_v44, %v670_v57 }
 0x108   : > { %v1023_v2 = vmul.f32 %v2411_v44, %v662_v0  ;;  %v1054_v3 = vadd.f32 %v1022_v62, %v2255_v59 }
 0x109   : > { %v1057_v4 = vadd.f32 %v1025_v33, %v2257_v60 }
 0x10a   : > { %v1793_v5 = vpop.f32.mrb[4].mxu0  ;;  %v1055_v6 = vadd.f32 %v1023_v2, %v2261_v63 }
 0x10b   : > { %v683_v9 = vadd.f32 %v1793_v5, %v2408_v41  ;;  %v674_v11 = vpop.f32.mrb[5].mxu0  ;;  %v1087_v16 = vpack.c.bf16 %v1057_v4, %v1056_v1 }
 0x10c   : > { %v675_v17 = vadd.f32 %v2408_v41, %v674_v11  ;;  %v1794_v23 = vpop.f32.mrb[6].mxu0  ;;  %v1086_v24 = vpack.c.bf16 %v1055_v6, %v1054_v3 }
 0x10d   : > { %v1028_v53 = vmul.f32 %v2411_v44, %v683_v9  ;;  %v686_v25 = vadd.f32 %v1794_v23, %v2408_v41  ;;  %v677_v26 = vpop.f32.mrb[7].mxu0 }
 0x10e   : > { %v1026_v59 = vmul.f32 %v2411_v44, %v675_v17  ;;  %v678_v60 = vadd.f32 %v2408_v41, %v677_v26  ;;  %1835 = vmatprep.mubr.bf16.mxu1 %v1086_v24 }
 0x10f   : > { %v1060_v63 = vadd.f32 %v1028_v53, %v2272_v15  ;;  %v1029_v28 = vmul.f32 %v2411_v44, %v686_v25  ;;  %1836 = vmatmul.mubr.bf16.vlgmr.msra.gmra.mrb[0].mxu1 %v1087_v16 }
 0x110   : > { %v1058_v29 = vadd.f32 %v1026_v59, %v2276_v18  ;;  %v1027_v32 = vmul.f32 %v2411_v44, %v678_v60 }
 0x111   : > { %v1061_v36 = vadd.f32 %v1029_v28, %v2280_v21 }
 0x112   : > { %v1059_v40 = vadd.f32 %v1027_v32, %v2282_v22  ;;  %v1797_v45 = vpop.f32.mrb[8].mxu0 }
 0x113   : > { %v699_v52 = vadd.f32 %v1797_v45, %v2408_v41  ;;  %v690_v34 = vpop.f32.mrb[9].mxu0  ;;  %v1089_v35 = vpack.c.bf16 %v1061_v36, %v1060_v63 }
 0x114   : > { %v691_v54 = vadd.f32 %v2408_v41, %v690_v34  ;;  %v1798_v56 = vpop.f32.mrb[10].mxu0  ;;  %v1088_v15 = vpack.c.bf16 %v1059_v40, %v1058_v29 }
 0x115   : > { %v1032_v57 = vmul.f32 %v2411_v44, %v699_v52  ;;  %v702_v30 = vadd.f32 %v1798_v56, %v2408_v41  ;;  %v693_v18 = vpop.f32.mrb[11].mxu0 }
 0x116   : > { %v1030_v62 = vmul.f32 %v2411_v44, %v691_v54  ;;  %v694_v21 = vadd.f32 %v2408_v41, %v693_v18  ;;  %1839 = vmatprep.mubr.bf16.mxu1 %v1088_v15 }
 0x117   : > { %v1064_v22 = vadd.f32 %v1032_v57, %v2292_v43  ;;  %v1033_v0 = vmul.f32 %v2411_v44, %v702_v30  ;;  %1840 = vmatmul.mubr.bf16.gmra.mrb[4].mxu1 %v1089_v35 }
 0x118   : > { %v1062_v1 = vadd.f32 %v1030_v62, %v2296_v46  ;;  %v1031_v33 = vmul.f32 %v2411_v44, %v694_v21 }
 0x119   : > { %v1065_v2 = vadd.f32 %v1033_v0, %v2300_v49 }
 0x11a   : > { %v1063_v3 = vadd.f32 %v1031_v33, %v2302_v50  ;;  %v1801_v4 = vpop.f32.mrb[12].mxu0 }
 0x11b   : > { %v715_v5 = vadd.f32 %v1801_v4, %v2408_v41  ;;  %v706_v6 = vpop.f32.mrb[13].mxu0  ;;  %v1091_v9 = vpack.c.bf16 %v1065_v2, %v1064_v22 }
 0x11c   : > { %v707_v11 = vadd.f32 %v2408_v41, %v706_v6  ;;  %v1802_v16 = vpop.f32.mrb[14].mxu0  ;;  %v1090_v43 = vpack.c.bf16 %v1063_v3, %v1062_v1 }
 0x11d   : > { %v1036_v17 = vmul.f32 %v2411_v44, %v715_v5  ;;  %v718_v23 = vadd.f32 %v1802_v16, %v2408_v41  ;;  %v709_v46 = vpop.f32.mrb[15].mxu0 }
 0x11e   : > { %v1034_v24 = vmul.f32 %v2411_v44, %v707_v11  ;;  %v710_v49 = vadd.f32 %v2408_v41, %v709_v46  ;;  %1843 = vmatprep.mubr.bf16.mxu1 %v1090_v43 }
 0x11f   : > { %v1068_v50 = vadd.f32 %v1036_v17, %v2312_v7  ;;  %v1037_v53 = vmul.f32 %v2411_v44, %v718_v23  ;;  %1844 = vmatmul.mubr.bf16.gmra.mrb[8].mxu1 %v1091_v9 }
 0x120   : > { %v1066_v25 = vadd.f32 %v1034_v24, %v2316_v10  ;;  %v1035_v26 = vmul.f32 %v2411_v44, %v710_v49 }
 0x121   : > { %v1069_v59 = vadd.f32 %v1037_v53, %v2320_v13 }
 0x122   : > { %v1067_v60 = vadd.f32 %v1035_v26, %v2322_v14  ;;  %v1805_v63 = vpop.f32.mrb[16].mxu0 }
 0x123   : > { %v731_v28 = vadd.f32 %v1805_v63, %v2408_v41  ;;  %v722_v29 = vpop.f32.mrb[17].mxu0  ;;  %v1093_v32 = vpack.c.bf16 %v1069_v59, %v1068_v50 }
 0x124   : > { %v723_v36 = vadd.f32 %v2408_v41, %v722_v29  ;;  %v1806_v40 = vpop.f32.mrb[18].mxu0  ;;  %v1092_v7 = vpack.c.bf16 %v1067_v60, %v1066_v25 }
 0x125   : > { %v1040_v45 = vmul.f32 %v2411_v44, %v731_v28  ;;  %v734_v52 = vadd.f32 %v1806_v40, %v2408_v41  ;;  %v725_v10 = vpop.f32.mrb[19].mxu0 }
 0x126   : > { %v1038_v34 = vmul.f32 %v2411_v44, %v723_v36  ;;  %v726_v13 = vadd.f32 %v2408_v41, %v725_v10  ;;  %1847 = vmatprep.mubr.bf16.mxu1 %v1092_v7 }
 0x127   : > { %v1072_v14 = vadd.f32 %v1040_v45, %v2332_v39  ;;  %v1041_v35 = vmul.f32 %v2411_v44, %v734_v52  ;;  %1848 = vmatmul.mubr.bf16.gmra.mrb[12].mxu1 %v1093_v32 }
 0x128   : > { %v1070_v54 = vadd.f32 %v1038_v34, %v2336_v42  ;;  %v1039_v56 = vmul.f32 %v2411_v44, %v726_v13 }
 0x129   : > { %v1073_v15 = vadd.f32 %v1041_v35, %v2340_v47 }
 0x12a   : > { %v1071_v57 = vadd.f32 %v1039_v56, %v2342_v48  ;;  %v1809_v30 = vpop.f32.mrb[20].mxu0 }
 0x12b   : > { %v747_v18 = vadd.f32 %v1809_v30, %v2408_v41  ;;  %v738_v62 = vpop.f32.mrb[21].mxu0  ;;  %v1095_v21 = vpack.c.bf16 %v1073_v15, %v1072_v14 }
 0x12c   : > { %v739_v22 = vadd.f32 %v2408_v41, %v738_v62  ;;  %v1810_v0 = vpop.f32.mrb[22].mxu0  ;;  %v1094_v39 = vpack.c.bf16 %v1071_v57, %v1070_v54 }
 0x12d   : > { %v1044_v1 = vmul.f32 %v2411_v44, %v747_v18  ;;  %v750_v33 = vadd.f32 %v1810_v0, %v2408_v41  ;;  %v741_v42 = vpop.f32.mrb[23].mxu0 }
 0x12e   : > { %v1042_v2 = vmul.f32 %v2411_v44, %v739_v22  ;;  %v742_v47 = vadd.f32 %v2408_v41, %v741_v42  ;;  %1851 = vmatprep.mubr.bf16.mxu1 %v1094_v39 }
 0x12f   : > { %v1076_v48 = vadd.f32 %v1044_v1, %v2352_v8  ;;  %v1045_v3 = vmul.f32 %v2411_v44, %v750_v33  ;;  %1852 = vmatmul.mubr.bf16.gmra.mrb[16].mxu1 %v1095_v21 }
 0x130   : > { %v1074_v4 = vadd.f32 %v1042_v2, %v2356_v12  ;;  %v1043_v5 = vmul.f32 %v2411_v44, %v742_v47 }
 0x131   : > { %v1077_v6 = vadd.f32 %v1045_v3, %v2360_v19 }
 0x132   : > { %v1075_v9 = vadd.f32 %v1043_v5, %v2362_v20  ;;  %v1813_v11 = vpop.f32.mrb[24].mxu0 }
 0x133   : > { %v763_v16 = vadd.f32 %v1813_v11, %v2408_v41  ;;  %v754_v43 = vpop.f32.mrb[25].mxu0  ;;  %v1097_v17 = vpack.c.bf16 %v1077_v6, %v1076_v48 }
 0x134   : > { %v755_v23 = vadd.f32 %v2408_v41, %v754_v43  ;;  %v1814_v46 = vpop.f32.mrb[26].mxu0  ;;  %v1096_v8 = vpack.c.bf16 %v1075_v9, %v1074_v4 }
 0x135   : > { %v1048_v24 = vmul.f32 %v2411_v44, %v763_v16  ;;  %v766_v49 = vadd.f32 %v1814_v46, %v2408_v41  ;;  %v757_v12 = vpop.f32.mrb[27].mxu0 }
 0x136   : > { %v1046_v50 = vmul.f32 %v2411_v44, %v755_v23  ;;  %v758_v19 = vadd.f32 %v2408_v41, %v757_v12  ;;  %1855 = vmatprep.mubr.bf16.mxu1 %v1096_v8 }
 0x137   : > { %v1080_v20 = vadd.f32 %v1048_v24, %v2372_v51  ;;  %v1049_v53 = vmul.f32 %v2411_v44, %v766_v49  ;;  %1856 = vmatmul.mubr.bf16.gmra.mrb[20].mxu1 %v1097_v17 }
 0x138   : > { %v1078_v25 = vadd.f32 %v1046_v50, %v2376_v55  ;;  %v1047_v26 = vmul.f32 %v2411_v44, %v758_v19 }
 0x139   : > { %v1081_v59 = vadd.f32 %v1049_v53, %v2380_v58 }
 0x13a   : > { %v1079_v60 = vadd.f32 %v1047_v26, %v2382_v61  ;;  %v1817_v63 = vpop.f32.mrb[28].mxu0 }
 0x13b   : > { %v779_v28 = vadd.f32 %v1817_v63, %v2408_v41  ;;  %v770_v29 = vpop.f32.mrb[29].mxu0  ;;  %v1099_v32 = vpack.c.bf16 %v1081_v59, %v1080_v20 }
 0x13c   : > { %v771_v36 = vadd.f32 %v2408_v41, %v770_v29  ;;  %v1818_v40 = vpop.f32.mrb[30].mxu0  ;;  %v1098_v51 = vpack.c.bf16 %v1079_v60, %v1078_v25 }
 0x13d   : > { %v1052_v7 = vmul.f32 %v2411_v44, %v779_v28  ;;  %v782_v45 = vadd.f32 %v1818_v40, %v2408_v41  ;;  %v773_v55 = vpop.f32.mrb[31].mxu0 }
 0x13e   : > { %v1050_v58 = vmul.f32 %v2411_v44, %v771_v36  ;;  %v774_v61 = vadd.f32 %v2408_v41, %v773_v55  ;;  %1859 = vmatprep.mubr.bf16.mxu1 %v1098_v51 }
 0x13f   : > { %v1084_v52 = vadd.f32 %v1052_v7, %v2392_v27  ;;  %v1053_v10 = vmul.f32 %v2411_v44, %v782_v45  ;;  %1860 = vmatmul.mubr.bf16.gmra.mrb[24].mxu1 %v1099_v32  ;;  %v2515_v27 = vld [vmem:[%s2647_s7] ss:$0 sm:$0xff] }
 0x140   : > { %v1082_v34 = vadd.f32 %v1050_v58, %v2396_v31  ;;  %v1051_v13 = vmul.f32 %v2411_v44, %v774_v61 }
 0x141   : > { %v1085_v14 = vadd.f32 %v1053_v10, %v2400_v37 }
 0x142   : > { %v1083_v35 = vadd.f32 %v1051_v13, %v2402_v38 }
 0x143   : > { %v1101_v54 = vpack.c.bf16 %v1085_v14, %v1084_v52 }
 0x144   : > { %v1100_v56 = vpack.c.bf16 %v1083_v35, %v1082_v34 }
 0x146   : > { %1863 = vmatprep.mubr.bf16.mxu1 %v1100_v56 }
 0x147   : > { %1864 = vmatmul.mubr.bf16.gmra.mrb[28].mxu1 %v1101_v54 }
 0x1e2   : > { %v1837_v41 = vpop.f32.mrb[0].mxu1 }
 0x1e3   : > { %v1216_v31 = vadd.f32 %v1837_v41, %v2515_v27  ;;  %v1207_v44 = vpop.f32.mrb[1].mxu1 }
 0x1e4   : > { %v1208_v37 = vadd.f32 %v2515_v27, %v1207_v44  ;;  %v1838_v15 = vpop.f32.mrb[2].mxu1 }
 0x1e5   : > { %1336 = vst [vmem:[%s2519_s19 + $0x10] sm:$0xff] %v1216_v31  ;;  %v1219_v38 = vadd.f32 %v1838_v15, %v2515_v27  ;;  %v1210_v57 = vpop.f32.mrb[3].mxu1 }
 0x1e6   : > { %1334 = vst [vmem:[%s2519_s19] sm:$0xff] %v1208_v37  ;;  %v1211_v30 = vadd.f32 %v2515_v27, %v1210_v57 }
 0x1e7   : > { %1337 = vst [vmem:[%s2519_s19 + $0x18] sm:$0xff] %v1219_v38 }
 0x1e8   : > { %1335 = vst [vmem:[%s2519_s19 + $0x8] sm:$0xff] %v1211_v30 }
 0x1ea   : > { %v1841_v18 = vpop.f32.mrb[4].mxu1 }
 0x1eb   : > { %v1232_v62 = vadd.f32 %v1841_v18, %v2515_v27  ;;  %v1223_v21 = vpop.f32.mrb[5].mxu1 }
 0x1ec   : > { %v1224_v22 = vadd.f32 %v2515_v27, %v1223_v21  ;;  %v1842_v0 = vpop.f32.mrb[6].mxu1 }
 0x1ed   : > { %1340 = vst [vmem:[%s2519_s19 + $0x30] sm:$0xff] %v1232_v62  ;;  %v1235_v39 = vadd.f32 %v1842_v0, %v2515_v27  ;;  %v1226_v1 = vpop.f32.mrb[7].mxu1 }
 0x1ee   : > { %1338 = vst [vmem:[%s2519_s19 + $0x20] sm:$0xff] %v1224_v22  ;;  %v1227_v33 = vadd.f32 %v2515_v27, %v1226_v1 }
 0x1ef   : > { %1341 = vst [vmem:[%s2519_s19 + $0x38] sm:$0xff] %v1235_v39 }
 0x1f0   : > { %1339 = vst [vmem:[%s2519_s19 + $0x28] sm:$0xff] %v1227_v33 }
 0x1f2   : > { %v1845_v42 = vpop.f32.mrb[8].mxu1 }
 0x1f3   : > { %v1248_v2 = vadd.f32 %v1845_v42, %v2515_v27  ;;  %v1239_v47 = vpop.f32.mrb[9].mxu1 }
 0x1f4   : > { %v1240_v48 = vadd.f32 %v2515_v27, %v1239_v47  ;;  %v1846_v3 = vpop.f32.mrb[10].mxu1 }
 0x1f5   : > { %1344 = vst [vmem:[%s2519_s19 + $0x50] sm:$0xff] %v1248_v2  ;;  %v1251_v4 = vadd.f32 %v1846_v3, %v2515_v27  ;;  %v1242_v5 = vpop.f32.mrb[11].mxu1 }
 0x1f6   : > { %1342 = vst [vmem:[%s2519_s19 + $0x40] sm:$0xff] %v1240_v48  ;;  %v1243_v6 = vadd.f32 %v2515_v27, %v1242_v5 }
 0x1f7   : > { %1345 = vst [vmem:[%s2519_s19 + $0x58] sm:$0xff] %v1251_v4 }
 0x1f8   : > { %1343 = vst [vmem:[%s2519_s19 + $0x48] sm:$0xff] %v1243_v6 }
 0x1fa   : > { %v1849_v9 = vpop.f32.mrb[12].mxu1 }
 0x1fb   : > { %v1264_v11 = vadd.f32 %v1849_v9, %v2515_v27  ;;  %v1255_v16 = vpop.f32.mrb[13].mxu1 }
 0x1fc   : > { %v1256_v43 = vadd.f32 %v2515_v27, %v1255_v16  ;;  %v1850_v17 = vpop.f32.mrb[14].mxu1 }
 0x1fd   : > { %1348 = vst [vmem:[%s2519_s19 + $0x70] sm:$0xff] %v1264_v11  ;;  %v1267_v23 = vadd.f32 %v1850_v17, %v2515_v27  ;;  %v1258_v46 = vpop.f32.mrb[15].mxu1 }
 0x1fe   : > { %1346 = vst [vmem:[%s2519_s19 + $0x60] sm:$0xff] %v1256_v43  ;;  %v1259_v8 = vadd.f32 %v2515_v27, %v1258_v46 }
 0x1ff   : > { %1349 = vst [vmem:[%s2519_s19 + $0x78] sm:$0xff] %v1267_v23 }
 0x200   : > { %1347 = vst [vmem:[%s2519_s19 + $0x68] sm:$0xff] %v1259_v8 }
 0x202   : > { %v1853_v24 = vpop.f32.mrb[16].mxu1 }
 0x203   : > { %v1280_v49 = vadd.f32 %v1853_v24, %v2515_v27  ;;  %v1271_v12 = vpop.f32.mrb[17].mxu1 }
 0x204   : > { %v1272_v50 = vadd.f32 %v2515_v27, %v1271_v12  ;;  %v1854_v19 = vpop.f32.mrb[18].mxu1 }
 0x205   : > { %1352 = vst [vmem:[%s2519_s19 + $0x90] sm:$0xff] %v1280_v49  ;;  %v1283_v20 = vadd.f32 %v1854_v19, %v2515_v27  ;;  %v1274_v53 = vpop.f32.mrb[19].mxu1 }
 0x206   : > { %1350 = vst [vmem:[%s2519_s19 + $0x80] sm:$0xff] %v1272_v50  ;;  %v1275_v25 = vadd.f32 %v2515_v27, %v1274_v53 }
 0x207   : > { %1353 = vst [vmem:[%s2519_s19 + $0x98] sm:$0xff] %v1283_v20 }
 0x208   : > { %1351 = vst [vmem:[%s2519_s19 + $0x88] sm:$0xff] %v1275_v25 }
 0x20a   : > { %v1857_v26 = vpop.f32.mrb[20].mxu1 }
 0x20b   : > { %v1296_v59 = vadd.f32 %v1857_v26, %v2515_v27  ;;  %v1287_v60 = vpop.f32.mrb[21].mxu1 }
 0x20c   : > { %v1288_v63 = vadd.f32 %v2515_v27, %v1287_v60  ;;  %v1858_v28 = vpop.f32.mrb[22].mxu1 }
 0x20d   : > { %1356 = vst [vmem:[%s2519_s19 + $0xb0] sm:$0xff] %v1296_v59  ;;  %v1299_v29 = vadd.f32 %v1858_v28, %v2515_v27  ;;  %v1290_v32 = vpop.f32.mrb[23].mxu1 }
 0x20e   : > { %1354 = vst [vmem:[%s2519_s19 + $0xa0] sm:$0xff] %v1288_v63  ;;  %v1291_v36 = vadd.f32 %v2515_v27, %v1290_v32 }
 0x20f   : > { %1357 = vst [vmem:[%s2519_s19 + $0xb8] sm:$0xff] %v1299_v29 }
 0x210   : > { %1355 = vst [vmem:[%s2519_s19 + $0xa8] sm:$0xff] %v1291_v36 }
 0x212   : > { %v1861_v40 = vpop.f32.mrb[24].mxu1 }
 0x213   : > { %v1312_v51 = vadd.f32 %v1861_v40, %v2515_v27  ;;  %v1303_v7 = vpop.f32.mrb[25].mxu1 }
 0x214   : > { %v1304_v45 = vadd.f32 %v2515_v27, %v1303_v7  ;;  %v1862_v55 = vpop.f32.mrb[26].mxu1 }
 0x215   : > { %1360 = vst [vmem:[%s2519_s19 + $0xd0] sm:$0xff] %v1312_v51  ;;  %v1315_v58 = vadd.f32 %v1862_v55, %v2515_v27  ;;  %v1306_v61 = vpop.f32.mrb[27].mxu1 }
 0x216   : > { %1358 = vst [vmem:[%s2519_s19 + $0xc0] sm:$0xff] %v1304_v45  ;;  %v1307_v52 = vadd.f32 %v2515_v27, %v1306_v61 }
 0x217   : > { %1361 = vst [vmem:[%s2519_s19 + $0xd8] sm:$0xff] %v1315_v58 }
 0x218   : > { %1359 = vst [vmem:[%s2519_s19 + $0xc8] sm:$0xff] %v1307_v52 }
 0x21a   : > { %v1865_v10 = vpop.f32.mrb[28].mxu1 }
 0x21b   : > { %v1328_v34 = vadd.f32 %v1865_v10, %v2515_v27  ;;  %v1319_v13 = vpop.f32.mrb[29].mxu1 }
 0x21c   : > { %v1320_v14 = vadd.f32 %v2515_v27, %v1319_v13  ;;  %v1866_v35 = vpop.f32.mrb[30].mxu1 }
 0x21d   : > { %1364 = vst [vmem:[%s2519_s19 + $0xf0] sm:$0xff] %v1328_v34  ;;  %v1331_v54 = vadd.f32 %v1866_v35, %v2515_v27  ;;  %v1322_v56 = vpop.f32.mrb[31].mxu1 }
 0x21e   : > { %1362 = vst [vmem:[%s2519_s19 + $0xe0] sm:$0xff] %v1320_v14  ;;  %v1323_v41 = vadd.f32 %v2515_v27, %v1322_v56 }
 0x21f   : > { %1365 = vst [vmem:[%s2519_s19 + $0xf8] sm:$0xff] %v1331_v54 }
 0x220   : > { %1363 = vst [vmem:[%s2519_s19 + $0xe8] sm:$0xff] %v1323_v41 }
 0x221   : > { %1969 = shalt.err (!%p1966_p5)
}
 0x222   : > { %s1970_s12 = scalar_lea.hbm %s2584_s24, 4096  ;;  %s1974_s20 = scalar_lea.hbm %s2648_s8, 8192 }
 0x223   : > { %p1971_p6 = scmp.ne.s32.totalorder %s2584_s24, %s1970_s12  ;;  %p1975_p10 = scmp.lt.u32.totalorder %s2584_s24, %s2648_s8 }
 0x224   : > { %p1976_p11 = scmp.lt.u32.totalorder %s1974_s20, %s1970_s12  ;;  %p1978_p13 = scmp.lt.u32.totalorder %s1970_s12, %s2584_s24 }
 0x225   : > { %p1972_p7 = pnand %p1971_p6, %p2124_p4 }
 0x226   : > { %p1977_p12 = por %p1976_p11, %p1975_p10 }
 0x227   : > { %p1973_p9 = pneg %p1972_p7 }
 0x228   : > { %p1979_p0 = por %p1978_p13, %p1977_p12 }
 0x22a   : > { %p1980_p1 = pnand %p1979_p0, %p1973_p9 }
 0x22c   : > { %1983 = shalt.err (!%p1980_p1)
}
 0x22d   : > { %s2037_s25 = smov 128   ;;  %s2038_s11 = smov 8  }
 0x22e   : > { %1867 = dma.vmem_to_hbm [thread:$0]  (%p2124_p4), %s2586_s26, 4096, %s2584_s24, %s2594_s30, %s2037_s25, %s2037_s25, %s2038_s11  }
 0x22f PF: > { %p1873_p2 = scmp.ge.s32.totalorder %s2034_s10, 2  ;;  %s1397_s14 = sand.u32 1, %s2014_s27  }
 0x230   : > { %s1398_s16 = scalar_lea.sflag [#allocation3], %s1397_s14 }
 0x231   : > { %p1870_p3 = pnand %p1873_p2, %p2131_p8 }
 0x233   : > { %2009 = dma.done.wait (!%p1870_p3), %s1398_s16, 4096  }
 0x234   : > { %2011 = vsyncadd (!%p1870_p3), %s1398_s16, 4294963200  ;;  %s21_s10 = sadd.s32 1, %s2034_s10   ;;  %s2651_s27 = smov %s2018_s28 }
 0x235   : > { %p18_p5 = scmp.ge.s32.totalorder %s21_s10, 4   ;;  %s2652_s28 = smov %s2022_s29 }
 0x236   : > { %s2653_s29 = smov %s2137_s18  ;;  %s2654_s30 = smov %s2030_s9 }
 0x237   : > { %s2655_s9 = smov %s2657_s13  ;;  %20 = sbr.rel (!%p18_p5) target bundleno = 4 (0x4), region = 96 }
 0x23e   :  { %1403 = vsyncpa [#allocation3], 1 }
 0x23f   :  { %1405 = vsyncpa [#allocation3 + $0x1], 1 }

</bundles_post_ra>
